<compile_context>
chip_gen: v6e
topology: v6e:2x2x1
jax: 0.10.0
libtpu: 0.0.40
codegen_flags: <defaults>
</compile_context>

<pallas_src>
import functools

import jax
import jax.numpy as jnp
from jax.experimental import pallas as pl
from jax.experimental.pallas import tpu as pltpu

DIM = 32           # qns_encoder.dim_hidden
ATT_HIDDEN = 256   # TempAttention hidden_dim (as in HME.__init__)
NUM_CAND = 5
B_BLK = 8          # batch rows per grid step; sized comfortably for v7x's 64 MiB VMEM


# ----------------------------------------------------------------------------
# Pallas kernel: vq_encoder hot path for one batch block, all 5 candidates.
# ----------------------------------------------------------------------------
def _vq_encoder_kernel(q_ref, mem_ref, vis_ref,
                       wtext_ref, wvis_ref, watt_ref, wtail_ref,
                       vec512_ref, vec128_ref, bout_ref,
                       out_ref):
    Bb, C, D2 = q_ref.shape          # batch-block, candidates, 2*dim
    F = vis_ref.shape[1]             # frames
    D2b = vis_ref.shape[2]           # 2*D2 : app lanes || motion lanes
    H2 = wtext_ref.shape[1]          # 2*att_hidden : app-stream || motion-stream

    b_text = vec512_ref[0]           # (2H,)  = b_text_a || b_text_m
    b_vis = vec512_ref[1]            # (2H,)  = b_vis_a  || b_vis_m
    b_tail = vec128_ref[0]           # (128,) = b_vid | b_vid | b_mem | 0
    w_out = vec128_ref[1]            # (128,) = w_out[0:96] | 0

    # ---- fused text projection, all candidates of this block, one MXU dot
    tq = jnp.dot(q_ref[...].reshape(Bb * C, D2), wtext_ref[...],
                 preferred_element_type=jnp.float32) + b_text            # (Bb*C, 2H)
    tq3 = tq.reshape(Bb, C, H2)

    # ---- candidate-invariant visual projection (both streams, block-diag weight)
    vis = vis_ref[...]                                                    # (Bb, F, D2b) bf16
    tv = jnp.dot(vis.reshape(Bb * F, D2b), wvis_ref[...],
                 preferred_element_type=jnp.float32) + b_vis              # (Bb*F, 2H)
    tv3 = tv.reshape(Bb, F, H2)

    # ---- attention energies: only a (Bb, F, 2H) chunk is live per candidate;
    # the w_att contraction runs on the MXU with per-candidate output columns:
    # lane c = e_app[candidate c], lane C+c = e_motion[candidate c].
    e_acc = jnp.zeros((Bb * F, 128), jnp.float32)
    for c in range(C):               # static unroll, C = 5
        a_c = jnp.tanh(tq3[:, c:c + 1, :] + tv3)                          # (Bb, F, 2H) f32
        e_acc = e_acc + jnp.dot(a_c.reshape(Bb * F, H2), watt_ref[c],
                                preferred_element_type=jnp.float32)       # (Bb*F, 128)

    # ---- softmax over frames (sublane-axis reduce; candidate lanes stay in place)
    e3 = e_acc.reshape(Bb, F, 128)
    m = jnp.max(e3, axis=1, keepdims=True)
    p = jnp.exp(e3 - m)
    s = jnp.sum(p, axis=1, keepdims=True)
    beta = p * pl.reciprocal(s, approx=False)                             # (Bb, F, 128)

    # ---- temporal read: explicit app/motion halves as small batched MXU matmuls
    visf = vis.astype(jnp.float32)
    beta_app = jnp.swapaxes(beta[:, :, 0:C], 1, 2)                        # (Bb, C, F)
    beta_mot = jnp.swapaxes(beta[:, :, C:2 * C], 1, 2)                    # (Bb, C, F)
    att_app = jnp.einsum('bcf,bfd->bcd', beta_app, visf[:, :, :D2],
                         preferred_element_type=jnp.float32)              # (Bb, C, D2)
    att_mot = jnp.einsum('bcf,bfd->bcd', beta_mot, visf[:, :, D2:],
                         preferred_element_type=jnp.float32)              # (Bb, C, D2)
    att_out = jnp.concatenate([att_app, att_mot], axis=-1)                # (Bb, C, 2*D2)

    # ---- fused tail: [att_app | att_mot | mem] @ blockdiag(w_vid, w_vid, w_mem),
    # single tanh, packed w_out lane-multiply + reduce -> (Bb, C) logits
    x_tail = jnp.concatenate([att_out.astype(jnp.bfloat16), mem_ref[...]], axis=-1)
    t = jnp.tanh(jnp.dot(x_tail.reshape(Bb * C, 3 * D2), wtail_ref[...],
                         preferred_element_type=jnp.float32) + b_tail)    # (Bb*C, 128)
    logits = jnp.sum(t.reshape(Bb, C, 128) * w_out, axis=-1) + bout_ref[...]
    out_ref[...] = logits                                                 # (Bb, C)


# ----------------------------------------------------------------------------
# Weight packing (block-diagonal / fused slabs).  With params baked as jit
# constants (functools.partial below) this is constant-folded once at trace
# time; if params ever become traced arguments (training), hoist this call.
# ----------------------------------------------------------------------------
def _pack_vq_weights(params, C):
    f32, bf16 = jnp.float32, jnp.bfloat16
    D2, H = params["w_text_a"].shape          # (2*dim, att_hidden)
    dim = params["w_vid"].shape[1]
    H2 = 2 * H
    # layout sanity (review: guard the packing assumptions)
    assert params["w_vis_a"].shape == (D2, H) and params["w_vis_m"].shape == (D2, H)
    assert params["w_att_a"].shape == (1, H) and params["w_att_m"].shape == (1, H)
    assert params["w_vid"].shape == (D2, dim) and params["w_mem"].shape == (D2, dim)
    assert params["w_out"].shape == (3 * dim, 1)
    assert 2 * C <= 128 and 3 * dim <= 128

    w_text_both = jnp.concatenate(
        [params["w_text_a"], params["w_text_m"]], axis=1).astype(bf16)        # (D2, 2H)
    w_vis_bd = (jnp.zeros((2 * D2, H2), f32)
                .at[:D2, :H].set(params["w_vis_a"])
                .at[D2:, H:].set(params["w_vis_m"])).astype(bf16)             # (2*D2, 2H)

    # per-candidate block-diagonal w_att: lane c <- app energy, lane C+c <- motion
    w_att_all = jnp.zeros((C, H2, 128), f32)
    for c in range(C):
        w_att_all = (w_att_all
                     .at[c, :H, c].set(params["w_att_a"][0])
                     .at[c, H:, C + c].set(params["w_att_m"][0]))             # (C, 2H, 128)

    # fused tail weight: rows [att_app | att_mot | mem] -> cols [app_t | mot_t | mem_t | 0]
    w_tail = (jnp.zeros((3 * D2, 128), f32)
              .at[0:D2, 0:dim].set(params["w_vid"])
              .at[D2:2 * D2, dim:2 * dim].set(params["w_vid"])
              .at[2 * D2:, 2 * dim:3 * dim].set(params["w_mem"])).astype(bf16)

    vec512 = jnp.stack([
        jnp.concatenate([params["b_text_a"][0], params["b_text_m"][0]]),
        jnp.concatenate([params["b_vis_a"][0], params["b_vis_m"][0]]),
    ]).astype(f32)                                                            # (2, 2H)
    vec128 = (jnp.zeros((2, 128), f32)
              .at[0, 0:dim].set(params["b_vid"][0])
              .at[0, dim:2 * dim].set(params["b_vid"][0])
              .at[0, 2 * dim:3 * dim].set(params["b_mem"][0])
              .at[1, 0:3 * dim].set(params["w_out"][:, 0]))                   # (2, 128)
    b_out = params["b_out"].astype(f32)                                       # (1, 1)
    return w_text_both, w_vis_bd, w_att_all, w_tail, vec512, vec128, b_out


def vq_encoder_pallas(qns_embed, mem_output, outputs_app, outputs_motion, params,
                      b_blk=B_BLK):
    """qns_embed/mem_output: (C, B, 2*dim); outputs_*: (B, F, 2*dim) -> logits (B, C)."""
    C, B, D2 = qns_embed.shape
    _, F, _ = outputs_app.shape
    bf16 = jnp.bfloat16

    (w_text_both, w_vis_bd, w_att_all, w_tail,
     vec512, vec128, b_out) = _pack_vq_weights(params, C)
    H2 = w_text_both.shape[1]

    # batch-major activations (candidates kept as a small inner axis)
    q_b = jnp.transpose(qns_embed, (1, 0, 2)).astype(bf16)                    # (B, C, D2)
    mem_b = jnp.transpose(mem_output, (1, 0, 2)).astype(bf16)                 # (B, C, D2)
    vis_b = jnp.concatenate([outputs_app, outputs_motion], axis=-1).astype(bf16)  # (B, F, 2*D2)

    # pad batch to a multiple of the block; padded rows are sliced off afterwards
    Bp = pl.cdiv(B, b_blk) * b_blk
    if Bp != B:
        pad = ((0, Bp - B), (0, 0), (0, 0))
        q_b, mem_b, vis_b = jnp.pad(q_b, pad), jnp.pad(mem_b, pad), jnp.pad(vis_b, pad)

    grid_spec = pltpu.PrefetchScalarGridSpec(
        num_scalar_prefetch=0,
        grid=(Bp // b_blk,),
        in_specs=[
            pl.BlockSpec((b_blk, C, D2), lambda b: (b, 0, 0)),       # q
            pl.BlockSpec((b_blk, C, D2), lambda b: (b, 0, 0)),       # mem
            pl.BlockSpec((b_blk, F, 2 * D2), lambda b: (b, 0, 0)),   # vis (app || motion)
            pl.BlockSpec((D2, H2), lambda b: (0, 0)),                # w_text_both
            pl.BlockSpec((2 * D2, H2), lambda b: (0, 0)),            # w_vis_bd
            pl.BlockSpec((C, H2, 128), lambda b: (0, 0, 0)),         # w_att_all
            pl.BlockSpec((3 * D2, 128), lambda b: (0, 0)),           # w_tail
            pl.BlockSpec((2, H2), lambda b: (0, 0)),                 # vec512 (biases)
            pl.BlockSpec((2, 128), lambda b: (0, 0)),                # vec128 (b_tail, w_out)
            pl.BlockSpec((1, 1), lambda b: (0, 0)),                  # b_out
        ],
        out_specs=pl.BlockSpec((b_blk, C), lambda b: (b, 0)),
    )

    logits = pl.pallas_call(
        _vq_encoder_kernel,
        out_shape=jax.ShapeDtypeStruct((Bp, C), jnp.float32),
        grid_spec=grid_spec,
        compiler_params=pltpu.CompilerParams(
            # batch blocks are independent -> megacore-shard on v7x, no-op on 1-TC chips
            dimension_semantics=("parallel",),
            # footprint: ~1.7 MiB packed weights (+ double buffers) and a few MiB of
            # per-block f32 temporaries; 32 MiB leaves ample headroom on all of
            # v5e/v6e/v7x (well under v7x's 64 MiB physical VMEM).
            vmem_limit_bytes=32 * 1024 * 1024,
        ),
    )(q_b, mem_b, vis_b, w_text_both, w_vis_bd, w_att_all, w_tail,
      vec512, vec128, b_out)

    return logits[:B]                                                         # (B, C)


# ----------------------------------------------------------------------------
# Parameter init (deterministic, synthetic) + plain-JAX glue for the external
# encoder / memory sub-modules.
# ----------------------------------------------------------------------------
def init_params(key, visual_dim, emb_dim, dim=DIM, att_hidden=ATT_HIDDEN):
    ks = iter(jax.random.split(key, 24))

    def lin(i, o, scale=0.05):
        return scale * jax.random.normal(next(ks), (i, o), jnp.float32)

    p = {}
    # --- HME-owned parameters (consumed inside the Pallas kernel) ---
    p["w_text_a"] = lin(2 * dim, att_hidden)
    p["b_text_a"] = jnp.zeros((1, att_hidden), jnp.float32)
    p["w_vis_a"] = lin(2 * dim, att_hidden)
    p["b_vis_a"] = jnp.zeros((1, att_hidden), jnp.float32)
    p["w_att_a"] = lin(1, att_hidden)                      # Linear(hidden, 1, bias=False)
    p["w_text_m"] = lin(2 * dim, att_hidden)
    p["b_text_m"] = jnp.zeros((1, att_hidden), jnp.float32)
    p["w_vis_m"] = lin(2 * dim, att_hidden)
    p["b_vis_m"] = jnp.zeros((1, att_hidden), jnp.float32)
    p["w_att_m"] = lin(1, att_hidden)
    p["w_vid"] = lin(2 * dim, dim)
    p["b_vid"] = jnp.zeros((1, dim), jnp.float32)
    p["w_mem"] = lin(2 * dim, dim)
    p["b_mem"] = jnp.zeros((1, dim), jnp.float32)
    p["w_out"] = lin(3 * dim, 1)
    p["b_out"] = jnp.zeros((1, 1), jnp.float32)
    # --- synthetic stand-ins for the external encoder / memory sub-modules ---
    p["w_app1"] = lin(2 * visual_dim, dim)
    p["w_app2"] = lin(2 * visual_dim, dim)
    p["w_mot1"] = lin(2 * visual_dim, dim)
    p["w_mot2"] = lin(2 * visual_dim, dim)
    p["w_qseq"] = lin(emb_dim, 2 * dim)
    p["w_qhid"] = lin(emb_dim, 2 * dim)
    p["w_mm_v"] = lin(2 * dim, 2 * dim)
    p["w_mm_t"] = lin(2 * dim, 2 * dim)
    return p


def hme_forward(params, video_appearance_feat, video_motion_feat,
                candidates, candidates_len, obj_feature, dep_adj,
                question, question_len, obj_fea_q, dep_adj_q):
    del dep_adj, question, question_len, obj_fea_q, dep_adj_q  # unused by HME.forward

    # vid_feats = cat(appearance.mean(2), motion)  -> (B, F, 2*visual_dim)
    vid_feats = jnp.concatenate(
        [video_appearance_feat.mean(axis=2), video_motion_feat], axis=-1)

    # TODO(synk): vid_encoder is a two-stream, two-layer LSTM in the original;
    # approximated here with per-frame tanh(linear) projections of matching shape.
    app_l1 = jnp.tanh(vid_feats @ params["w_app1"])         # (B, F, dim)
    app_l2 = jnp.tanh(vid_feats @ params["w_app2"])
    mot_l1 = jnp.tanh(vid_feats @ params["w_mot1"])
    mot_l2 = jnp.tanh(vid_feats @ params["w_mot2"])
    outputs_app = jnp.concatenate([app_l1, app_l2], axis=-1)       # (B, F, 2*dim)
    outputs_motion = jnp.concatenate([mot_l1, mot_l2], axis=-1)    # (B, F, 2*dim)
    tmp_app_motion = jnp.concatenate(
        [app_l2[:, -1, :], mot_l2[:, -1, :]], axis=-1)             # (B, 2*dim)

    # candidates.permute(1,0,2,3) etc.
    cands = jnp.transpose(candidates, (1, 0, 2, 3))                # (5, B, L, E)
    objs = jnp.transpose(obj_feature, (1, 0, 2, 3))                # (5, B, L, E)
    cand_len = jnp.transpose(candidates_len, (1, 0))               # (5, B)

    # TODO(synk): qns_encoder (BERT/GRU question encoder) approximated with
    # length-masked tanh(linear) projections producing (seq output, hidden).
    L = cands.shape[2]
    mask = (jnp.arange(L)[None, None, :] < cand_len[:, :, None]).astype(jnp.float32)
    x = cands + objs
    qa_seq = jnp.tanh(x @ params["w_qseq"])                        # (5, B, L, 2*dim)
    denom = jnp.maximum(mask.sum(2), 1.0)[..., None]
    pooled = (x * mask[..., None]).sum(2) / denom                  # (5, B, E)
    qns_embed = jnp.tanh(pooled @ params["w_qhid"])                # (5, B, 2*dim)

    # TODO(synk): MemoryRamTwoStreamModule2 / MemoryRamModule2 / MMModule2
    # (iterative episodic memory) approximated with a single fused tanh(linear) read.
    qa_pool = (qa_seq * mask[..., None]).sum(2) / denom            # (5, B, 2*dim)
    mem_output = jnp.tanh(tmp_app_motion[None] @ params["w_mm_v"]
                          + qa_pool @ params["w_mm_t"])            # (5, B, 2*dim)

    # ------ Pallas kernel: vq_encoder hot path, batch-tiled grid, all candidates ------
    out = vq_encoder_pallas(qns_embed, mem_output,
                            outputs_app, outputs_motion, params)   # (B, 5)
    predict_idx = jnp.argmax(out, axis=1)
    return out, predict_idx


if __name__ == "__main__":
    key = jax.random.PRNGKey(0)
    B, num_clips, num_frames, visual_dim = 2, 8, 4, 16
    L, E = 8, 24

    k_in, k_p = jax.random.split(key)
    ks = jax.random.split(k_in, 6)
    video_appearance_feat = jax.random.normal(
        ks[0], (B, num_clips, num_frames, visual_dim), jnp.float32)
    video_motion_feat = jax.random.normal(ks[1], (B, num_clips, visual_dim), jnp.float32)
    candidates = jax.random.normal(ks[2], (B, NUM_CAND, L, E), jnp.float32)
    candidates_len = jnp.full((B, NUM_CAND), L, jnp.int32)
    obj_feature = jax.random.normal(ks[3], (B, NUM_CAND, L, E), jnp.float32)
    dep_adj = jnp.tile(jnp.eye(L, dtype=jnp.float32)[None], (B, 1, 1))
    question = jax.random.normal(ks[4], (B, NUM_CAND, L, E), jnp.float32)
    question_len = jnp.full((B, NUM_CAND), L, jnp.int32)
    obj_fea_q = jax.random.normal(ks[5], (B, NUM_CAND, L, E), jnp.float32)
    dep_adj_q = dep_adj

    params = init_params(k_p, visual_dim, E)

    fwd = jax.jit(functools.partial(hme_forward, params))
    out, predict_idx = fwd(video_appearance_feat, video_motion_feat,
                           candidates, candidates_len, obj_feature, dep_adj,
                           question, question_len, obj_fea_q, dep_adj_q)
    jax.block_until_ready((out, predict_idx))
    assert out.shape == (B, NUM_CAND) and predict_idx.shape == (B,)
    print("KERNEL_OK")
</pallas_src>

<mosaic_0001>
module attributes {stable_mosaic.version = 11 : i64} {
  func.func @_vq_encoder_kernel(%arg0: i32, %arg1: memref<8x5x64xbf16, #tpu.memory_space<vmem>>, %arg2: memref<8x5x64xbf16, #tpu.memory_space<vmem>>, %arg3: memref<8x8x128xbf16, #tpu.memory_space<vmem>>, %arg4: memref<64x512xbf16, #tpu.memory_space<vmem>>, %arg5: memref<128x512xbf16, #tpu.memory_space<vmem>>, %arg6: memref<5x512x128xf32, #tpu.memory_space<vmem>>, %arg7: memref<192x128xbf16, #tpu.memory_space<vmem>>, %arg8: memref<2x512xf32, #tpu.memory_space<vmem>>, %arg9: memref<2x128xf32, #tpu.memory_space<vmem>>, %arg10: memref<1x1xf32, #tpu.memory_space<vmem>>, %arg11: memref<8x5xf32, #tpu.memory_space<vmem>>) attributes {dimension_semantics = [#tpu.dimension_semantics<parallel>], iteration_bounds = array<i64: 1>, scalar_prefetch = 0 : i64, scratch_operands = 0 : i64, tpu.core_type = #tpu.core_type<tc>, window_params = [{transform_indices = @transform_0, window_bounds = array<i64: 8, 5, 64>}, {transform_indices = @transform_1, window_bounds = array<i64: 8, 5, 64>}, {transform_indices = @transform_2, window_bounds = array<i64: 8, 8, 128>}, {pipeline_mode = #tpu.pipeline_mode<synchronous>, transform_indices = @transform_3, window_bounds = array<i64: 64, 512>}, {pipeline_mode = #tpu.pipeline_mode<synchronous>, transform_indices = @transform_4, window_bounds = array<i64: 128, 512>}, {pipeline_mode = #tpu.pipeline_mode<synchronous>, transform_indices = @transform_5, window_bounds = array<i64: 5, 512, 128>}, {pipeline_mode = #tpu.pipeline_mode<synchronous>, transform_indices = @transform_6, window_bounds = array<i64: 192, 128>}, {pipeline_mode = #tpu.pipeline_mode<synchronous>, transform_indices = @transform_7, window_bounds = array<i64: 2, 512>}, {pipeline_mode = #tpu.pipeline_mode<synchronous>, transform_indices = @transform_8, window_bounds = array<i64: 2, 128>}, {pipeline_mode = #tpu.pipeline_mode<synchronous>, transform_indices = @transform_9, window_bounds = array<i64: 1, 1>}, {transform_indices = @transform_10, window_bounds = array<i64: 8, 5>}]} {
    %c0 = arith.constant 0 : index
    %c0_0 = arith.constant 0 : index
    %0 = vector.load %arg8[%c0, %c0_0] : memref<2x512xf32, #tpu.memory_space<vmem>>, vector<1x512xf32>
    %1 = vector.shape_cast %0 : vector<1x512xf32> to vector<512xf32>
    %c1 = arith.constant 1 : index
    %c0_1 = arith.constant 0 : index
    %2 = vector.load %arg8[%c1, %c0_1] : memref<2x512xf32, #tpu.memory_space<vmem>>, vector<1x512xf32>
    %3 = vector.shape_cast %2 : vector<1x512xf32> to vector<512xf32>
    %c0_2 = arith.constant 0 : index
    %c0_3 = arith.constant 0 : index
    %4 = vector.load %arg9[%c0_2, %c0_3] : memref<2x128xf32, #tpu.memory_space<vmem>>, vector<1x128xf32>
    %5 = vector.shape_cast %4 : vector<1x128xf32> to vector<128xf32>
    %c1_4 = arith.constant 1 : index
    %c0_5 = arith.constant 0 : index
    %6 = vector.load %arg9[%c1_4, %c0_5] : memref<2x128xf32, #tpu.memory_space<vmem>>, vector<1x128xf32>
    %7 = vector.shape_cast %6 : vector<1x128xf32> to vector<128xf32>
    %c0_6 = arith.constant 0 : index
    %c0_7 = arith.constant 0 : index
    %c0_8 = arith.constant 0 : index
    %8 = vector.load %arg1[%c0_6, %c0_7, %c0_8] : memref<8x5x64xbf16, #tpu.memory_space<vmem>>, vector<8x5x64xbf16>
    %9 = vector.shape_cast %8 : vector<8x5x64xbf16> to vector<40x64xbf16>
    %c0_9 = arith.constant 0 : index
    %c0_10 = arith.constant 0 : index
    %10 = vector.load %arg4[%c0_9, %c0_10] : memref<64x512xbf16, #tpu.memory_space<vmem>>, vector<64x512xbf16>
    %cst = arith.constant dense<0.000000e+00> : vector<40x512xf32>
    %11 = tpu.matmul %9, %10, %cst {dimension_numbers = #tpu.dot_dimension_numbers<[1], [0], [0], [1], [0, 0, 1, 1], [], []>} : vector<40x64xbf16>, vector<64x512xbf16>, vector<40x512xf32> -> vector<40x512xf32>
    %12 = vector.shape_cast %1 : vector<512xf32> to vector<1x512xf32>
    %13 = vector.broadcast %12 : vector<1x512xf32> to vector<40x512xf32>
    %14 = arith.addf %11, %13 : vector<40x512xf32>
    %15 = vector.shape_cast %14 : vector<40x512xf32> to vector<8x5x512xf32>
    %c0_11 = arith.constant 0 : index
    %c0_12 = arith.constant 0 : index
    %c0_13 = arith.constant 0 : index
    %16 = vector.load %arg3[%c0_11, %c0_12, %c0_13] : memref<8x8x128xbf16, #tpu.memory_space<vmem>>, vector<8x8x128xbf16>
    %17 = vector.shape_cast %16 : vector<8x8x128xbf16> to vector<64x128xbf16>
    %c0_14 = arith.constant 0 : index
    %c0_15 = arith.constant 0 : index
    %18 = vector.load %arg5[%c0_14, %c0_15] : memref<128x512xbf16, #tpu.memory_space<vmem>>, vector<128x512xbf16>
    %cst_16 = arith.constant dense<0.000000e+00> : vector<64x512xf32>
    %19 = tpu.matmul %17, %18, %cst_16 {dimension_numbers = #tpu.dot_dimension_numbers<[1], [0], [0], [1], [0, 0, 1, 1], [], []>} : vector<64x128xbf16>, vector<128x512xbf16>, vector<64x512xf32> -> vector<64x512xf32>
    %20 = vector.shape_cast %3 : vector<512xf32> to vector<1x512xf32>
    %21 = vector.broadcast %20 : vector<1x512xf32> to vector<64x512xf32>
    %22 = arith.addf %19, %21 : vector<64x512xf32>
    %23 = vector.shape_cast %22 : vector<64x512xf32> to vector<8x8x512xf32>
    %cst_17 = arith.constant 0.000000e+00 : f32
    %24 = vector.broadcast %cst_17 : f32 to vector<64x128xf32>
    %25 = vector.extract_strided_slice %15 {offsets = [0, 0, 0], sizes = [8, 1, 512], strides = [1, 1, 1]} : vector<8x5x512xf32> to vector<8x1x512xf32>
    %26 = vector.broadcast %25 : vector<8x1x512xf32> to vector<8x8x512xf32>
    %27 = arith.addf %26, %23 : vector<8x8x512xf32>
    %28 = math.tanh %27 : vector<8x8x512xf32>
    %29 = vector.shape_cast %28 : vector<8x8x512xf32> to vector<64x512xf32>
    %c0_18 = arith.constant 0 : index
    %c0_19 = arith.constant 0 : index
    %c0_20 = arith.constant 0 : index
    %30 = vector.load %arg6[%c0_18, %c0_19, %c0_20] : memref<5x512x128xf32, #tpu.memory_space<vmem>>, vector<1x512x128xf32>
    %31 = vector.shape_cast %30 : vector<1x512x128xf32> to vector<512x128xf32>
    %cst_21 = arith.constant dense<0.000000e+00> : vector<64x128xf32>
    %32 = tpu.matmul %29, %31, %cst_21 {dimension_numbers = #tpu.dot_dimension_numbers<[1], [0], [0], [1], [0, 0, 1, 1], [], []>} : vector<64x512xf32>, vector<512x128xf32>, vector<64x128xf32> -> vector<64x128xf32>
    %33 = arith.addf %24, %32 : vector<64x128xf32>
    %34 = vector.extract_strided_slice %15 {offsets = [0, 1, 0], sizes = [8, 1, 512], strides = [1, 1, 1]} : vector<8x5x512xf32> to vector<8x1x512xf32>
    %35 = vector.broadcast %34 : vector<8x1x512xf32> to vector<8x8x512xf32>
    %36 = arith.addf %35, %23 : vector<8x8x512xf32>
    %37 = math.tanh %36 : vector<8x8x512xf32>
    %38 = vector.shape_cast %37 : vector<8x8x512xf32> to vector<64x512xf32>
    %c1_22 = arith.constant 1 : index
    %c0_23 = arith.constant 0 : index
    %c0_24 = arith.constant 0 : index
    %39 = vector.load %arg6[%c1_22, %c0_23, %c0_24] : memref<5x512x128xf32, #tpu.memory_space<vmem>>, vector<1x512x128xf32>
    %40 = vector.shape_cast %39 : vector<1x512x128xf32> to vector<512x128xf32>
    %cst_25 = arith.constant dense<0.000000e+00> : vector<64x128xf32>
    %41 = tpu.matmul %38, %40, %cst_25 {dimension_numbers = #tpu.dot_dimension_numbers<[1], [0], [0], [1], [0, 0, 1, 1], [], []>} : vector<64x512xf32>, vector<512x128xf32>, vector<64x128xf32> -> vector<64x128xf32>
    %42 = arith.addf %33, %41 : vector<64x128xf32>
    %43 = vector.extract_strided_slice %15 {offsets = [0, 2, 0], sizes = [8, 1, 512], strides = [1, 1, 1]} : vector<8x5x512xf32> to vector<8x1x512xf32>
    %44 = vector.broadcast %43 : vector<8x1x512xf32> to vector<8x8x512xf32>
    %45 = arith.addf %44, %23 : vector<8x8x512xf32>
    %46 = math.tanh %45 : vector<8x8x512xf32>
    %47 = vector.shape_cast %46 : vector<8x8x512xf32> to vector<64x512xf32>
    %c2 = arith.constant 2 : index
    %c0_26 = arith.constant 0 : index
    %c0_27 = arith.constant 0 : index
    %48 = vector.load %arg6[%c2, %c0_26, %c0_27] : memref<5x512x128xf32, #tpu.memory_space<vmem>>, vector<1x512x128xf32>
    %49 = vector.shape_cast %48 : vector<1x512x128xf32> to vector<512x128xf32>
    %cst_28 = arith.constant dense<0.000000e+00> : vector<64x128xf32>
    %50 = tpu.matmul %47, %49, %cst_28 {dimension_numbers = #tpu.dot_dimension_numbers<[1], [0], [0], [1], [0, 0, 1, 1], [], []>} : vector<64x512xf32>, vector<512x128xf32>, vector<64x128xf32> -> vector<64x128xf32>
    %51 = arith.addf %42, %50 : vector<64x128xf32>
    %52 = vector.extract_strided_slice %15 {offsets = [0, 3, 0], sizes = [8, 1, 512], strides = [1, 1, 1]} : vector<8x5x512xf32> to vector<8x1x512xf32>
    %53 = vector.broadcast %52 : vector<8x1x512xf32> to vector<8x8x512xf32>
    %54 = arith.addf %53, %23 : vector<8x8x512xf32>
    %55 = math.tanh %54 : vector<8x8x512xf32>
    %56 = vector.shape_cast %55 : vector<8x8x512xf32> to vector<64x512xf32>
    %c3 = arith.constant 3 : index
    %c0_29 = arith.constant 0 : index
    %c0_30 = arith.constant 0 : index
    %57 = vector.load %arg6[%c3, %c0_29, %c0_30] : memref<5x512x128xf32, #tpu.memory_space<vmem>>, vector<1x512x128xf32>
    %58 = vector.shape_cast %57 : vector<1x512x128xf32> to vector<512x128xf32>
    %cst_31 = arith.constant dense<0.000000e+00> : vector<64x128xf32>
    %59 = tpu.matmul %56, %58, %cst_31 {dimension_numbers = #tpu.dot_dimension_numbers<[1], [0], [0], [1], [0, 0, 1, 1], [], []>} : vector<64x512xf32>, vector<512x128xf32>, vector<64x128xf32> -> vector<64x128xf32>
    %60 = arith.addf %51, %59 : vector<64x128xf32>
    %61 = vector.extract_strided_slice %15 {offsets = [0, 4, 0], sizes = [8, 1, 512], strides = [1, 1, 1]} : vector<8x5x512xf32> to vector<8x1x512xf32>
    %62 = vector.broadcast %61 : vector<8x1x512xf32> to vector<8x8x512xf32>
    %63 = arith.addf %62, %23 : vector<8x8x512xf32>
    %64 = math.tanh %63 : vector<8x8x512xf32>
    %65 = vector.shape_cast %64 : vector<8x8x512xf32> to vector<64x512xf32>
    %c4 = arith.constant 4 : index
    %c0_32 = arith.constant 0 : index
    %c0_33 = arith.constant 0 : index
    %66 = vector.load %arg6[%c4, %c0_32, %c0_33] : memref<5x512x128xf32, #tpu.memory_space<vmem>>, vector<1x512x128xf32>
    %67 = vector.shape_cast %66 : vector<1x512x128xf32> to vector<512x128xf32>
    %cst_34 = arith.constant dense<0.000000e+00> : vector<64x128xf32>
    %68 = tpu.matmul %65, %67, %cst_34 {dimension_numbers = #tpu.dot_dimension_numbers<[1], [0], [0], [1], [0, 0, 1, 1], [], []>} : vector<64x512xf32>, vector<512x128xf32>, vector<64x128xf32> -> vector<64x128xf32>
    %69 = arith.addf %60, %68 : vector<64x128xf32>
    %70 = vector.shape_cast %69 : vector<64x128xf32> to vector<8x8x128xf32>
    %cst_35 = arith.constant dense<0xFF800000> : vector<8x128xf32>
    %71 = vector.multi_reduction <maximumf>, %70, %cst_35 [1] : vector<8x8x128xf32> to vector<8x128xf32>
    %72 = vector.shape_cast %71 : vector<8x128xf32> to vector<8x1x128xf32>
    %73 = vector.broadcast %72 : vector<8x1x128xf32> to vector<8x8x128xf32>
    %74 = arith.subf %70, %73 : vector<8x8x128xf32>
    %75 = math.exp %74 : vector<8x8x128xf32>
    %cst_36 = arith.constant dense<0.000000e+00> : vector<8x128xf32>
    %76 = vector.multi_reduction <add>, %75, %cst_36 [1] : vector<8x8x128xf32> to vector<8x128xf32>
    %77 = vector.shape_cast %76 : vector<8x128xf32> to vector<8x1x128xf32>
    %78 = tpu.reciprocal %77 : vector<8x1x128xf32> -> vector<8x1x128xf32>
    %79 = vector.broadcast %78 : vector<8x1x128xf32> to vector<8x8x128xf32>
    %80 = arith.mulf %75, %79 : vector<8x8x128xf32>
    %81 = arith.extf %16 : vector<8x8x128xbf16> to vector<8x8x128xf32>
    %82 = vector.extract_strided_slice %80 {offsets = [0, 0, 0], sizes = [8, 8, 5], strides = [1, 1, 1]} : vector<8x8x128xf32> to vector<8x8x5xf32>
    %83 = tpu.transpose %82, [0, 2, 1] : vector<8x8x5xf32> -> vector<8x5x8xf32>
    %84 = vector.extract_strided_slice %80 {offsets = [0, 0, 5], sizes = [8, 8, 5], strides = [1, 1, 1]} : vector<8x8x128xf32> to vector<8x8x5xf32>
    %85 = tpu.transpose %84, [0, 2, 1] : vector<8x8x5xf32> -> vector<8x5x8xf32>
    %86 = vector.extract_strided_slice %81 {offsets = [0, 0, 0], sizes = [8, 8, 64], strides = [1, 1, 1]} : vector<8x8x128xf32> to vector<8x8x64xf32>
    "tpu.trace_start"() <{level = 10 : i32, message = "bcf,bfd->bcd"}> : () -> ()
    %cst_37 = arith.constant dense<0.000000e+00> : vector<8x5x64xf32>
    %87 = tpu.matmul %83, %86, %cst_37 {dimension_numbers = #tpu.dot_dimension_numbers<[2], [1], [1], [2], [0, 0, 0, 1, 1, 2], [0], [0]>} : vector<8x5x8xf32>, vector<8x8x64xf32>, vector<8x5x64xf32> -> vector<8x5x64xf32>
    "tpu.trace_stop"() : () -> ()
    %88 = vector.extract_strided_slice %81 {offsets = [0, 0, 64], sizes = [8, 8, 64], strides = [1, 1, 1]} : vector<8x8x128xf32> to vector<8x8x64xf32>
    "tpu.trace_start"() <{level = 10 : i32, message = "bcf,bfd->bcd"}> : () -> ()
    %cst_38 = arith.constant dense<0.000000e+00> : vector<8x5x64xf32>
    %89 = tpu.matmul %85, %88, %cst_38 {dimension_numbers = #tpu.dot_dimension_numbers<[2], [1], [1], [2], [0, 0, 0, 1, 1, 2], [0], [0]>} : vector<8x5x8xf32>, vector<8x8x64xf32>, vector<8x5x64xf32> -> vector<8x5x64xf32>
    "tpu.trace_stop"() : () -> ()
    %90 = tpu.concatenate %87, %89 in 2 : vector<8x5x64xf32>, vector<8x5x64xf32> -> vector<8x5x128xf32>
    %91 = arith.truncf %90 : vector<8x5x128xf32> to vector<8x5x128xbf16>
    %c0_39 = arith.constant 0 : index
    %c0_40 = arith.constant 0 : index
    %c0_41 = arith.constant 0 : index
    %92 = vector.load %arg2[%c0_39, %c0_40, %c0_41] : memref<8x5x64xbf16, #tpu.memory_space<vmem>>, vector<8x5x64xbf16>
    %93 = tpu.concatenate %91, %92 in 2 : vector<8x5x128xbf16>, vector<8x5x64xbf16> -> vector<8x5x192xbf16>
    %94 = vector.shape_cast %93 : vector<8x5x192xbf16> to vector<40x192xbf16>
    %c0_42 = arith.constant 0 : index
    %c0_43 = arith.constant 0 : index
    %95 = vector.load %arg7[%c0_42, %c0_43] : memref<192x128xbf16, #tpu.memory_space<vmem>>, vector<192x128xbf16>
    %cst_44 = arith.constant dense<0.000000e+00> : vector<40x128xf32>
    %96 = tpu.matmul %94, %95, %cst_44 {dimension_numbers = #tpu.dot_dimension_numbers<[1], [0], [0], [1], [0, 0, 1, 1], [], []>} : vector<40x192xbf16>, vector<192x128xbf16>, vector<40x128xf32> -> vector<40x128xf32>
    %97 = vector.shape_cast %5 : vector<128xf32> to vector<1x128xf32>
    %98 = vector.broadcast %97 : vector<1x128xf32> to vector<40x128xf32>
    %99 = arith.addf %96, %98 : vector<40x128xf32>
    %100 = math.tanh %99 : vector<40x128xf32>
    %101 = vector.shape_cast %100 : vector<40x128xf32> to vector<8x5x128xf32>
    %102 = vector.shape_cast %7 : vector<128xf32> to vector<1x1x128xf32>
    %103 = vector.broadcast %102 : vector<1x1x128xf32> to vector<8x5x128xf32>
    %104 = arith.mulf %101, %103 : vector<8x5x128xf32>
    %cst_45 = arith.constant dense<0.000000e+00> : vector<8x5xf32>
    %105 = vector.multi_reduction <add>, %104, %cst_45 [2] : vector<8x5x128xf32> to vector<8x5xf32>
    %c0_46 = arith.constant 0 : index
    %c0_47 = arith.constant 0 : index
    %106 = vector.load %arg10[%c0_46, %c0_47] : memref<1x1xf32, #tpu.memory_space<vmem>>, vector<1x1xf32>
    %107 = vector.broadcast %106 : vector<1x1xf32> to vector<8x5xf32>
    %108 = arith.addf %105, %107 : vector<8x5xf32>
    %c0_48 = arith.constant 0 : index
    %c0_49 = arith.constant 0 : index
    %109 = vector.load %arg11[%c0_48, %c0_49] : memref<8x5xf32, #tpu.memory_space<vmem>>, vector<8x5xf32>
    tpu.vector_store %arg11[%c0_48, %c0_49], %108 {strides = array<i32>} : memref<8x5xf32, #tpu.memory_space<vmem>>, vector<8x5xf32>,
    return
  }
  func.func @transform_0(%arg0: i32) -> (i32, i32, i32) {
    %c0_i32 = arith.constant 0 : i32
    %c0_i32_0 = arith.constant 0 : i32
    %c0_i32_1 = arith.constant 0 : i32
    return %arg0, %c0_i32, %c0_i32_0 : i32, i32, i32
  }
  func.func @transform_1(%arg0: i32) -> (i32, i32, i32) {
    %c0_i32 = arith.constant 0 : i32
    %c0_i32_0 = arith.constant 0 : i32
    %c0_i32_1 = arith.constant 0 : i32
    return %arg0, %c0_i32, %c0_i32_0 : i32, i32, i32
  }
  func.func @transform_2(%arg0: i32) -> (i32, i32, i32) {
    %c0_i32 = arith.constant 0 : i32
    %c0_i32_0 = arith.constant 0 : i32
    %c0_i32_1 = arith.constant 0 : i32
    return %arg0, %c0_i32, %c0_i32_0 : i32, i32, i32
  }
  func.func @transform_3(%arg0: i32) -> (i32, i32) {
    %c0_i32 = arith.constant 0 : i32
    %c0_i32_0 = arith.constant 0 : i32
    %c0_i32_1 = arith.constant 0 : i32
    return %c0_i32, %c0_i32_0 : i32, i32
  }
  func.func @transform_4(%arg0: i32) -> (i32, i32) {
    %c0_i32 = arith.constant 0 : i32
    %c0_i32_0 = arith.constant 0 : i32
    %c0_i32_1 = arith.constant 0 : i32
    return %c0_i32, %c0_i32_0 : i32, i32
  }
  func.func @transform_5(%arg0: i32) -> (i32, i32, i32) {
    %c0_i32 = arith.constant 0 : i32
    %c0_i32_0 = arith.constant 0 : i32
    %c0_i32_1 = arith.constant 0 : i32
    %c0_i32_2 = arith.constant 0 : i32
    return %c0_i32, %c0_i32_0, %c0_i32_1 : i32, i32, i32
  }
  func.func @transform_6(%arg0: i32) -> (i32, i32) {
    %c0_i32 = arith.constant 0 : i32
    %c0_i32_0 = arith.constant 0 : i32
    %c0_i32_1 = arith.constant 0 : i32
    return %c0_i32, %c0_i32_0 : i32, i32
  }
  func.func @transform_7(%arg0: i32) -> (i32, i32) {
    %c0_i32 = arith.constant 0 : i32
    %c0_i32_0 = arith.constant 0 : i32
    %c0_i32_1 = arith.constant 0 : i32
    return %c0_i32, %c0_i32_0 : i32, i32
  }
  func.func @transform_8(%arg0: i32) -> (i32, i32) {
    %c0_i32 = arith.constant 0 : i32
    %c0_i32_0 = arith.constant 0 : i32
    %c0_i32_1 = arith.constant 0 : i32
    return %c0_i32, %c0_i32_0 : i32, i32
  }
  func.func @transform_9(%arg0: i32) -> (i32, i32) {
    %c0_i32 = arith.constant 0 : i32
    %c0_i32_0 = arith.constant 0 : i32
    %c0_i32_1 = arith.constant 0 : i32
    return %c0_i32, %c0_i32_0 : i32, i32
  }
  func.func @transform_10(%arg0: i32) -> (i32, i32) {
    %c0_i32 = arith.constant 0 : i32
    %c0_i32_0 = arith.constant 0 : i32
    return %arg0, %c0_i32 : i32, i32
  }
}

</mosaic_0001>

<bundles_post_ra>
// kernel: hme_forward.1
= control target key start
LH: loop header
LB: loop body
LE: loop exit
PB: predicated region body
PF: predicated region fallthrough
CT: control target
= control target key end

     0   :  { %s10566_s0 = inlined_call_operand.vmem [shape: bf16[8,5,64], index: 0, kind: input, shape index: {}]   ;;  %s10567_s1 = inlined_call_operand.vmem [shape: bf16[8,5,64], index: 1, kind: input, shape index: {}]   ;;  %s10568_s2 = inlined_call_operand.vmem [shape: bf16[8,8,128], index: 2, kind: input, shape index: {}]   ;;  %s10569_s3 = inlined_call_operand.hbm [shape: bf16[64,512], index: 3, kind: input, shape index: {}]   ;;  %s10570_s4 = inlined_call_operand.hbm [shape: bf16[128,512], index: 4, kind: input, shape index: {}]   ;;  %s10571_s5 = inlined_call_operand.hbm [shape: f32[5,512,128], index: 5, kind: input, shape index: {}]   ;;  %s10572_s6 = inlined_call_operand.hbm [shape: bf16[192,128], index: 6, kind: input, shape index: {}]   ;;  %s10573_s7 = inlined_call_operand.vmem [shape: f32[2,512], index: 7, kind: input, shape index: {}]   ;;  %s10574_s8 = inlined_call_operand.vmem [shape: f32[2,128], index: 8, kind: input, shape index: {}]   ;;  %s10575_s9 = inlined_call_operand.<no memory space> [shape: f32[1,1], index: 9, kind: input, shape index: {}]   ;;  %s10576_s10 = inlined_call_operand.vmem [shape: f32[8,5], index: 10, kind: output, shape index: {}]  }
   0x1   :  { %v15_v0 = vstv %s10575_s9 }
   0x2   :  { %16 = vst [vmem:[#allocation2] sm:$0x1] %v15_v0 }
   0x3   :  { %17 = vsyncpa [#allocation4], 0 }
   0x4   :  { %18 = vsyncpa [#allocation6], 0 }
   0x5   :  { %19 = vsyncpa [#allocation9], 0  ;;  %s8778_s15 = smov [#allocation5]   ;;  %s8779_s17 = smov [#allocation3]  }
   0x6   :  { %s43_s16 = sshll.u32 %s8778_s15, 4  ;;  %s31_s18 = sshll.u32 %s8779_s17, 4  ;;  %s44_s16 = int_to_ptr.vmem [resolvable:$true] %s43_s16  ;;  %s32_s18 = int_to_ptr.vmem [resolvable:$true] %s31_s18 }
   0x7   :  { %s8700_s19 = scalar_lea.vmem %s44_s16, 4096  ;;  %p8705_p1 = scmp.lt.s32.totalorder %s44_s16, %s44_s16 }
   0x8   :  { %p8701_p0 = scmp.ne.s32.totalorder %s44_s16, %s8700_s19  ;;  %p8706_p2 = scmp.lt.s32.totalorder %s8700_s19, %s8700_s19 }
   0xa   :  { %p8707_p3 = por %p8706_p2, %p8705_p1 }
   0xc   :  { %p8708_p4 = pnand %p8707_p3, %p8701_p0 }
   0xe   :  { %8711 = shalt.err (!%p8708_p4)
}
   0xf   :  { %s8780_s20 = smov 256   ;;  %s8781_s21 = smov 16  }
  0x10   :  { %49 = dma.hbm_to_vmem [thread:$0]  %s10570_s4, 4096, %s44_s16, [#allocation6], %s8780_s20, %s8780_s20, %s8781_s21  }
  0x11   :  { %s8720_s23 = scalar_lea.vmem %s32_s18, 2048  ;;  %p8725_p6 = scmp.lt.s32.totalorder %s32_s18, %s32_s18 }
  0x12   :  { %p8721_p5 = scmp.ne.s32.totalorder %s32_s18, %s8720_s23  ;;  %p8726_p7 = scmp.lt.s32.totalorder %s8720_s23, %s8720_s23 }
  0x14   :  { %p8727_p8 = por %p8726_p7, %p8725_p6 }
  0x16   :  { %p8728_p9 = pnand %p8727_p8, %p8721_p5 }
  0x18   :  { %8731 = shalt.err (!%p8728_p9)
}
  0x19   :  { %37 = dma.hbm_to_vmem [thread:$0]  %s10569_s3, 2048, %s32_s18, [#allocation4], %s8780_s20, %s8780_s20, %s8781_s21  }
  0x1a   :  { %s8782_s26 = smov [#allocation7]  }
  0x1b   :  { %s55_s27 = sshll.u32 %s8782_s26, 4  ;;  %s56_s27 = int_to_ptr.vmem [resolvable:$true] %s55_s27 }
  0x1c   :  { %s8740_s28 = scalar_lea.vmem %s56_s27, 40960  ;;  %p8745_p11 = scmp.lt.s32.totalorder %s56_s27, %s56_s27 }
  0x1d   :  { %p8741_p10 = scmp.ne.s32.totalorder %s56_s27, %s8740_s28  ;;  %p8746_p12 = scmp.lt.s32.totalorder %s8740_s28, %s8740_s28 }
  0x1f   :  { %p8747_p13 = por %p8746_p12, %p8745_p11 }
  0x21   :  { %p8748_p0 = pnand %p8747_p13, %p8741_p10 }
  0x23   :  { %8751 = shalt.err (!%p8748_p0)
}
  0x24   :  { %s8783_s4 = smov 128   ;;  %s8784_s29 = smov 8  }
  0x25   :  { %61 = dma.hbm_to_vmem [thread:$0]  %s10571_s5, 40960, %s56_s27, [#allocation6], %s8783_s4, %s8783_s4, %s8784_s29  }
  0x26   :  { %s8785_s12 = smov [#allocation8]  }
  0x27   :  { %s67_s13 = sshll.u32 %s8785_s12, 4  ;;  %s68_s13 = int_to_ptr.vmem [resolvable:$true] %s67_s13 }
  0x28   :  { %s8760_s3 = scalar_lea.vmem %s68_s13, 1536  ;;  %p8765_p2 = scmp.lt.s32.totalorder %s68_s13, %s68_s13 }
  0x29   :  { %p8761_p1 = scmp.ne.s32.totalorder %s68_s13, %s8760_s3  ;;  %p8766_p3 = scmp.lt.s32.totalorder %s8760_s3, %s8760_s3 }
  0x2b   :  { %p8767_p4 = por %p8766_p3, %p8765_p2 }
  0x2d   :  { %p8768_p5 = pnand %p8767_p4, %p8761_p1 }
  0x2f   :  { %8771 = shalt.err (!%p8768_p5)
}
  0x30   :  { %s8786_s14 = smov 64   ;;  %s8787_s15 = smov 4  }
  0x31   :  { %73 = dma.hbm_to_vmem [thread:$0]  %s10572_s6, 1536, %s68_s13, [#allocation9], %s8786_s14, %s8786_s14, %s8787_s15  }
  0x32   :  { %8772 = dma.done.wait [#allocation4], 2048  }
  0x33   :  { %8773 = vsyncadd [#allocation4], 4294965248 }
  0x34   :  { %8774 = dma.done.wait [#allocation6], 45056  }
  0x35   :  { %8775 = vsyncadd [#allocation6], 4294922240 }
  0x36   :  { %8776 = dma.done.wait [#allocation9], 1536  }
  0x37   :  { %8777 = vsyncadd [#allocation9], 4294965760  ;;  %v10578_v1 = vmov 0   ;;  %v8234_v2 = vld [vmem:[#allocation3 + $0x64] ss:$16 sps:$4 sm:$0xff]   ;;  %v10577_v5 = vlaneseq  ;;  %vm597_vm0 = vcmask 523264  }
  0x38   :  { %639 = vmatprep.mubr.bf16.mxu0 %v10578_v1  ;;  %700 = vmatprep.mubr.bf16.mxu1 %v10578_v1  ;;  %v8789_v3 = vmov 1966171168   ;;  %v8236_v6 = vld [vmem:[#allocation3 + $0x6c] ss:$16 sps:$4 sm:$0xff]   ;;  %v8238_v7 = vld [vmem:[#allocation3 + $0x60] ss:$16 sps:$4 sm:$0xff]  }
  0x39   :  { %v123_v4 = vunpack.c.l.s4 %v8789_v3  ;;  %615 = vmatprep.subr.bf16.mxu0 %v8234_v2  ;;  %v8239_v8 = vld [vmem:[#allocation3 + $0x68] ss:$16 sps:$4 sm:$0xff]   ;;  %676 = vmatprep.subr.bf16.mxu1 %v8236_v6  ;;  %v8240_v9 = vld [vmem:[#allocation3 + $0x44] ss:$16 sps:$4 sm:$0xff]   ;;  %v8242_v10 = vld [vmem:[#allocation3 + $0x4c] ss:$16 sps:$4 sm:$0xff]  }
  0x3a   :  { %616 = vmatpush1.bf16.msra.mxu0 %v8238_v7  ;;  %677 = vmatpush1.bf16.msra.mxu1 %v8239_v8  ;;  %v8244_v11 = vld [vmem:[#allocation3 + $0x40] ss:$16 sps:$4 sm:$0xff]   ;;  %v8868_v13 = vshrl.u32 %v10577_v5, 7  ;;  %v8245_v14 = vld [vmem:[#allocation3 + $0x48] ss:$16 sps:$4 sm:$0xff]   ;;  %s8790_s23 = smov 123  }
  0x3b   :  { %v124_v12 = vunpack.c.0.s8 %v123_v4  ;;  %617 = vmatprep.subr.bf16.mxu0 %v8240_v9  ;;  %678 = vmatprep.subr.bf16.mxu1 %v8242_v10  ;;  %v8246_v15 = vld [vmem:[#allocation3 + $0x24] ss:$16 sps:$4 sm:$0xff]   ;;  %v8248_v16 = vld [vmem:[#allocation3 + $0x2c] ss:$16 sps:$4 sm:$0xff]   ;;  %v8250_v17 = vld [vmem:[#allocation3 + $0x20] ss:$16 sps:$4 sm:$0xff]  }
  0x3c   :  { %10646 = vst [vmem:[#allocation13_spill] sm:$0xff] %v8868_v13  ;;  %v8251_v18 = vld [vmem:[#allocation3 + $0x28] ss:$16 sps:$4 sm:$0xff]   ;;  %v8252_v19 = vld [vmem:[#allocation3 + $0x4] ss:$16 sps:$4 sm:$0xff]   ;;  %vm8792_vm1 = vmmov 0  }
  0x3d   :  { %v8871_v20 = vsub.s32 %v124_v12, %v8868_v13  ;;  %v8254_v21 = vld [vmem:[#allocation3 + $0xc] ss:$16 sps:$4 sm:$0xff]   ;;  %v8256_v22 = vld [vmem:[#allocation3] ss:$16 sps:$4 sm:$0xff]   ;;  %v8257_v24 = vld [vmem:[#allocation3 + $0x8] ss:$16 sps:$4 sm:$0xff]  }
  0x3e   :  { %618 = vmatpush1.bf16.msra.mxu0 %v8244_v11  ;;  %679 = vmatpush1.bf16.msra.mxu1 %v8245_v14  ;;  %v7397_v23 = vld.sshfl [vmem:[%s10566_s0] sm:$0x13 pattern:$0x75316420]  ;;  %v8260_v31 = vld [vmem:[#allocation5 + $0xe4] ss:$16 sps:$4 sm:$0xff]  }
  0x3f   :  { %10647 = vst [vmem:[#allocation14_spill] sm:$0xff] %v8871_v20  ;;  %619 = vmatprep.subr.bf16.mxu0 %v8246_v15  ;;  %680 = vmatprep.subr.bf16.mxu1 %v8248_v16  ;;  %v7398_v25 = vld.sshfl [vmem:[%s10566_s0 + $0x4] sm:$0x13 pattern:$0x75316420]  ;;  %v121_v26 = vcombine.high %v7397_v23, %v7397_v23  ;;  %v128_v27 = vrot.slane %v7397_v23, %v8871_v20  ;;  %vm4686_vm2 = vcmask 64512  }
  0x40   :  { %v7399_v28 = vld.sshfl [vmem:[%s10566_s0 + $0x8] sm:$0x13 pattern:$0x75316420]  ;;  %v144_v29 = vcombine.high %v7398_v25, %v7398_v25  ;;  %v151_v30 = vrot.slane %v7398_v25, %v8871_v20  ;;  %vm7287_vm3 = vcmask 1044480   ;;  %vm7372_vm4 = vcmask 1041409  }
  0x41   :  { %v7400_v32 = vld.sshfl [vmem:[%s10566_s0 + $0xc] sm:$0x13 pattern:$0x75316420]  ;;  %v135_v33 = vrot.slane %v121_v26, %v8871_v20  ;;  %v136_v34 = vcombine.high %v128_v27, %v128_v27  ;;  %v167_v35 = vcombine.high %v7399_v28, %v7399_v28  ;;  %v174_v36 = vrot.slane %v7399_v28, %v8871_v20  ;;  %v2041_v5 = vld [vmem:[#allocation7 + $0x380] sm:$0xff] }
  0x42   :  { %620 = vmatpush1.bf16.msra.mxu0 %v8250_v17  ;;  %681 = vmatpush1.bf16.msra.mxu1 %v8251_v18  ;;  %v158_v37 = vrot.slane %v144_v29, %v8871_v20  ;;  %v159_v38 = vcombine.high %v151_v30, %v151_v30  ;;  %v197_v39 = vrot.slane %v7400_v32, %v8871_v20  ;;  %v304_v40 = vunpack.i.h.s16 %v151_v30  ;;  %v7401_v47 = vld.sshfl [vmem:[%s10566_s0 + $0x10] sm:$0x13 pattern:$0x75316420] }
  0x43   :  { %621 = vmatprep.subr.bf16.mxu0 %v8252_v19  ;;  %682 = vmatprep.subr.bf16.mxu1 %v8254_v21  ;;  %v181_v41 = vrot.slane %v167_v35, %v8871_v20  ;;  %v182_v42 = vcombine.high %v174_v36, %v174_v36  ;;  %v7405_v43 = vpack.i.b16 %v151_v30, %v136_v34  ;;  %v7402_v50 = vld.sshfl [vmem:[%s10566_s0 + $0x14] sm:$0x13 pattern:$0x75316420]  ;;  %vm7374_vm5 = vcmask 1042434  }
  0x44   :  { %v306_v44 = vunpack.i.h.s16 %v158_v37  ;;  %v7406_v45 = vpack.i.b16 %v158_v37, %v304_v40  ;;  %v395_v46 = vcombine.low %v128_v27, %v135_v33  ;;  %v190_v48 = vcombine.high %v7400_v32, %v7400_v32  ;;  %v7403_v57 = vld.sshfl [vmem:[%s10566_s0 + $0x18] sm:$0x13 pattern:$0x75316420]  ;;  %v8258_v32 = vld [vmem:[#allocation5 + $0xe0] ss:$16 sps:$4 sm:$0xff]  }
  0x45   :  { %v7408_v49 = vpack.i.b16 %v197_v39, %v182_v42  ;;  %v205_v51 = vcombine.high %v197_v39, %v197_v39  ;;  %v213_v52 = vcombine.high %v7401_v47, %v7401_v47  ;;  %v220_v53 = vrot.slane %v7401_v47, %v8871_v20  ;;  %v7404_v18 = vld.sshfl [vmem:[%s10566_s0 + $0x1c] sm:$0x13 pattern:$0x75316420]  ;;  %v8263_v37 = vld [vmem:[#allocation5 + $0xc4] ss:$16 sps:$4 sm:$0xff]  }
  0x46   :  { %622 = vmatpush1.bf16.msra.mxu0 %v8256_v22  ;;  %683 = vmatpush1.bf16.msra.mxu1 %v8257_v24  ;;  %v7407_v54 = vpack.i.b16 %v159_v38, %v306_v44  ;;  %v396_v55 = vcombine.low %v7405_v43, %v7406_v45  ;;  %v405_v56 = vrot.slane %v395_v46, %v8871_v20  ;;  %v314_v7 = vunpack.i.h.s16 %v197_v39  ;;  %v8261_v47 = vld [vmem:[#allocation5 + $0xc0] ss:$16 sps:$4 sm:$0xff]  }
  0x47   :  { %1334 = vmatprep.subr.bf16.mxu1 %v8260_v31  ;;  %v204_v58 = vrot.slane %v190_v48, %v8871_v20  ;;  %v398_v59 = vcombine.low %v181_v41, %v7408_v49  ;;  %v227_v60 = vrot.slane %v213_v52, %v8871_v20  ;;  %v228_v61 = vcombine.high %v220_v53, %v220_v53 }
  0x48   :  { %v236_v62 = vcombine.high %v7402_v50, %v7402_v50  ;;  %v397_v63 = vcombine.low %v7407_v54, %v174_v36  ;;  %v412_v0 = vrot.slane %v396_v55, %v8871_v20  ;;  %v243_v2 = vrot.slane %v7402_v50, %v8871_v20 }
  0x49   :  { %v266_v3 = vrot.slane %v7403_v57, %v8871_v20  ;;  %v426_v4 = vrot.slane %v398_v59, %v8871_v20  ;;  %v316_v8 = vunpack.i.h.s16 %v204_v58  ;;  %v7409_v15 = vpack.i.b16 %v204_v58, %v314_v7  ;;  %v8269_v59 = vld [vmem:[#allocation5 + $0x84] ss:$16 sps:$4 sm:$0xff]   ;;  %v8276_v7 = vld [vmem:[#allocation5 + $0x20] ss:$16 sps:$4 sm:$0xff]  }
  0x4a   :  { %v250_v6 = vrot.slane %v236_v62, %v8871_v20  ;;  %v419_v9 = vrot.slane %v397_v63, %v8871_v20  ;;  %v427_v10 = vcombine.low %v405_v56, %v412_v0  ;;  %v251_v11 = vcombine.high %v243_v2, %v243_v2  ;;  %v8272_v62 = vld [vmem:[#allocation5 + $0x64] ss:$16 sps:$4 sm:$0xff]   ;;  %v8270_v0 = vld [vmem:[#allocation5 + $0x60] ss:$16 sps:$4 sm:$0xff]  }
  0x4b   :  { %v324_v12 = vunpack.i.h.s16 %v243_v2  ;;  %v7410_v16 = vpack.i.b16 %v205_v51, %v316_v8  ;;  %v7411_v17 = vpack.i.b16 %v243_v2, %v228_v61  ;;  %v445_v23 = vcombine.low %v220_v53, %v227_v60  ;;  %v8266_v51 = vld [vmem:[#allocation5 + $0xa4] ss:$16 sps:$4 sm:$0xff]   ;;  %v8267_v61 = vld [vmem:[#allocation5 + $0x80] ss:$16 sps:$4 sm:$0xff]  }
  0x4c   :  { %v326_v14 = vunpack.i.h.s16 %v250_v6  ;;  %v428_v19 = vcombine.low %v419_v9, %v426_v4  ;;  %v435_v21 = vrot.slane %v427_v10, %v8871_v20  ;;  %v259_v26 = vcombine.high %v7403_v57, %v7403_v57  ;;  %v8264_v57 = vld [vmem:[#allocation5 + $0xa0] ss:$16 sps:$4 sm:$0xff]   ;;  %v8281_v8 = vld [vmem:[#allocation5 + $0x4] ss:$16 sps:$4 sm:$0xff]  }
  0x4d   :  { %v7412_v22 = vpack.i.b16 %v250_v6, %v324_v12  ;;  %v444_v25 = vcombine.low %v7409_v15, %v7410_v16  ;;  %v274_v27 = vcombine.high %v266_v3, %v266_v3  ;;  %v461_v30 = vrot.slane %v445_v23, %v8871_v20  ;;  %v8273_v4 = vld [vmem:[#allocation5 + $0x40] ss:$16 sps:$4 sm:$0xff]   ;;  %v8278_v6 = vld [vmem:[#allocation5 + $0x24] ss:$16 sps:$4 sm:$0xff]   ;;  %v8283_v12 = vld [vmem:[#allocation5 + $0xe8] ss:$16 sps:$4 sm:$0xff]  }
  0x4e   :  { %v7413_v24 = vpack.i.b16 %v251_v11, %v326_v14  ;;  %v442_v28 = vrot.slane %v428_v19, %v8871_v20  ;;  %v282_v31 = vcombine.high %v7404_v18, %v7404_v18  ;;  %v289_v35 = vrot.slane %v7404_v18, %v8871_v20  ;;  %v8279_v9 = vld [vmem:[#allocation5] ss:$16 sps:$4 sm:$0xff]   ;;  %v8285_v11 = vld [vmem:[#allocation5 + $0xec] ss:$16 sps:$4 sm:$0xff]   ;;  %v8286_v15 = vld [vmem:[#allocation5 + $0xc8] ss:$16 sps:$4 sm:$0xff]  }
  0x4f   :  { %v446_v29 = vcombine.low %v7411_v17, %v7412_v22  ;;  %v454_v34 = vrot.slane %v444_v25, %v8871_v20  ;;  %v273_v39 = vrot.slane %v259_v26, %v8871_v20  ;;  %v1089_v10 = vld [vmem:[%s10568_s2] sm:$0xff]   ;;  %v1091_v16 = vld [vmem:[%s10568_s2 + $0x8] sm:$0xff]   ;;  %v1093_v22 = vld [vmem:[%s10568_s2 + $0x10] sm:$0xff]   ;;  %vm7376_vm6 = vcmask 1043459  }
  0x50   :  { %v447_v33 = vcombine.low %v7413_v24, %v266_v3  ;;  %v443_v36 = vcombine.low %v435_v21, %v442_v28  ;;  %v296_v40 = vrot.slane %v282_v31, %v8871_v20  ;;  %v297_v43 = vcombine.high %v289_v35, %v289_v35  ;;  %v8275_v3 = vld [vmem:[#allocation5 + $0x44] ss:$16 sps:$4 sm:$0xff]   ;;  %v8288_v14 = vld [vmem:[#allocation5 + $0xcc] ss:$16 sps:$4 sm:$0xff]   ;;  %v8290_v18 = vld [vmem:[#allocation5 + $0xa8] ss:$16 sps:$4 sm:$0xff]  }
  0x51   :  { %v468_v38 = vrot.slane %v446_v29, %v8871_v20  ;;  %v476_v42 = vcombine.low %v454_v34, %v461_v30  ;;  %v334_v44 = vunpack.i.h.s16 %v289_v35  ;;  %v7414_v46 = vpack.i.b16 %v289_v35, %v274_v27  ;;  %v8292_v17 = vld [vmem:[#allocation5 + $0xac] ss:$16 sps:$4 sm:$0xff]   ;;  %v8293_v21 = vld [vmem:[#allocation5 + $0x88] ss:$16 sps:$4 sm:$0xff]   ;;  %v2023_v34 = vld [vmem:[#allocation7 + $0x2f0] sm:$0xff] }
  0x52   :  { %v475_v41 = vrot.slane %v447_v33, %v8871_v20  ;;  %7433 = vmatmul.mubr.msk.bf16.vlgmr.msra.gmra.mxu0 %vm597_vm0, %v443_v36  ;;  %7436 = vmatmul.mubr.msk.bf16.vlgmr.msra.gmra.mxu1 %vm597_vm0, %v443_v36  ;;  %v336_v45 = vunpack.i.h.s16 %v296_v40  ;;  %v8295_v19 = vld [vmem:[#allocation5 + $0x8c] ss:$16 sps:$4 sm:$0xff]   ;;  %v8297_v24 = vld [vmem:[#allocation5 + $0x68] ss:$16 sps:$4 sm:$0xff]   ;;  %v2007_v35 = vld [vmem:[#allocation7 + $0x270] sm:$0xff]  ;;  %vm7378_vm7 = vcmask 1044484  }
  0x53   :  { %1335 = vmatpush1.bf16.msra.mxu1 %v8258_v32  ;;  %649 = vmatprep.mubr.bf16.mxu0 %v10578_v1  ;;  %v484_v49 = vrot.slane %v476_v42, %v8871_v20  ;;  %v7415_v50 = vpack.i.b16 %v296_v40, %v334_v44  ;;  %v493_v53 = vcombine.low %v273_v39, %v7414_v46  ;;  %v8299_v23 = vld [vmem:[#allocation5 + $0x6c] ss:$16 sps:$4 sm:$0xff]   ;;  %v8300_v26 = vld [vmem:[#allocation5 + $0x48] ss:$16 sps:$4 sm:$0xff]   ;;  %v2005_v39 = vld [vmem:[#allocation7 + $0x260] sm:$0xff]  ;;  %vm7380_vm8 = vcmask 1045509  }
  0x54   :  { %v477_v48 = vcombine.low %v468_v38, %v475_v41  ;;  %1336 = vmatprep.subr.bf16.mxu1 %v8263_v37  ;;  %710 = vmatprep.mubr.bf16.mxu1 %v10578_v1  ;;  %v7416_v52 = vpack.i.b16 %v297_v43, %v336_v45  ;;  %v8302_v25 = vld [vmem:[#allocation5 + $0x4c] ss:$16 sps:$4 sm:$0xff]   ;;  %v8304_v29 = vld [vmem:[#allocation5 + $0x28] ss:$16 sps:$4 sm:$0xff]   ;;  %v2021_v38 = vld [vmem:[#allocation7 + $0x2e0] sm:$0xff]  ;;  %vm7382_vm9 = vcmask 1046534  }
  0x55   :  { %v501_v56 = vrot.slane %v493_v53, %v8871_v20  ;;  %v1095_v27 = vld [vmem:[%s10568_s2 + $0x18] sm:$0xff]   ;;  %v2022_v36 = vld [vmem:[#allocation7 + $0x2e8] sm:$0xff]  ;;  %v2017_v46 = vld [vmem:[#allocation7 + $0x2c0] sm:$0xff]  ;;  %vm7384_vm10 = vcmask 1047559   ;;  %vm7387_vm11 = vcmask 39936  }
  0x56   :  { %v491_v54 = vrot.slane %v477_v48, %v8871_v20  ;;  %v494_v55 = vcombine.low %v7415_v50, %v7416_v52  ;;  %v8306_v28 = vld [vmem:[#allocation5 + $0x2c] ss:$16 sps:$4 sm:$0xff]   ;;  %v8307_v31 = vld [vmem:[#allocation5 + $0x8] ss:$16 sps:$4 sm:$0xff]   ;;  %v2019_v42 = vld [vmem:[#allocation7 + $0x2d0] sm:$0xff] }
  0x57   :  { %1337 = vmatpush1.bf16.msra.mxu1 %v8261_v47  ;;  %v8309_v30 = vld [vmem:[#allocation5 + $0xc] ss:$16 sps:$4 sm:$0xff]   ;;  %v2003_v43 = vld [vmem:[#allocation7 + $0x250] sm:$0xff]  ;;  %v2001_v47 = vld [vmem:[#allocation7 + $0x240] sm:$0xff] }
  0x58   :  { %v492_v58 = vcombine.low %v484_v49, %v491_v54  ;;  %1338 = vmatprep.subr.bf16.mxu1 %v8266_v51  ;;  %v508_v60 = vrot.slane %v494_v55, %v8871_v20  ;;  %v2024_v32 = vld [vmem:[#allocation7 + $0x2f8] sm:$0xff]  ;;  %v2006_v37 = vld [vmem:[#allocation7 + $0x268] sm:$0xff]  ;;  %v2015_v50 = vld [vmem:[#allocation7 + $0x2b0] sm:$0xff] }
  0x59   :  { %7521 = vmatprep.subr.mxu0 %v2024_v32  ;;  %v2008_v33 = vld [vmem:[#allocation7 + $0x278] sm:$0xff]  ;;  %v2018_v44 = vld [vmem:[#allocation7 + $0x2c8] sm:$0xff]  ;;  %v1999_v51 = vld [vmem:[#allocation7 + $0x230] sm:$0xff] }
  0x5a   :  { %7434 = vmatmul.mubr.msk.bf16.gmra.mxu0 %vm597_vm0, %v492_v58  ;;  %7437 = vmatmul.mubr.msk.bf16.gmra.mxu1 %vm597_vm0, %v492_v58  ;;  %v509_v63 = vcombine.low %v501_v56, %v508_v60  ;;  %v2020_v40 = vld [vmem:[#allocation7 + $0x2d8] sm:$0xff]  ;;  %v2002_v45 = vld [vmem:[#allocation7 + $0x248] sm:$0xff]  ;;  %v2013_v54 = vld [vmem:[#allocation7 + $0x2a0] sm:$0xff] }
  0x5b   :  { %1339 = vmatpush1.bf16.msra.mxu1 %v8264_v57  ;;  %720 = vmatprep.mubr.bf16.mxu1 %v10578_v1  ;;  %v2004_v41 = vld [vmem:[#allocation7 + $0x258] sm:$0xff]  ;;  %v2014_v52 = vld [vmem:[#allocation7 + $0x2a8] sm:$0xff]  ;;  %v1997_v55 = vld [vmem:[#allocation7 + $0x220] sm:$0xff] }
  0x5c   :  { %1340 = vmatprep.subr.bf16.mxu1 %v8269_v59  ;;  %659 = vmatprep.mubr.bf16.mxu0 %v10578_v1  ;;  %v516_v2 = vrot.slane %v509_v63, %v8871_v20  ;;  %v2016_v48 = vld [vmem:[#allocation7 + $0x2b8] sm:$0xff]  ;;  %v1998_v53 = vld [vmem:[#allocation7 + $0x228] sm:$0xff]  ;;  %v2011_v58 = vld [vmem:[#allocation7 + $0x290] sm:$0xff] }
  0x5d   :  { %7522 = vmatpush3.msra.mxu0 %v2008_v33  ;;  %v2000_v49 = vld [vmem:[#allocation7 + $0x238] sm:$0xff]  ;;  %v1995_v59 = vld [vmem:[#allocation7 + $0x210] sm:$0xff]  ;;  %v2010_v60 = vld [vmem:[#allocation7 + $0x288] sm:$0xff] }
  0x5e   :  { %7523 = vmatprep.subr.mxu0 %v2023_v34  ;;  %v2012_v56 = vld [vmem:[#allocation7 + $0x298] sm:$0xff]  ;;  %v1993_v63 = vld [vmem:[#allocation7 + $0x200] sm:$0xff] }
  0x5f   :  { %1341 = vmatpush1.bf16.msra.mxu1 %v8267_v61  ;;  %7524 = vmatpush3.msra.mxu0 %v2007_v35  ;;  %v1996_v57 = vld [vmem:[#allocation7 + $0x218] sm:$0xff]  ;;  %v1994_v61 = vld [vmem:[#allocation7 + $0x208] sm:$0xff] }
  0x60   :  { %1342 = vmatprep.subr.bf16.mxu1 %v8272_v62  ;;  %7525 = vmatprep.subr.mxu0 %v2022_v36  ;;  %v2009_v62 = vld [vmem:[#allocation7 + $0x280] sm:$0xff] }
  0x61   :  { %7526 = vmatpush3.msra.mxu0 %v2006_v37 }
  0x62   :  { %7438 = vmatmul.mubr.msk.bf16.gmra.mxu1 %vm597_vm0, %v516_v2  ;;  %7435 = vmatmul.mubr.msk.bf16.gmra.mxu0 %vm597_vm0, %v516_v2  ;;  %v1735_v2 = vld [vmem:[#allocation7 + $0xf8] sm:$0xff] }
  0x63   :  { %1343 = vmatpush1.bf16.msra.mxu1 %v8270_v0  ;;  %1366 = vmatprep.mubr.bf16.mxu1 %v10578_v1  ;;  %v2056_v0 = vld [vmem:[#allocation7 + $0x3f8] sm:$0xff] }
  0x64   :  { %1344 = vmatprep.subr.bf16.mxu1 %v8275_v3  ;;  %7527 = vmatprep.subr.mxu0 %v2021_v38  ;;  %v2040_v3 = vld [vmem:[#allocation7 + $0x378] sm:$0xff]  ;;  %v2049_v38 = vld [vmem:[#allocation7 + $0x3c0] sm:$0xff] }
  0x65   :  { %7528 = vmatpush3.msra.mxu0 %v2005_v39  ;;  %v2033_v39 = vld [vmem:[#allocation7 + $0x340] sm:$0xff] }
  0x66   :  { %7529 = vmatprep.subr.mxu0 %v2020_v40 }
  0x67   :  { %1345 = vmatpush1.bf16.msra.mxu1 %v8273_v4  ;;  %7530 = vmatpush3.msra.mxu0 %v2004_v41  ;;  %v2055_v4 = vld [vmem:[#allocation7 + $0x3f0] sm:$0xff] }
  0x68   :  { %1346 = vmatprep.subr.bf16.mxu1 %v8278_v6  ;;  %7531 = vmatprep.subr.mxu0 %v2019_v42  ;;  %v2039_v6 = vld [vmem:[#allocation7 + $0x370] sm:$0xff] }
  0x69   :  { %7532 = vmatpush3.msra.mxu0 %v2003_v43 }
  0x6a   :  { %7533 = vmatprep.subr.mxu0 %v2018_v44 }
  0x6b   :  { %1347 = vmatpush1.bf16.msra.mxu1 %v8276_v7  ;;  %7534 = vmatpush3.msra.mxu0 %v2002_v45  ;;  %v2054_v7 = vld [vmem:[#allocation7 + $0x3e8] sm:$0xff] }
  0x6c   :  { %1348 = vmatprep.subr.bf16.mxu1 %v8281_v8  ;;  %7535 = vmatprep.subr.mxu0 %v2017_v46  ;;  %v2038_v8 = vld [vmem:[#allocation7 + $0x368] sm:$0xff] }
  0x6d   :  { %7536 = vmatpush3.msra.mxu0 %v2001_v47 }
  0x6e   :  { %7537 = vmatprep.subr.mxu0 %v2016_v48 }
  0x6f   :  { %1349 = vmatpush1.bf16.msra.mxu1 %v8279_v9  ;;  %7538 = vmatpush3.msra.mxu0 %v2000_v49  ;;  %v2053_v9 = vld [vmem:[#allocation7 + $0x3e0] sm:$0xff] }
  0x70   :  { %1407 = vmatprep.subr.bf16.mxu1 %v8285_v11  ;;  %7539 = vmatprep.subr.mxu0 %v2015_v50  ;;  %v2052_v11 = vld [vmem:[#allocation7 + $0x3d8] sm:$0xff] }
  0x71   :  { %7540 = vmatpush3.msra.mxu0 %v1999_v51 }
  0x72   :  { %1367 = vmatmul.mubr.bf16.vlgmr.msra.gmra.mxu1 %v1089_v10  ;;  %7541 = vmatprep.subr.mxu0 %v2014_v52 }
  0x73   :  { %1408 = vmatpush1.bf16.msra.mxu1 %v8283_v12  ;;  %1376 = vmatprep.mubr.bf16.mxu1 %v10578_v1  ;;  %v2036_v12 = vld [vmem:[#allocation7 + $0x358] sm:$0xff] }
  0x74   :  { %1409 = vmatprep.subr.bf16.mxu1 %v8288_v14  ;;  %7542 = vmatpush3.msra.mxu0 %v1998_v53  ;;  %v8959_v14 = vsub.s32 0, %v8868_v13 }
  0x75   :  { %7543 = vmatprep.subr.mxu0 %v2013_v54 }
  0x76   :  { %7544 = vmatpush3.msra.mxu0 %v1997_v55 }
  0x77   :  { %1410 = vmatpush1.bf16.msra.mxu1 %v8286_v15  ;;  %7545 = vmatprep.subr.mxu0 %v2012_v56  ;;  %v2051_v15 = vld [vmem:[#allocation7 + $0x3d0] sm:$0xff] }
  0x78   :  { %1411 = vmatprep.subr.bf16.mxu1 %v8292_v17  ;;  %7546 = vmatpush3.msra.mxu0 %v1996_v57  ;;  %v8962_v17 = vsub.s32 2, %v8868_v13  ;;  %v1716_v57 = vld [vmem:[#allocation7 + $0x60] sm:$0xff] }
  0x79   :  { %7547 = vmatprep.subr.mxu0 %v2011_v58  ;;  %v2048_v58 = vld [vmem:[#allocation7 + $0x3b8] sm:$0xff] }
  0x7a   :  { %1377 = vmatmul.mubr.bf16.gmra.mxu1 %v1091_v16  ;;  %7548 = vmatpush3.msra.mxu0 %v1995_v59  ;;  %v2032_v59 = vld [vmem:[#allocation7 + $0x338] sm:$0xff] }
  0x7b   :  { %1412 = vmatpush1.bf16.msra.mxu1 %v8290_v18  ;;  %1386 = vmatprep.mubr.bf16.mxu1 %v10578_v1  ;;  %v8965_v18 = vsub.s32 1, %v8868_v13 }
  0x7c   :  { %1413 = vmatprep.subr.bf16.mxu1 %v8295_v19  ;;  %7549 = vmatprep.subr.mxu0 %v2010_v60  ;;  %v8968_v19 = vsub.s32 3, %v8868_v13  ;;  %v1707_v13 = vld [vmem:[#allocation7 + $0x18] sm:$0xff] }
  0x7d   :  { %7550 = vmatpush3.msra.mxu0 %v1994_v61 }
  0x7e   :  { %7551 = vmatprep.subr.mxu0 %v2009_v62 }
  0x7f   :  { %1414 = vmatpush1.bf16.msra.mxu1 %v8293_v21  ;;  %7552 = vmatpush3.msra.mxu0 %v1993_v63  ;;  %v93_v21 = vld [vmem:[%s10573_s7] ss:$2 sm:$0xf] }
  0x80   :  { %1415 = vmatprep.subr.bf16.mxu1 %v8299_v23  ;;  %7633 = vmatprep.subr.mxu0 %v1735_v2  ;;  %v8977_v23 = vrot.slane %v93_v21, %v8962_v17 }
  0x82   :  { %1387 = vmatmul.mubr.bf16.gmra.mxu1 %v1093_v22 }
  0x83   :  { %1416 = vmatpush1.bf16.msra.mxu1 %v8297_v24  ;;  %1396 = vmatprep.mubr.bf16.mxu1 %v10578_v1  ;;  %v8980_v24 = vrot.slane %v93_v21, %v8965_v18 }
  0x84   :  { %1417 = vmatprep.subr.bf16.mxu1 %v8302_v25  ;;  %v8983_v25 = vrot.slane %v93_v21, %v8968_v19 }
  0x87   :  { %1418 = vmatpush1.bf16.msra.mxu1 %v8300_v26  ;;  %v2050_v26 = vld [vmem:[#allocation7 + $0x3c8] sm:$0xff] }
  0x88   :  { %1419 = vmatprep.subr.bf16.mxu1 %v8306_v28 }
  0x8a   :  { %1397 = vmatmul.mubr.bf16.gmra.mxu1 %v1095_v27 }
  0x8b   :  { %1420 = vmatpush1.bf16.msra.mxu1 %v8304_v29  ;;  %1439 = vmatprep.mubr.bf16.mxu1 %v10578_v1 }
  0x8c   :  { %1421 = vmatprep.subr.bf16.mxu1 %v8309_v30 }
  0x8f   :  { %1422 = vmatpush1.bf16.msra.mxu1 %v8307_v31 }
  0x90   :  { %7577 = vmatprep.subr.mxu1 %v2056_v0 }
  0x92   :  { %1440 = vmatmul.mubr.bf16.vlgmr.msra.gmra.mxu1 %v1089_v10  ;;  %v2037_v10 = vld [vmem:[#allocation7 + $0x360] sm:$0xff] }
  0x93   :  { %1449 = vmatprep.mubr.bf16.mxu1 %v10578_v1  ;;  %7578 = vmatpush3.msra.mxu1 %v2040_v3 }
  0x94   :  { %7579 = vmatprep.subr.mxu1 %v2055_v4 }
  0x95   :  { %7580 = vmatpush3.msra.mxu1 %v2039_v6  ;;  %v1734_v6 = vld [vmem:[#allocation7 + $0xf0] sm:$0xff] }
  0x96   :  { %7581 = vmatprep.subr.mxu1 %v2054_v7  ;;  %v1717_v7 = vld [vmem:[#allocation7 + $0x68] sm:$0xff] }
  0x97   :  { %7582 = vmatpush3.msra.mxu1 %v2038_v8 }
  0x98   :  { %7583 = vmatprep.subr.mxu1 %v2053_v9 }
  0x99   :  { %7584 = vmatpush3.msra.mxu1 %v2037_v10  ;;  %v2047_v10 = vld [vmem:[#allocation7 + $0x3b0] sm:$0xff] }
  0x9a   :  { %1450 = vmatmul.mubr.bf16.gmra.mxu1 %v1091_v16  ;;  %7585 = vmatprep.subr.mxu1 %v2052_v11  ;;  %v2035_v16 = vld [vmem:[#allocation7 + $0x350] sm:$0xff] }
  0x9b   :  { %1459 = vmatprep.mubr.bf16.mxu1 %v10578_v1  ;;  %7586 = vmatpush3.msra.mxu1 %v2036_v12  ;;  %v2031_v11 = vld [vmem:[#allocation7 + $0x330] sm:$0xff] }
  0x9c   :  { %7587 = vmatprep.subr.mxu1 %v2051_v15 }
  0x9d   :  { %7588 = vmatpush3.msra.mxu1 %v2035_v16 }
  0x9e   :  { %7589 = vmatprep.subr.mxu1 %v2050_v26 }
  0xa2   :  { %1460 = vmatmul.mubr.bf16.gmra.mxu1 %v1093_v22  ;;  %v8974_v22 = vrot.slane %v93_v21, %v8959_v14 }
  0xa3   :  { %1469 = vmatprep.mubr.bf16.mxu1 %v10578_v1  ;;  %v1767_v1 = vld [vmem:[#allocation7 + $0x1f8] sm:$0xff] }
  0xaa   :  { %1470 = vmatmul.mubr.bf16.gmra.mxu1 %v1095_v27  ;;  %v2034_v27 = vld [vmem:[#allocation7 + $0x348] sm:$0xff] }
  0xab   :  { %7590 = vmatpush3.msra.mxu1 %v2034_v27 }
  0xac   :  { %7591 = vmatprep.subr.mxu1 %v2049_v38 }
  0xad   :  { %7592 = vmatpush3.msra.mxu1 %v2033_v39 }
  0xae   :  { %7593 = vmatprep.subr.mxu1 %v2048_v58 }
  0xaf   :  { %7594 = vmatpush3.msra.mxu1 %v2032_v59 }
  0xb0   :  { %7595 = vmatprep.subr.mxu1 %v2047_v10  ;;  %v1711_v10 = vld [vmem:[#allocation7 + $0x38] sm:$0xff] }
  0xb1   :  { %7596 = vmatpush3.msra.mxu1 %v2031_v11 }
 0x112   :  { %v641_v28 = vpop.f32.mrf.mxu0  ;;  %v702_v29 = vpop.f32.mrf.mxu1 }
 0x113   :  { %v642_v30 = vadd.f32 %v641_v28, %v8974_v22  ;;  %v703_v33 = vadd.f32 %v702_v29, %v8977_v23 }
 0x114   :  { %v643_v31 = vpop.f32.mrf.mxu0  ;;  %v704_v32 = vpop.f32.mrf.mxu1 }
 0x115   :  { %v644_v34 = vadd.f32 %v643_v31, %v8980_v24  ;;  %v705_v35 = vadd.f32 %v704_v32, %v8983_v25 }
 0x116   :  { %v645_v36 = vpop.f32.mrf.mxu0  ;;  %v706_v37 = vpop.f32.mrf.mxu1 }
 0x117   :  { %v749_v40 = vcombine.low %v642_v30, %v644_v34  ;;  %v750_v41 = vcombine.high %v642_v30, %v644_v34  ;;  %v751_v42 = vcombine.low %v703_v33, %v705_v35  ;;  %v752_v43 = vcombine.high %v703_v33, %v705_v35  ;;  %v2046_v34 = vld [vmem:[#allocation7 + $0x3a8] sm:$0xff] }
 0x118   :  { %v8990_v44 = vadd.f32 %v645_v36, %v8974_v22  ;;  %v647_v45 = vpop.f32.mrf.mxu0  ;;  %v708_v46 = vpop.f32.mrf.mxu1  ;;  %v9005_v51 = vadd.f32 %v706_v37, %v8977_v23  ;;  %v2030_v35 = vld [vmem:[#allocation7 + $0x328] sm:$0xff]  ;;  %7597 = vmatprep.subr.mxu1 %v2046_v34 }
 0x119   :  { %v8993_v47 = vrot.slane %v749_v40, %v8871_v20  ;;  %v8996_v48 = vrot.slane %v750_v41, %v8871_v20  ;;  %v8999_v49 = vrot.slane %v751_v42, %v8871_v20  ;;  %v9002_v50 = vrot.slane %v752_v43, %v8871_v20  ;;  %7598 = vmatpush3.msra.mxu1 %v2030_v35 }
 0x11a   :  { %v9008_v52 = vadd.f32 %v647_v45, %v8980_v24  ;;  %v9011_v53 = vadd.f32 %v708_v46, %v8983_v25  ;;  %v651_v54 = vpop.f32.mrf.mxu0  ;;  %v712_v55 = vpop.f32.mrf.mxu1 }
 0x11b   :  { %v9032_v12 = vadd.f32 %v651_v54, %v8974_v22  ;;  %v9035_v15 = vadd.f32 %v712_v55, %v8977_v23 }
 0x11c   :  { %v818_v60 = vcombine.high %v8990_v44, %v9008_v52  ;;  %v820_v61 = vcombine.high %v9005_v51, %v9011_v53  ;;  %v653_v62 = vpop.f32.mrf.mxu0  ;;  %v714_v63 = vpop.f32.mrf.mxu1 }
 0x11d   :  { %v9038_v16 = vadd.f32 %v653_v62, %v8980_v24  ;;  %v9041_v21 = vadd.f32 %v714_v63, %v8983_v25  ;;  %v2045_v63 = vld [vmem:[#allocation7 + $0x3a0] sm:$0xff] }
 0x11e   :  { %v9022_v0 = vrot.slane %v818_v60, %v8871_v20  ;;  %v9025_v2 = vrot.slane %v820_v61, %v8871_v20  ;;  %v655_v3 = vpop.f32.mrf.mxu0  ;;  %v716_v4 = vpop.f32.mrf.mxu1  ;;  %7599 = vmatprep.subr.mxu1 %v2045_v63  ;;  %v2043_v63 = vld [vmem:[#allocation7 + $0x390] sm:$0xff] }
 0x11f   :  { %v885_v28 = vcombine.low %v9032_v12, %v9038_v16  ;;  %v887_v29 = vcombine.low %v9035_v15, %v9041_v21  ;;  %v656_v36 = vadd.f32 %v655_v3, %v8974_v22  ;;  %v717_v37 = vadd.f32 %v716_v4, %v8977_v23  ;;  %v2029_v3 = vld [vmem:[#allocation7 + $0x320] sm:$0xff] }
 0x120   :  { %v657_v8 = vpop.f32.mrf.mxu0  ;;  %v718_v9 = vpop.f32.mrf.mxu1  ;;  %7600 = vmatpush3.msra.mxu1 %v2029_v3  ;;  %v2027_v3 = vld [vmem:[#allocation7 + $0x310] sm:$0xff]  ;;  %v888_v56 = vcombine.high %v9035_v15, %v9041_v21 }
 0x121   :  { %v9048_v32 = vrot.slane %v885_v28, %v8871_v20  ;;  %v9051_v33 = vrot.slane %v887_v29, %v8871_v20  ;;  %v658_v38 = vadd.f32 %v657_v8, %v8980_v24  ;;  %v719_v39 = vadd.f32 %v718_v9, %v8983_v25  ;;  %v1733_v9 = vld [vmem:[#allocation7 + $0xe8] sm:$0xff]  ;;  %v1730_v21 = vld [vmem:[#allocation7 + $0xd0] sm:$0xff] }
 0x122   :  { %v722_v26 = vpop.f32.mrf.mxu1  ;;  %v661_v27 = vpop.f32.mrf.mxu0  ;;  %v9206_v15 = vrot.slane %v888_v56, %v8871_v20  ;;  %v1729_v56 = vld [vmem:[#allocation7 + $0xc8] sm:$0xff] }
 0x123   :  { %10648 = vst [vmem:[#allocation15_spill] sm:$0xff] %v9051_v33  ;;  %v953_v43 = vcombine.low %v656_v36, %v658_v38  ;;  %v954_v45 = vcombine.high %v656_v36, %v658_v38  ;;  %v955_v46 = vcombine.low %v717_v37, %v719_v39  ;;  %v956_v54 = vcombine.high %v717_v37, %v719_v39  ;;  %v9086_v39 = vld [vmem:[%s10573_s7 + $0x1] ss:$2 sm:$0xf] }
 0x124   :  { %v724_v30 = vpop.f32.mrf.mxu1  ;;  %v663_v31 = vpop.f32.mrf.mxu0  ;;  %v723_v11 = vadd.f32 %v722_v26, %v8977_v23  ;;  %v662_v29 = vadd.f32 %v661_v27, %v8974_v22  ;;  %v782_v23 = vcombine.high %v8993_v47, %v8999_v49  ;;  %v9104_v27 = vrot.slane %v9086_v39, %v8959_v14 }
 0x125   :  { %v9060_v59 = vrot.slane %v953_v43, %v8871_v20  ;;  %v9063_v60 = vrot.slane %v954_v45, %v8871_v20  ;;  %v9066_v61 = vrot.slane %v955_v46, %v8871_v20  ;;  %v9069_v62 = vrot.slane %v956_v54, %v8871_v20  ;;  %v1718_v43 = vld [vmem:[#allocation7 + $0x70] sm:$0xff] }
 0x126   :  { %v726_v40 = vpop.f32.mrf.mxu1  ;;  %v665_v41 = vpop.f32.mrf.mxu0  ;;  %v725_v28 = vadd.f32 %v724_v30, %v8983_v25  ;;  %v664_v34 = vadd.f32 %v663_v31, %v8980_v24  ;;  %v9115_v54 = vrot.slane %v782_v23, %v8871_v20  ;;  %v2026_v23 = vld [vmem:[#allocation7 + $0x308] sm:$0xff] }
 0x127   :  { %v985_v4 = vcombine.low %v9060_v59, %v9066_v61  ;;  %v2044_v40 = vld [vmem:[#allocation7 + $0x398] sm:$0xff] }
 0x128   :  { %v727_v55 = vpop.f32.mrf.mxu1  ;;  %v666_v58 = vpop.f32.mrf.mxu0  ;;  %v1023_v35 = vcombine.low %v723_v11, %v725_v28  ;;  %v1024_v36 = vcombine.high %v723_v11, %v725_v28  ;;  %v1021_v37 = vcombine.low %v662_v29, %v664_v34  ;;  %v1022_v38 = vcombine.high %v662_v29, %v664_v34  ;;  %v2028_v41 = vld [vmem:[#allocation7 + $0x318] sm:$0xff]  ;;  %7601 = vmatprep.subr.mxu1 %v2044_v40 }
 0x129   :  { %7602 = vmatpush3.msra.mxu1 %v2028_v41  ;;  %10651 = vst [vmem:[#allocation18_spill] sm:$0xff] %v9115_v54  ;;  %v9119_v55 = vrot.slane %v9086_v39, %v8965_v18  ;;  %v783_v11 = vcombine.low %v8996_v48, %v9002_v50  ;;  %v817_v34 = vcombine.low %v8990_v44, %v9008_v52  ;;  %v2042_v41 = vld [vmem:[#allocation7 + $0x388] sm:$0xff] }
 0x12a   :  { %v9091_v25 = vrot.slane %v1023_v35, %v8871_v20  ;;  %v9094_v22 = vrot.slane %v1024_v36, %v8871_v20  ;;  %v9097_v24 = vrot.slane %v1021_v37, %v8871_v20  ;;  %v9100_v26 = vrot.slane %v1022_v38, %v8871_v20  ;;  %7603 = vmatprep.subr.mxu1 %v2043_v63 }
 0x12b   :  { %7604 = vmatpush3.msra.mxu1 %v2027_v3  ;;  %v819_v35 = vcombine.low %v9005_v51, %v9011_v53  ;;  %v1775_v37 = vrot.slane %v9115_v54, %v8965_v18  ;;  %v1771_v40 = vrot.slane %v9115_v54, %v8959_v14  ;;  %v9143_v53 = vrot.slane %v817_v34, %v8871_v20 }
 0x12c   :  { %10649 = vst [vmem:[#allocation16_spill] sm:$0xff] %v9094_v22  ;;  %10650 = vst [vmem:[#allocation17_spill] sm:$0xff] %v9100_v26  ;;  %7605 = vmatprep.subr.mxu1 %v2042_v41 }
 0x12d   :  { %7606 = vmatpush3.msra.mxu1 %v2026_v23 }
 0x12e   :  { %7607 = vmatprep.subr.mxu1 %v2041_v5 }
 0x132   :  { %v1368_v30 = vpop.f32.mrf.mxu1 }
 0x133   :  { %v9124_v29 = vadd.f32 %v1368_v30, %v9104_v27  ;;  %v9138_v30 = vrot.slane %v783_v11, %v8871_v20 }
 0x134   :  { %v1370_v58 = vpop.f32.mrf.mxu1 }
 0x135   :  { %10652 = vst [vmem:[#allocation19_spill] sm:$0xff] %v9124_v29  ;;  %v9131_v36 = vadd.f32 %v1370_v58, %v9119_v55  ;;  %10654 = vst [vmem:[#allocation21_spill] sm:$0xff] %v9138_v30  ;;  %v1928_v51 = vadd.f32 %v1771_v40, %v9124_v29  ;;  %v9146_v58 = vrot.slane %v819_v35, %v8871_v20 }
 0x136   :  { %v1372_v28 = vpop.f32.mrf.mxu1  ;;  %v9150_v3 = vcombine.high %v9138_v30, %v9138_v30 }
 0x137   :  { %10653 = vst [vmem:[#allocation20_spill] sm:$0xff] %v9131_v36  ;;  %v1929_v44 = vadd.f32 %v1775_v37, %v9131_v36  ;;  %v2025_v37 = vld [vmem:[#allocation7 + $0x300] sm:$0xff]  ;;  %v850_v40 = vcombine.high %v9143_v53, %v9146_v58  ;;  %v9158_v35 = vadd.f32 %v1372_v28, %v9104_v27 }
 0x138   :  { %v1374_v38 = vpop.f32.mrf.mxu1  ;;  %7608 = vmatpush3.msra.mxu1 %v2025_v37  ;;  %v1791_v23 = vrot.slane %v9150_v3, %v8965_v18 }
 0x139   :  { %8326 = vtanh.f32 %v1929_v44  ;;  %v9155_v34 = vadd.f32 %v1374_v38, %v9119_v55  ;;  %10655 = vst [vmem:[#allocation22_spill] sm:$0xff] %v9158_v35  ;;  %v1787_v44 = vrot.slane %v9150_v3, %v8959_v14  ;;  %v9165_v5 = vrot.slane %v850_v40, %v8871_v20  ;;  %7689 = vmatprep.subr.mxu1 %v1767_v1  ;;  %v1719_v1 = vld [vmem:[#allocation7 + $0x78] sm:$0xff] }
 0x13a   :  { %v1378_v52 = vpop.f32.mrf.mxu1  ;;  %8328 = vtanh.f32 %v1928_v51 }
 0x13b   :  { %10656 = vst [vmem:[#allocation23_spill] sm:$0xff] %v9165_v5  ;;  %v1933_v51 = vadd.f32 %v1791_v23, %v9155_v34  ;;  %v1932_v38 = vadd.f32 %v1787_v44, %v9158_v35  ;;  %v9173_v28 = vcombine.high %v9165_v5, %v9165_v5  ;;  %v9181_v42 = vadd.f32 %v1378_v52, %v9104_v27  ;;  %v1722_v5 = vld [vmem:[#allocation7 + $0x90] sm:$0xff] }
 0x13c   :  { %v1380_v63 = vpop.f32.mrf.mxu1 }
 0x13d   :  { %8330 = vtanh.f32 %v1933_v51  ;;  %v9178_v31 = vadd.f32 %v1380_v63, %v9119_v55  ;;  %v1807_v44 = vrot.slane %v9173_v28, %v8965_v18  ;;  %v1803_v51 = vrot.slane %v9173_v28, %v8959_v14 }
 0x13e   :  { %v1382_v11 = vpop.f32.mrf.mxu1  ;;  %8332 = vtanh.f32 %v1932_v38  ;;  %v917_v63 = vcombine.low %v9048_v32, %v9051_v33 }
 0x13f   :  { %v1937_v52 = vadd.f32 %v1807_v44, %v9178_v31  ;;  %v1936_v8 = vadd.f32 %v1803_v51, %v9181_v42 }
 0x140   :  { %v1384_v41 = vpop.f32.mrf.mxu1  ;;  %v9200_v44 = vrot.slane %v917_v63, %v8871_v20 }
 0x141   :  { %8334 = vtanh.f32 %v1937_v52 }
 0x142   :  { %v9169_v37 = vpop.f32.mrf.mxu1  ;;  %8336 = vtanh.f32 %v1936_v8  ;;  %v1714_v8 = vld [vmem:[#allocation7 + $0x50] sm:$0xff]  ;;  %v1823_v63 = vrot.slane %v9200_v44, %v8965_v18 }
 0x144   :  { %v9175_v46 = vpop.f32.mrf.mxu1 }
 0x146   :  { %v8327_v40 = vpop.eup %8326  ;;  %v9187_v38 = vpop.f32.mrf.mxu1 }
 0x147   :  { %v8329_v23 = vpop.eup %8328  ;;  %2121 = vmatprep.mubr.f32.mxu0 %v8327_v40  ;;  %v886_v40 = vcombine.high %v9032_v12, %v9038_v16  ;;  %v9209_v16 = vadd.f32 %v1384_v41, %v9119_v55  ;;  %v1819_v41 = vrot.slane %v9200_v44, %v8959_v14 }
 0x148   :  { %2122 = vmatmul.mubr.f32.vlgmr.msra.gmra.mxu0 %v8329_v23  ;;  %v1732_v23 = vld [vmem:[#allocation7 + $0xe0] sm:$0xff]  ;;  %v9197_v45 = vpop.f32.mrf.mxu1 }
 0x149   :  { %7634 = vmatpush3.msra.mxu0 %v1719_v1  ;;  %v1731_v1 = vld [vmem:[#allocation7 + $0xd8] sm:$0xff]  ;;  %v9203_v12 = vrot.slane %v886_v40, %v8871_v20  ;;  %v1941_v52 = vadd.f32 %v1823_v63, %v9209_v16  ;;  %v1728_v40 = vld [vmem:[#allocation7 + $0xc0] sm:$0xff] }
 0x14a   :  { %7635 = vmatprep.subr.mxu0 %v1734_v6  ;;  %v1715_v6 = vld [vmem:[#allocation7 + $0x58] sm:$0xff] }
 0x14b   :  { %7636 = vmatpush3.msra.mxu0 %v1718_v43  ;;  %v9212_v43 = vadd.f32 %v1382_v11, %v9104_v27  ;;  %v920_v11 = vcombine.high %v9203_v12, %v9206_v15  ;;  %8338 = vtanh.f32 %v1941_v52 }
 0x14c   :  { %7637 = vmatprep.subr.mxu0 %v1733_v9  ;;  %v8331_v9 = vpop.eup %8330 }
 0x14d   :  { %7638 = vmatpush3.msra.mxu0 %v1717_v7  ;;  %v9214_v7 = vpop.f32.mrf.mxu1  ;;  %v8333_v51 = vpop.eup %8332  ;;  %2126 = vmatprep.mubr.f32.mxu0 %v8331_v9  ;;  %v1727_v9 = vld [vmem:[#allocation7 + $0xb8] sm:$0xff] }
 0x14e   :  { %7639 = vmatprep.subr.mxu0 %v1732_v23  ;;  %2127 = vmatmul.mubr.f32.gmra.mxu0 %v8333_v51  ;;  %v1940_v23 = vadd.f32 %v1819_v41, %v9212_v43  ;;  %v1726_v51 = vld [vmem:[#allocation7 + $0xb0] sm:$0xff]  ;;  %v9233_v41 = vadd.f32 %v9175_v46, %v9119_v55 }
 0x14f   :  { %7640 = vmatpush3.msra.mxu0 %v1716_v57  ;;  %v1713_v57 = vld [vmem:[#allocation7 + $0x48] sm:$0xff] }
 0x150   :  { %7641 = vmatprep.subr.mxu0 %v1731_v1  ;;  %v9224_v1 = vpop.f32.mrf.mxu1  ;;  %8340 = vtanh.f32 %v1940_v23 }
 0x151   :  { %7642 = vmatpush3.msra.mxu0 %v1715_v6  ;;  %v1712_v6 = vld [vmem:[#allocation7 + $0x40] sm:$0xff] }
 0x152   :  { %7643 = vmatprep.subr.mxu0 %v1730_v21  ;;  %v9227_v21 = vrot.slane %v920_v11, %v8871_v20  ;;  %v9229_v63 = vpop.f32.mrf.mxu1  ;;  %v1709_v11 = vld [vmem:[#allocation7 + $0x28] sm:$0xff] }
 0x153   :  { %7644 = vmatpush3.msra.mxu0 %v1714_v8  ;;  %v1710_v8 = vld [vmem:[#allocation7 + $0x30] sm:$0xff] }
 0x154   :  { %7645 = vmatprep.subr.mxu0 %v1729_v56  ;;  %v1725_v56 = vld [vmem:[#allocation7 + $0xa8] sm:$0xff]  ;;  %v1839_v23 = vrot.slane %v9227_v21, %v8965_v18  ;;  %v1835_v46 = vrot.slane %v9227_v21, %v8959_v14 }
 0x155   :  { %7646 = vmatpush3.msra.mxu0 %v1713_v57  ;;  %v8335_v57 = vpop.eup %8334 }
 0x156   :  { %7647 = vmatprep.subr.mxu0 %v1728_v40  ;;  %v9237_v40 = vadd.f32 %v9169_v37, %v9104_v27  ;;  %v8337_v52 = vpop.eup %8336  ;;  %2131 = vmatprep.mubr.f32.mxu0 %v8335_v57  ;;  %v9249_v37 = vrot.slane %v985_v4, %v8871_v20  ;;  %v1723_v57 = vld [vmem:[#allocation7 + $0x98] sm:$0xff]  ;;  %v1721_v4 = vld [vmem:[#allocation7 + $0x88] sm:$0xff] }
 0x157   :  { %7648 = vmatpush3.msra.mxu0 %v1712_v6  ;;  %v1724_v6 = vld [vmem:[#allocation7 + $0xa0] sm:$0xff] }
 0x158   :  { %7649 = vmatprep.subr.mxu0 %v1727_v9  ;;  %10657 = vst [vmem:[#allocation24_spill] sm:$0xff] %v9237_v40  ;;  %v9243_v9 = vpop.f32.mrf.mxu1  ;;  %2132 = vmatmul.mubr.f32.gmra.mxu0 %v8337_v52  ;;  %10658 = vst [vmem:[#allocation25_spill] sm:$0xff] %v9249_v37  ;;  %v9257_v52 = vcombine.high %v9249_v37, %v9249_v37 }
 0x159   :  { %7650 = vmatpush3.msra.mxu0 %v1711_v10  ;;  %v1708_v10 = vld [vmem:[#allocation7 + $0x20] sm:$0xff] }
 0x15a   :  { %7651 = vmatprep.subr.mxu0 %v1726_v51  ;;  %v1945_v51 = vadd.f32 %v1839_v23, %v9233_v41  ;;  %v9253_v30 = vpop.f32.mrf.mxu1  ;;  %10659 = vst [vmem:[#allocation26_spill] sm:$0xff] %v9257_v52  ;;  %v9261_v23 = vadd.f32 %v9197_v45, %v9119_v55  ;;  %v1851_v45 = vrot.slane %v9257_v52, %v8959_v14 }
 0x15b   :  { %7652 = vmatpush3.msra.mxu0 %v1710_v8  ;;  %v1944_v8 = vadd.f32 %v1835_v46, %v9237_v40  ;;  %v8339_v46 = vpop.eup %8338 }
 0x15c   :  { %7653 = vmatprep.subr.mxu0 %v1725_v56  ;;  %v1706_v56 = vld [vmem:[#allocation7 + $0x10] sm:$0xff]  ;;  %8342 = vtanh.f32 %v1945_v51  ;;  %10660 = vst [vmem:[#allocation27_spill] sm:$0xff] %v9261_v23  ;;  %v1704_v51 = vld [vmem:[#allocation7] sm:$0xff]  ;;  %2136 = vmatprep.mubr.f32.mxu0 %v8339_v46 }
 0x15d   :  { %7654 = vmatpush3.msra.mxu0 %v1709_v11  ;;  %8344 = vtanh.f32 %v1944_v8  ;;  %v1705_v11 = vld [vmem:[#allocation7 + $0x8] sm:$0xff]  ;;  %v2733_v8 = vld [vmem:[#allocation7 + $0x4f8] sm:$0xff] }
 0x15e   :  { %7655 = vmatprep.subr.mxu0 %v1724_v6  ;;  %v1720_v6 = vld [vmem:[#allocation7 + $0x80] sm:$0xff] }
 0x15f   :  { %7656 = vmatpush3.msra.mxu0 %v1708_v10  ;;  %v9265_v10 = vadd.f32 %v9187_v38, %v9104_v27  ;;  %v10661_v38 = vcombine.high %v9063_v60, %v9069_v62 }
 0x160   :  { %7657 = vmatprep.subr.mxu0 %v1723_v57  ;;  %v9267_v57 = vpop.f32.mrf.mxu1 }
 0x161   :  { %7658 = vmatpush3.msra.mxu0 %v1707_v13  ;;  %v8341_v13 = vpop.eup %8340  ;;  %v1948_v37 = vadd.f32 %v1851_v45, %v9265_v10 }
 0x162   :  { %7659 = vmatprep.subr.mxu0 %v1722_v5  ;;  %v1855_v5 = vrot.slane %v9257_v52, %v8965_v18  ;;  %2137 = vmatmul.mubr.f32.gmra.mxu0 %v8341_v13  ;;  %v1445_v33 = vpop.f32.mrf.mxu1 }
 0x163   :  { %7660 = vmatpush3.msra.mxu0 %v1706_v56  ;;  %v9277_v56 = vrot.slane %v10661_v38, %v8871_v20 }
 0x164   :  { %7661 = vmatprep.subr.mxu0 %v1721_v4  ;;  %v1949_v4 = vadd.f32 %v1855_v5, %v9261_v23  ;;  %v1447_v13 = vpop.f32.mrf.mxu1 }
 0x165   :  { %7662 = vmatpush3.msra.mxu0 %v1705_v11  ;;  %10662 = vst [vmem:[#allocation28_spill] sm:$0xff] %v9277_v56  ;;  %v10663_v11 = vcombine.high %v8996_v48, %v9002_v50  ;;  %v9301_v48 = vadd.f32 %v9214_v7, %v9104_v27  ;;  %v9305_v50 = vrot.slane %v9086_v39, %v8962_v17 }
 0x166   :  { %7663 = vmatprep.subr.mxu0 %v1720_v6  ;;  %v9289_v6 = vcombine.high %v9277_v56, %v9277_v56  ;;  %8346 = vtanh.f32 %v1949_v4  ;;  %v9314_v4 = vpop.f32.mrf.mxu1 }
 0x167   :  { %7664 = vmatpush3.msra.mxu0 %v1704_v51  ;;  %v9285_v46 = vrot.slane %v10663_v11, %v8871_v20  ;;  %8348 = vtanh.f32 %v1948_v37  ;;  %v9293_v51 = vadd.f32 %v9224_v1, %v9119_v55  ;;  %v9312_v38 = vadd.f32 %v1445_v33, %v9305_v50 }
 0x168   :  { %7745 = vmatprep.subr.mxu0 %v2733_v8  ;;  %10665 = vst [vmem:[#allocation30_spill] sm:$0xff] %v9289_v6  ;;  %v1871_v37 = vrot.slane %v9289_v6, %v8965_v18  ;;  %v1867_v1 = vrot.slane %v9289_v6, %v8959_v14  ;;  %v9319_v11 = vrot.slane %v9086_v39, %v8968_v19 }
 0x169   :  { %10664 = vst [vmem:[#allocation29_spill] sm:$0xff] %v9285_v46  ;;  %10666 = vst [vmem:[#allocation31_spill] sm:$0xff] %v9293_v51  ;;  %v8343_v5 = vpop.eup %8342  ;;  %v9297_v8 = vcombine.high %v9285_v46, %v9285_v46 }
 0x16a   :  { %v8345_v45 = vpop.eup %8344  ;;  %2141 = vmatprep.mubr.f32.mxu0 %v8343_v5  ;;  %10667 = vst [vmem:[#allocation32_spill] sm:$0xff] %v9312_v38  ;;  %v1953_v7 = vadd.f32 %v1871_v37, %v9293_v51  ;;  %v1952_v56 = vadd.f32 %v1867_v1, %v9301_v48  ;;  %v9325_v52 = vadd.f32 %v1447_v13, %v9319_v11 }
 0x16b   :  { %2142 = vmatmul.mubr.f32.gmra.mxu0 %v8345_v45  ;;  %v2504_v5 = vrot.slane %v9297_v8, %v8962_v17  ;;  %v9330_v45 = vpop.f32.mrf.mxu1  ;;  %v10670_v37 = vcombine.low %v9100_v26, %v9094_v22  ;;  %v2508_v39 = vrot.slane %v9297_v8, %v8968_v19  ;;  %v849_v1 = vcombine.low %v9143_v53, %v9146_v58 }
 0x16c   :  { %10668 = vst [vmem:[#allocation33_spill] sm:$0xff] %v9325_v52  ;;  %8350 = vtanh.f32 %v1953_v7  ;;  %v10672_v13 = vcombine.low %v8993_v47, %v8999_v49  ;;  %v9357_v22 = vadd.f32 %v9229_v63, %v9104_v27  ;;  %v919_v63 = vcombine.low %v9203_v12, %v9206_v15 }
 0x16d   :  { %v9328_v33 = vadd.f32 %v2504_v5, %v9312_v38  ;;  %v9336_v6 = vrot.slane %v10670_v37, %v8871_v20  ;;  %8352 = vtanh.f32 %v1952_v56  ;;  %v9353_v37 = vadd.f32 %v2508_v39, %v9325_v52  ;;  %v9359_v53 = vpop.f32.mrf.mxu1 }
 0x16e   :  { %v9346_v5 = vrot.slane %v10672_v13, %v8871_v20  ;;  %10675 = vst [vmem:[#allocation38_spill] sm:$0xff] %v9357_v22  ;;  %v9364_v49 = vrot.slane %v849_v1, %v8871_v20  ;;  %v10678_v12 = vcombine.high %v9022_v0, %v9025_v2 }
 0x16f   :  { %10669 = vst [vmem:[#allocation34_spill] sm:$0xff] %v9328_v33  ;;  %10671 = vst [vmem:[#allocation35_spill] sm:$0xff] %v9336_v6  ;;  %v9350_v33 = vadd.f32 %v9243_v9, %v9119_v55  ;;  %v1887_v47 = vrot.slane %v9336_v6, %v8965_v18  ;;  %v1883_v55 = vrot.slane %v9336_v6, %v8959_v14  ;;  %v9374_v39 = vpop.f32.mrf.mxu1 }
 0x170   :  { %10674 = vst [vmem:[#allocation37_spill] sm:$0xff] %v9353_v37  ;;  %10676 = vst [vmem:[#allocation39_spill] sm:$0xff] %v9364_v49  ;;  %v1487_v9 = vrot.slane %v9346_v5, %v8965_v18  ;;  %v9379_v1 = vcombine.high %v9364_v49, %v9364_v49  ;;  %v9389_v15 = vrot.slane %v10678_v12, %v8871_v20 }
 0x171   :  { %10673 = vst [vmem:[#allocation36_spill] sm:$0xff] %v9350_v33  ;;  %v1957_v27 = vadd.f32 %v1887_v47, %v9350_v33  ;;  %v1956_v56 = vadd.f32 %v1883_v55, %v9357_v22  ;;  %v9392_v47 = vrot.slane %v919_v63, %v8871_v20  ;;  %v1499_v37 = vrot.slane %v9285_v46, %v8959_v14 }
 0x172   :  { %v1641_v13 = vadd.f32 %v1487_v9, %v9131_v36  ;;  %10677 = vst [vmem:[#allocation40_spill] sm:$0xff] %v9379_v1  ;;  %10679 = vst [vmem:[#allocation41_spill] sm:$0xff] %v9389_v15  ;;  %v1461_v9 = vpop.f32.mrf.mxu1  ;;  %v1519_v12 = vrot.slane %v9379_v1, %v8965_v18  ;;  %v9406_v63 = vadd.f32 %v9253_v30, %v9305_v50 }
 0x173   :  { %v8347_v7 = vpop.eup %8346  ;;  %8354 = vtanh.f32 %v1957_v27  ;;  %10680 = vst [vmem:[#allocation42_spill] sm:$0xff] %v9392_v47  ;;  %v9400_v27 = vadd.f32 %v9267_v57, %v9319_v11  ;;  %v9420_v26 = vcombine.high %v9389_v15, %v9389_v15 }
 0x174   :  { %v8349_v58 = vpop.eup %8348  ;;  %2146 = vmatprep.mubr.f32.mxu0 %v8347_v7  ;;  %v1483_v7 = vrot.slane %v9346_v5, %v8959_v14  ;;  %8356 = vtanh.f32 %v1956_v56  ;;  %10682 = vst [vmem:[#allocation44_spill] sm:$0xff] %v9406_v63  ;;  %v1649_v57 = vadd.f32 %v1519_v12, %v9178_v31  ;;  %v1463_v30 = vpop.f32.mrf.mxu1 }
 0x175   :  { %2147 = vmatmul.mubr.f32.gmra.mxu0 %v8349_v58  ;;  %v1503_v58 = vrot.slane %v9285_v46, %v8965_v18  ;;  %8358 = vtanh.f32 %v1641_v13  ;;  %10681 = vst [vmem:[#allocation43_spill] sm:$0xff] %v9400_v27  ;;  %v1644_v13 = vadd.f32 %v1499_v37, %v9158_v35  ;;  %v1779_v46 = vrot.slane %v9115_v54, %v8962_v17 }
 0x176   :  { %v1640_v55 = vadd.f32 %v1483_v7, %v9124_v29  ;;  %v1783_v7 = vrot.slane %v9115_v54, %v8968_v19  ;;  %10683 = vst [vmem:[#allocation45_spill] sm:$0xff] %v9420_v26  ;;  %v9425_v35 = vadd.f32 %v1461_v9, %v9305_v50  ;;  %v1535_v9 = vrot.slane %v9420_v26, %v8965_v18 }
 0x177   :  { %v1645_v49 = vadd.f32 %v1503_v58, %v9155_v34  ;;  %v9413_v58 = vcombine.high %v9392_v47, %v9392_v47  ;;  %v9441_v15 = vadd.f32 %v1463_v30, %v9319_v11  ;;  %v1799_v30 = vrot.slane %v9150_v3, %v8968_v19 }
 0x178   :  { %8360 = vtanh.f32 %v1640_v55  ;;  %v1931_v37 = vadd.f32 %v1783_v7, %v9400_v27  ;;  %v10684_v55 = vcombine.high %v9060_v59, %v9066_v61  ;;  %v1465_v7 = vpop.f32.mrf.mxu1 }
 0x179   :  { %v8351_v6 = vpop.eup %8350  ;;  %8362 = vtanh.f32 %v1645_v49  ;;  %v2552_v49 = vrot.slane %v9413_v58, %v8962_v17 }
 0x17a   :  { %v8353_v56 = vpop.eup %8352  ;;  %2151 = vmatprep.mubr.f32.mxu0 %v8351_v6  ;;  %v1930_v6 = vadd.f32 %v1779_v46, %v9406_v63  ;;  %v9431_v12 = vrot.slane %v10684_v55, %v8871_v20  ;;  %8364 = vtanh.f32 %v1644_v13  ;;  %v1653_v13 = vadd.f32 %v1535_v9, %v9209_v16 }
 0x17b   :  { %2152 = vmatmul.mubr.f32.gmra.mxu0 %v8353_v56  ;;  %v1515_v56 = vrot.slane %v9379_v1, %v8959_v14  ;;  %8366 = vtanh.f32 %v1649_v57  ;;  %v9444_v59 = vadd.f32 %v2552_v49, %v9425_v35  ;;  %v2556_v57 = vrot.slane %v9413_v58, %v8968_v19 }
 0x17c   :  { %8368 = vtanh.f32 %v1931_v37  ;;  %v9448_v61 = vcombine.high %v9431_v12, %v9431_v12  ;;  %v1795_v9 = vrot.slane %v9150_v3, %v8962_v17  ;;  %v1551_v3 = vrot.slane %v9392_v47, %v8965_v18 }
 0x17d   :  { %v1648_v46 = vadd.f32 %v1515_v56, %v9181_v42  ;;  %8370 = vtanh.f32 %v1930_v6  ;;  %10685 = vst [vmem:[#allocation46_spill] sm:$0xff] %v9444_v59  ;;  %v1467_v56 = vpop.f32.mrf.mxu1  ;;  %v9456_v37 = vadd.f32 %v2556_v57, %v9441_v15  ;;  %v9459_v6 = vadd.f32 %v1465_v7, %v9305_v50 }
 0x17e   :  { %v1531_v59 = vrot.slane %v9420_v26, %v8959_v14  ;;  %v1934_v57 = vadd.f32 %v1795_v9, %v9312_v38  ;;  %v2716_v26 = vld [vmem:[#allocation7 + $0x470] sm:$0xff]  ;;  %v1657_v9 = vadd.f32 %v1551_v3, %v9233_v41  ;;  %v2572_v38 = vrot.slane %v9448_v61, %v8968_v19 }
 0x17f   :  { %8372 = vtanh.f32 %v1648_v46  ;;  %10686 = vst [vmem:[#allocation47_spill] sm:$0xff] %v9456_v37  ;;  %v1935_v46 = vadd.f32 %v1799_v30, %v9325_v52  ;;  %v2717_v37 = vld [vmem:[#allocation7 + $0x478] sm:$0xff]  ;;  %v9469_v7 = vpop.f32.mrf.mxu1  ;;  %v2732_v30 = vld [vmem:[#allocation7 + $0x4f0] sm:$0xff] }
 0x180   :  { %v8355_v55 = vpop.eup %8354  ;;  %8374 = vtanh.f32 %v1653_v13  ;;  %v1652_v27 = vadd.f32 %v1531_v59, %v9212_v43  ;;  %v9478_v13 = vadd.f32 %v1467_v56, %v9319_v11  ;;  %v2731_v59 = vld [vmem:[#allocation7 + $0x4e8] sm:$0xff] }
 0x181   :  { %v8357_v1 = vpop.eup %8356  ;;  %2156 = vmatprep.mubr.f32.mxu0 %v8355_v55  ;;  %v2568_v55 = vrot.slane %v9448_v61, %v8962_v17  ;;  %8376 = vtanh.f32 %v1935_v46  ;;  %v9495_v46 = vpop.f32.mrf.mxu1 }
 0x182   :  { %v8359_v49 = vpop.eup %8358  ;;  %2157 = vmatmul.mubr.f32.gmra.mxu0 %v8357_v1  ;;  %8378 = vtanh.f32 %v1934_v57  ;;  %v1567_v57 = vrot.slane %v9431_v12, %v8965_v18 }
 0x183   :  { %2331 = vmatprep.mubr.f32.mxu0 %v8359_v49  ;;  %v9475_v1 = vadd.f32 %v2568_v55, %v9459_v6  ;;  %v10688_v55 = vcombine.low %v9063_v60, %v9069_v62  ;;  %8380 = vtanh.f32 %v1652_v27  ;;  %v9501_v60 = vadd.f32 %v9330_v45, %v9319_v11  ;;  %v1751_v27 = vld [vmem:[#allocation7 + $0x178] sm:$0xff] }
 0x184   :  { %v9504_v62 = vadd.f32 %v2572_v38, %v9478_v13  ;;  %8382 = vtanh.f32 %v1657_v9  ;;  %v1766_v38 = vld [vmem:[#allocation7 + $0x1f0] sm:$0xff]  ;;  %v1475_v9 = vpop.f32.mrf.mxu1 }
 0x185   :  { %v8361_v63 = vpop.eup %8360  ;;  %10687 = vst [vmem:[#allocation48_spill] sm:$0xff] %v9475_v1  ;;  %v9487_v56 = vrot.slane %v10688_v55, %v8871_v20 }
 0x186   :  { %v8363_v49 = vpop.eup %8362  ;;  %2332 = vmatmul.mubr.f32.vlgmr.msra.gmra.mxu0 %v8361_v63  ;;  %v10690_v63 = vcombine.high %v9097_v24, %v9091_v25  ;;  %10692 = vst [vmem:[#allocation51_spill] sm:$0xff] %v9504_v62  ;;  %v2714_v62 = vld [vmem:[#allocation7 + $0x460] sm:$0xff] }
 0x187   :  { %2336 = vmatprep.mubr.f32.mxu0 %v8363_v49  ;;  %7746 = vmatpush3.msra.mxu0 %v2717_v37  ;;  %v8365_v52 = vpop.eup %8364  ;;  %10689 = vst [vmem:[#allocation49_spill] sm:$0xff] %v9487_v56  ;;  %v1547_v37 = vrot.slane %v9392_v47, %v8959_v14  ;;  %v2715_v49 = vld [vmem:[#allocation7 + $0x468] sm:$0xff]  ;;  %v9517_v54 = vcombine.high %v9487_v56, %v9487_v56  ;;  %v2729_v56 = vld [vmem:[#allocation7 + $0x4d8] sm:$0xff] }
 0x188   :  { %v9493_v1 = vrot.slane %v10690_v63, %v8871_v20  ;;  %7747 = vmatprep.subr.mxu0 %v2732_v30  ;;  %v8367_v3 = vpop.eup %8366  ;;  %v9510_v30 = vadd.f32 %v9314_v4, %v9305_v50  ;;  %v2730_v63 = vld [vmem:[#allocation7 + $0x4e0] sm:$0xff]  ;;  %v1661_v4 = vadd.f32 %v1567_v57, %v9261_v23  ;;  %v1749_v23 = vld [vmem:[#allocation7 + $0x168] sm:$0xff] }
 0x189   :  { %7748 = vmatpush3.msra.mxu0 %v2716_v26  ;;  %v8369_v55 = vpop.eup %8368  ;;  %v1656_v45 = vadd.f32 %v1547_v37, %v9237_v40  ;;  %v1815_v26 = vrot.slane %v9173_v28, %v8968_v19  ;;  %10693 = vst [vmem:[#allocation52_spill] sm:$0xff] %v9517_v54 }
 0x18a   :  { %10691 = vst [vmem:[#allocation50_spill] sm:$0xff] %v9493_v1  ;;  %2337 = vmatmul.mubr.f32.gmra.mxu0 %v8365_v52  ;;  %7749 = vmatprep.subr.mxu0 %v2731_v59  ;;  %v8371_v47 = vpop.eup %8370  ;;  %v1811_v52 = vrot.slane %v9173_v28, %v8962_v17  ;;  %v1750_v59 = vld [vmem:[#allocation7 + $0x170] sm:$0xff]  ;;  %v9524_v37 = vcombine.high %v9493_v1, %v9493_v1 }
 0x18b   :  { %2226 = vmatprep.mubr.f32.mxu1 %v8369_v55  ;;  %2341 = vmatprep.mubr.f32.mxu0 %v8367_v3  ;;  %v1939_v3 = vadd.f32 %v1815_v26, %v9501_v60  ;;  %v1765_v55 = vld [vmem:[#allocation7 + $0x1e8] sm:$0xff]  ;;  %8384 = vtanh.f32 %v1656_v45  ;;  %v1563_v28 = vrot.slane %v9431_v12, %v8959_v14 }
 0x18c   :  { %2227 = vmatmul.mubr.f32.vlgmr.msra.gmra.mxu1 %v8371_v47  ;;  %7750 = vmatpush3.msra.mxu0 %v2715_v49  ;;  %v8373_v40 = vpop.eup %8372  ;;  %v1938_v57 = vadd.f32 %v1811_v52, %v9510_v30  ;;  %v9531_v47 = vadd.f32 %v1475_v9, %v9305_v50  ;;  %v1764_v49 = vld [vmem:[#allocation7 + $0x1e0] sm:$0xff]  ;;  %8386 = vtanh.f32 %v1661_v4  ;;  %v1477_v52 = vpop.f32.mrf.mxu1  ;;  %v1763_v9 = vld [vmem:[#allocation7 + $0x1d8] sm:$0xff]  ;;  %v1579_v4 = vrot.slane %v9517_v54, %v8959_v14 }
 0x18d   :  { %7690 = vmatpush3.msra.mxu1 %v1751_v27  ;;  %7751 = vmatprep.subr.mxu0 %v2730_v63  ;;  %v2713_v27 = vld [vmem:[#allocation7 + $0x458] sm:$0xff]  ;;  %v8375_v26 = vpop.eup %8374  ;;  %v1583_v63 = vrot.slane %v9517_v54, %v8965_v18  ;;  %v1660_v45 = vadd.f32 %v1563_v28, %v9265_v10  ;;  %8388 = vtanh.f32 %v1939_v3  ;;  %v9549_v3 = vadd.f32 %v1477_v52, %v9319_v11  ;;  %v1762_v28 = vld [vmem:[#allocation7 + $0x1d0] sm:$0xff] }
 0x18e   :  { %7691 = vmatprep.subr.mxu1 %v1766_v38  ;;  %7752 = vmatpush3.msra.mxu0 %v2714_v62  ;;  %10694 = vst [vmem:[#allocation53_spill] sm:$0xff] %v9531_v47  ;;  %v1748_v38 = vld [vmem:[#allocation7 + $0x160] sm:$0xff]  ;;  %v2728_v62 = vld [vmem:[#allocation7 + $0x4d0] sm:$0xff]  ;;  %8390 = vtanh.f32 %v1938_v57  ;;  %v1599_v57 = vrot.slane %v9524_v37, %v8965_v18  ;;  %v1607_v52 = vrot.slane %v9524_v37, %v8968_v19 }
 0x18f   :  { %7692 = vmatpush3.msra.mxu1 %v1750_v59  ;;  %2342 = vmatmul.mubr.f32.gmra.mxu0 %v8373_v40  ;;  %v1603_v59 = vrot.slane %v9524_v37, %v8962_v17  ;;  %v2712_v40 = vld [vmem:[#allocation7 + $0x450] sm:$0xff]  ;;  %v1665_v1 = vadd.f32 %v1583_v63, %v9293_v51  ;;  %8392 = vtanh.f32 %v1660_v45  ;;  %v1664_v63 = vadd.f32 %v1579_v4, %v9301_v48  ;;  %v1745_v45 = vld [vmem:[#allocation7 + $0x148] sm:$0xff] }
 0x190   :  { %7693 = vmatprep.subr.mxu1 %v1765_v55  ;;  %7753 = vmatprep.subr.mxu0 %v2729_v56  ;;  %v1747_v55 = vld [vmem:[#allocation7 + $0x158] sm:$0xff]  ;;  %v9543_v56 = vadd.f32 %v9374_v39, %v9319_v11  ;;  %v1746_v39 = vld [vmem:[#allocation7 + $0x150] sm:$0xff]  ;;  %v9567_v4 = vadd.f32 %v1607_v52, %v9549_v3 }
 0x191   :  { %7694 = vmatpush3.msra.mxu1 %v1749_v23  ;;  %2346 = vmatprep.mubr.f32.mxu0 %v8375_v26  ;;  %v9546_v23 = vadd.f32 %v1603_v59, %v9531_v47  ;;  %v8377_v26 = vpop.eup %8376  ;;  %v2727_v59 = vld [vmem:[#allocation7 + $0x4c8] sm:$0xff]  ;;  %8394 = vtanh.f32 %v1665_v1  ;;  %v9571_v1 = vcombine.high %v9346_v5, %v9346_v5  ;;  %v2725_v52 = vld [vmem:[#allocation7 + $0x4b8] sm:$0xff] }
 0x192   :  { %7695 = vmatprep.subr.mxu1 %v1764_v49  ;;  %7754 = vmatpush3.msra.mxu0 %v2713_v27  ;;  %v9555_v49 = vadd.f32 %v9359_v53, %v9305_v50  ;;  %v8379_v27 = vpop.eup %8378  ;;  %v1669_v53 = vadd.f32 %v1599_v57, %v9350_v33  ;;  %10696 = vst [vmem:[#allocation55_spill] sm:$0xff] %v9567_v4  ;;  %8396 = vtanh.f32 %v1664_v63 }
 0x193   :  { %10695 = vst [vmem:[#allocation54_spill] sm:$0xff] %v9546_v23  ;;  %7696 = vmatpush3.msra.mxu1 %v1748_v38  ;;  %7755 = vmatprep.subr.mxu0 %v2728_v62  ;;  %v1831_v38 = vrot.slane %v9200_v44, %v8968_v19  ;;  %v1761_v62 = vld [vmem:[#allocation7 + $0x1c8] sm:$0xff]  ;;  %v8381_v23 = vpop.eup %8380  ;;  %v2484_v63 = vrot.slane %v9571_v1, %v8965_v18 }
 0x194   :  { %7697 = vmatprep.subr.mxu1 %v1763_v9  ;;  %7756 = vmatpush3.msra.mxu0 %v2712_v40  ;;  %v1827_v9 = vrot.slane %v9200_v44, %v8962_v17  ;;  %v8383_v54 = vpop.eup %8382  ;;  %8398 = vtanh.f32 %v1669_v53  ;;  %v1758_v53 = vld [vmem:[#allocation7 + $0x1b0] sm:$0xff] }
 0x195   :  { %2231 = vmatprep.mubr.f32.mxu1 %v8377_v26  ;;  %7698 = vmatpush3.msra.mxu1 %v1747_v55  ;;  %v1943_v40 = vadd.f32 %v1831_v38, %v9543_v56  ;;  %v2711_v55 = vld [vmem:[#allocation7 + $0x448] sm:$0xff]  ;;  %v1760_v26 = vld [vmem:[#allocation7 + $0x1c0] sm:$0xff]  ;;  %v1595_v38 = vrot.slane %v9524_v37, %v8959_v14 }
 0x196   :  { %2232 = vmatmul.mubr.f32.gmra.mxu1 %v8379_v27  ;;  %7699 = vmatprep.subr.mxu1 %v1762_v28  ;;  %v1942_v57 = vadd.f32 %v1827_v9, %v9555_v49  ;;  %v2726_v28 = vld [vmem:[#allocation7 + $0x4c0] sm:$0xff] }
 0x197   :  { %7700 = vmatpush3.msra.mxu1 %v1746_v39  ;;  %2347 = vmatmul.mubr.f32.gmra.mxu0 %v8381_v23  ;;  %v1744_v27 = vld [vmem:[#allocation7 + $0x140] sm:$0xff]  ;;  %v1759_v39 = vld [vmem:[#allocation7 + $0x1b8] sm:$0xff]  ;;  %v1668_v4 = vadd.f32 %v1595_v38, %v9357_v22  ;;  %8400 = vtanh.f32 %v1943_v40  ;;  %v2638_v40 = vadd.f32 %v2484_v63, %v9131_v36  ;;  %v1757_v38 = vld [vmem:[#allocation7 + $0x1a8] sm:$0xff] }
 0x198   :  { %7701 = vmatprep.subr.mxu1 %v1761_v62  ;;  %7757 = vmatprep.subr.mxu0 %v2727_v59  ;;  %v2710_v23 = vld [vmem:[#allocation7 + $0x440] sm:$0xff]  ;;  %v1743_v62 = vld [vmem:[#allocation7 + $0x138] sm:$0xff]  ;;  %v8385_v59 = vpop.eup %8384  ;;  %8402 = vtanh.f32 %v1942_v57  ;;  %v1847_v57 = vrot.slane %v9227_v21, %v8968_v19 }
 0x199   :  { %2351 = vmatprep.mubr.f32.mxu0 %v8383_v54  ;;  %7702 = vmatpush3.msra.mxu1 %v1745_v45  ;;  %v2709_v54 = vld [vmem:[#allocation7 + $0x438] sm:$0xff]  ;;  %v8387_v37 = vpop.eup %8386  ;;  %v2480_v45 = vrot.slane %v9571_v1, %v8959_v14  ;;  %8404 = vtanh.f32 %v1668_v4 }
 0x19a   :  { %7758 = vmatpush3.msra.mxu0 %v2711_v55  ;;  %7703 = vmatprep.subr.mxu1 %v1760_v26  ;;  %v8389_v9 = vpop.eup %8388  ;;  %v2724_v55 = vld [vmem:[#allocation7 + $0x4b0] sm:$0xff]  ;;  %v1947_v63 = vadd.f32 %v1847_v57, %v9441_v15  ;;  %8406 = vtanh.f32 %v2638_v40  ;;  %v2496_v40 = vrot.slane %v9297_v8, %v8959_v14 }
 0x19b   :  { %7759 = vmatprep.subr.mxu0 %v2726_v28  ;;  %7704 = vmatpush3.msra.mxu1 %v1744_v27  ;;  %v1742_v26 = vld [vmem:[#allocation7 + $0x130] sm:$0xff]  ;;  %v8391_v28 = vpop.eup %8390 }
 0x19c   :  { %7760 = vmatpush3.msra.mxu0 %v2710_v23  ;;  %7705 = vmatprep.subr.mxu1 %v1759_v39  ;;  %v2708_v27 = vld [vmem:[#allocation7 + $0x430] sm:$0xff]  ;;  %v2637_v23 = vadd.f32 %v2480_v45, %v9124_v29  ;;  %v1843_v39 = vrot.slane %v9227_v21, %v8962_v17  ;;  %v1756_v45 = vld [vmem:[#allocation7 + $0x1a0] sm:$0xff] }
 0x19d   :  { %2352 = vmatmul.mubr.f32.gmra.mxu0 %v8385_v59  ;;  %7761 = vmatprep.subr.mxu0 %v2725_v52  ;;  %v2723_v52 = vld [vmem:[#allocation7 + $0x4a8] sm:$0xff]  ;;  %v2500_v59 = vrot.slane %v9297_v8, %v8965_v18 }
 0x19e   :  { %2356 = vmatprep.mubr.f32.mxu0 %v8387_v37  ;;  %7706 = vmatpush3.msra.mxu1 %v1743_v62  ;;  %v10697_v62 = vcombine.low %v9022_v0, %v9025_v2  ;;  %v8393_v37 = vpop.eup %8392  ;;  %v2722_v2 = vld [vmem:[#allocation7 + $0x4a0] sm:$0xff]  ;;  %8408 = vtanh.f32 %v2637_v23 }
 0x19f   :  { %2236 = vmatprep.mubr.f32.mxu1 %v8389_v9  ;;  %7762 = vmatpush3.msra.mxu0 %v2709_v54  ;;  %v1741_v54 = vld [vmem:[#allocation7 + $0x128] sm:$0xff]  ;;  %v1946_v9 = vadd.f32 %v1843_v39, %v9425_v35  ;;  %v2642_v0 = vadd.f32 %v2500_v59, %v9155_v34  ;;  %8410 = vtanh.f32 %v1947_v63 }
 0x1a0   :  { %2237 = vmatmul.mubr.f32.gmra.mxu1 %v8391_v28  ;;  %7707 = vmatprep.subr.mxu1 %v1758_v53  ;;  %v9591_v4 = vrot.slane %v10697_v62, %v8871_v20  ;;  %v2707_v53 = vld [vmem:[#allocation7 + $0x428] sm:$0xff]  ;;  %v8395_v28 = vpop.eup %8394  ;;  %v1740_v62 = vld [vmem:[#allocation7 + $0x120] sm:$0xff] }
 0x1a1   :  { %7763 = vmatprep.subr.mxu0 %v2724_v55  ;;  %7708 = vmatpush3.msra.mxu1 %v1742_v26  ;;  %v10698_v55 = vld [vmem:[#allocation15_spill] sm:$0xff]  ;;  %v8397_v59 = vpop.eup %8396  ;;  %8412 = vtanh.f32 %v1946_v9 }
 0x1a2   :  { %7764 = vmatpush3.msra.mxu0 %v2708_v27  ;;  %7709 = vmatprep.subr.mxu1 %v1757_v38  ;;  %v10699_v26 = vcombine.high %v9048_v32, %v10698_v55  ;;  %v2706_v27 = vld [vmem:[#allocation7 + $0x420] sm:$0xff]  ;;  %v1755_v38 = vld [vmem:[#allocation7 + $0x198] sm:$0xff]  ;;  %v2516_v39 = vrot.slane %v9591_v4, %v8965_v18  ;;  %v8399_v23 = vpop.eup %8398  ;;  %8414 = vtanh.f32 %v2642_v0  ;;  %v2512_v8 = vrot.slane %v9591_v4, %v8959_v14  ;;  %v2720_v9 = vld [vmem:[#allocation7 + $0x490] sm:$0xff] }
 0x1a3   :  { %2357 = vmatmul.mubr.f32.gmra.mxu0 %v8393_v37  ;;  %7765 = vmatprep.subr.mxu0 %v2723_v52  ;;  %v2721_v52 = vld [vmem:[#allocation7 + $0x498] sm:$0xff]  ;;  %v10700_v37 = vld [vmem:[#allocation22_spill] sm:$0xff] }
 0x1a4   :  { %v9602_v57 = vrot.slane %v10699_v26, %v8871_v20  ;;  %2361 = vmatprep.mubr.f32.mxu0 %v8395_v28  ;;  %7710 = vmatpush3.msra.mxu1 %v1741_v54  ;;  %v2641_v32 = vadd.f32 %v2496_v40, %v10700_v37  ;;  %v2646_v54 = vadd.f32 %v2516_v39, %v9178_v31  ;;  %v2705_v28 = vld [vmem:[#allocation7 + $0x418] sm:$0xff]  ;;  %v8401_v63 = vpop.eup %8400  ;;  %v10701_v0 = vld [vmem:[#allocation26_spill] sm:$0xff]  ;;  %v1754_v26 = vld [vmem:[#allocation7 + $0x190] sm:$0xff] }
 0x1a5   :  { %7766 = vmatpush3.msra.mxu0 %v2707_v53  ;;  %7711 = vmatprep.subr.mxu1 %v1756_v45  ;;  %v1739_v45 = vld [vmem:[#allocation7 + $0x118] sm:$0xff]  ;;  %v1863_v55 = vrot.slane %v10701_v0, %v8968_v19  ;;  %v2704_v40 = vld [vmem:[#allocation7 + $0x410] sm:$0xff] }
 0x1a6   :  { %7767 = vmatprep.subr.mxu0 %v2722_v2  ;;  %7712 = vmatpush3.msra.mxu1 %v1740_v62  ;;  %v2532_v53 = vrot.slane %v9602_v57, %v8965_v18  ;;  %v8403_v2 = vpop.eup %8402  ;;  %v2645_v62 = vadd.f32 %v2512_v8, %v9181_v42  ;;  %8416 = vtanh.f32 %v2641_v32  ;;  %v1738_v39 = vld [vmem:[#allocation7 + $0x110] sm:$0xff]  ;;  %v2719_v8 = vld [vmem:[#allocation7 + $0x488] sm:$0xff] }
 0x1a7   :  { %7768 = vmatpush3.msra.mxu0 %v2706_v27  ;;  %7713 = vmatprep.subr.mxu1 %v1755_v38  ;;  %v1859_v38 = vrot.slane %v10701_v0, %v8962_v17  ;;  %8418 = vtanh.f32 %v2646_v54  ;;  %v1737_v32 = vld [vmem:[#allocation7 + $0x108] sm:$0xff]  ;;  %v1752_v54 = vld [vmem:[#allocation7 + $0x180] sm:$0xff] }
 0x1a8   :  { %2362 = vmatmul.mubr.f32.gmra.mxu0 %v8397_v59  ;;  %7769 = vmatprep.subr.mxu0 %v2721_v52  ;;  %v2650_v27 = vadd.f32 %v2532_v53, %v9209_v16  ;;  %v1951_v52 = vadd.f32 %v1863_v55, %v9478_v13  ;;  %v1753_v59 = vld [vmem:[#allocation7 + $0x188] sm:$0xff]  ;;  %8420 = vtanh.f32 %v2645_v62  ;;  %v2702_v62 = vld [vmem:[#allocation7 + $0x400] sm:$0xff] }
 0x1a9   :  { %2241 = vmatprep.mubr.f32.mxu1 %v8401_v63  ;;  %2366 = vmatprep.mubr.f32.mxu0 %v8399_v23  ;;  %v8405_v63 = vpop.eup %8404  ;;  %v1950_v23 = vadd.f32 %v1859_v38, %v9459_v6  ;;  %v2703_v53 = vld [vmem:[#allocation7 + $0x408] sm:$0xff]  ;;  %v2544_v38 = vrot.slane %v9413_v58, %v8959_v14 }
 0x1aa   :  { %2242 = vmatmul.mubr.f32.gmra.mxu1 %v8403_v2  ;;  %7770 = vmatpush3.msra.mxu0 %v2705_v28  ;;  %v2528_v2 = vrot.slane %v9602_v57, %v8959_v14  ;;  %8422 = vtanh.f32 %v2650_v27  ;;  %v2548_v28 = vrot.slane %v9413_v58, %v8965_v18  ;;  %v8407_v0 = vpop.eup %8406  ;;  %v9644_v58 = vadd.f32 %v9469_v7, %v9305_v50  ;;  %v3223_v7 = vld [vmem:[#allocation7 + $0x670] sm:$0xff] }
 0x1ab   :  { %7714 = vmatpush3.msra.mxu1 %v1739_v45  ;;  %7771 = vmatprep.subr.mxu0 %v2720_v9  ;;  %v2718_v45 = vld [vmem:[#allocation7 + $0x480] sm:$0xff]  ;;  %8424 = vtanh.f32 %v1951_v52  ;;  %v8409_v27 = vpop.eup %8408  ;;  %v3240_v52 = vld [vmem:[#allocation7 + $0x6f8] sm:$0xff] }
 0x1ac   :  { %7715 = vmatprep.subr.mxu1 %v1754_v26  ;;  %7772 = vmatpush3.msra.mxu0 %v2704_v40  ;;  %v1736_v9 = vld [vmem:[#allocation7 + $0x100] sm:$0xff]  ;;  %v2649_v55 = vadd.f32 %v2528_v2, %v9212_v43  ;;  %v2765_v26 = vld [vmem:[#allocation7 + $0x5f8] sm:$0xff]  ;;  %v2654_v40 = vadd.f32 %v2548_v28, %v9233_v41  ;;  %8426 = vtanh.f32 %v1950_v23  ;;  %v2564_v23 = vrot.slane %v9448_v61, %v8965_v18  ;;  %v10704_v2 = vld [vmem:[#allocation30_spill] sm:$0xff] }
 0x1ad   :  { %7716 = vmatpush3.msra.mxu1 %v1738_v39  ;;  %2367 = vmatmul.mubr.f32.gmra.mxu0 %v8405_v63  ;;  %v9632_v39 = vadd.f32 %v9495_v46, %v9319_v11  ;;  %v3224_v11 = vld [vmem:[#allocation7 + $0x678] sm:$0xff]  ;;  %v10705_v28 = vld [vmem:[#allocation27_spill] sm:$0xff]  ;;  %v1875_v50 = vrot.slane %v10704_v2, %v8962_v17 }
 0x1ae   :  { %7717 = vmatprep.subr.mxu1 %v1753_v59  ;;  %7773 = vmatprep.subr.mxu0 %v2719_v8  ;;  %v8411_v59 = vpop.eup %8410  ;;  %v10702_v8 = vcombine.low %v9097_v24, %v9091_v25  ;;  %8428 = vtanh.f32 %v2649_v55  ;;  %v3239_v25 = vld [vmem:[#allocation7 + $0x6f0] sm:$0xff]  ;;  %v3238_v55 = vld [vmem:[#allocation7 + $0x6e8] sm:$0xff] }
 0x1af   :  { %7718 = vmatpush3.msra.mxu1 %v1737_v32  ;;  %7774 = vmatpush3.msra.mxu0 %v2703_v53  ;;  %v8413_v46 = vpop.eup %8412  ;;  %v10703_v32 = vld [vmem:[#allocation24_spill] sm:$0xff]  ;;  %8430 = vtanh.f32 %v2654_v40 }
 0x1b0   :  { %2830 = vmatprep.mubr.f32.mxu0 %v8407_v0  ;;  %7719 = vmatprep.subr.mxu1 %v1752_v54  ;;  %v9638_v63 = vrot.slane %v10702_v8, %v8871_v20  ;;  %v2653_v53 = vadd.f32 %v2544_v38, %v10703_v32  ;;  %v1879_v54 = vrot.slane %v10704_v2, %v8968_v19  ;;  %v8415_v24 = vpop.eup %8414  ;;  %v3221_v2 = vld [vmem:[#allocation7 + $0x660] sm:$0xff] }
 0x1b1   :  { %7775 = vmatprep.subr.mxu0 %v2718_v45  ;;  %7720 = vmatpush3.msra.mxu1 %v1736_v9  ;;  %v2658_v45 = vadd.f32 %v2564_v23, %v10705_v28  ;;  %v2560_v9 = vrot.slane %v9448_v61, %v8959_v14  ;;  %v3237_v23 = vld [vmem:[#allocation7 + $0x6e0] sm:$0xff] }
 0x1b2   :  { %7776 = vmatpush3.msra.mxu0 %v2702_v62  ;;  %7801 = vmatprep.subr.mxu1 %v2765_v26  ;;  %v1955_v0 = vadd.f32 %v1879_v54, %v9632_v39  ;;  %v10706_v62 = vld [vmem:[#allocation17_spill] sm:$0xff]  ;;  %v10707_v26 = vld [vmem:[#allocation16_spill] sm:$0xff]  ;;  %v2580_v38 = vrot.slane %v9638_v63, %v8965_v18  ;;  %8432 = vtanh.f32 %v2653_v53  ;;  %v2576_v54 = vrot.slane %v9638_v63, %v8959_v14 }
 0x1b3   :  { %2246 = vmatprep.mubr.f32.mxu1 %v8411_v59  ;;  %2831 = vmatmul.mubr.f32.vlgmr.msra.gmra.mxu0 %v8409_v27  ;;  %v10708_v40 = vcombine.high %v10706_v62, %v10707_v26  ;;  %v3222_v59 = vld [vmem:[#allocation7 + $0x668] sm:$0xff]  ;;  %v8417_v8 = vpop.eup %8416  ;;  %v2657_v61 = vadd.f32 %v2560_v9, %v9265_v10  ;;  %8434 = vtanh.f32 %v2658_v45 }
 0x1b4   :  { %2247 = vmatmul.mubr.f32.gmra.mxu1 %v8413_v46  ;;  %7857 = vmatprep.subr.mxu0 %v3240_v52  ;;  %v1954_v52 = vadd.f32 %v1875_v50, %v9644_v58  ;;  %v2662_v46 = vadd.f32 %v2580_v38, %v9293_v51  ;;  %8436 = vtanh.f32 %v1955_v0  ;;  %v2661_v45 = vadd.f32 %v2576_v54, %v9301_v48  ;;  %v3218_v54 = vld [vmem:[#allocation7 + $0x648] sm:$0xff] }
 0x1b5   :  { %2835 = vmatprep.mubr.f32.mxu0 %v8415_v24  ;;  %7858 = vmatpush3.msra.mxu0 %v3224_v11  ;;  %v9659_v27 = vrot.slane %v10708_v40, %v8871_v20  ;;  %v8419_v11 = vpop.eup %8418  ;;  %v3235_v40 = vld [vmem:[#allocation7 + $0x6d0] sm:$0xff] }
 0x1b6   :  { %7859 = vmatprep.subr.mxu0 %v3239_v25  ;;  %v3236_v25 = vld [vmem:[#allocation7 + $0x6d8] sm:$0xff]  ;;  %v8421_v24 = vpop.eup %8420  ;;  %8438 = vtanh.f32 %v1954_v52  ;;  %v10710_v52 = vld [vmem:[#allocation35_spill] sm:$0xff] }
 0x1b7   :  { %7860 = vmatpush3.msra.mxu0 %v3223_v7  ;;  %v2596_v53 = vrot.slane %v9659_v27, %v8965_v18  ;;  %v8423_v50 = vpop.eup %8422  ;;  %8440 = vtanh.f32 %v2657_v61  ;;  %v3220_v7 = vld [vmem:[#allocation7 + $0x658] sm:$0xff]  ;;  %v2592_v0 = vrot.slane %v9659_v27, %v8959_v14 }
 0x1b8   :  { %2836 = vmatmul.mubr.f32.gmra.mxu0 %v8417_v8  ;;  %7861 = vmatprep.subr.mxu0 %v3238_v55  ;;  %v8425_v9 = vpop.eup %8424  ;;  %v10709_v55 = vld [vmem:[#allocation18_spill] sm:$0xff]  ;;  %8442 = vtanh.f32 %v2662_v46  ;;  %v3219_v8 = vld [vmem:[#allocation7 + $0x650] sm:$0xff]  ;;  %v1495_v46 = vrot.slane %v9346_v5, %v8968_v19 }
 0x1b9   :  { %2840 = vmatprep.mubr.f32.mxu0 %v8419_v11  ;;  %7862 = vmatpush3.msra.mxu0 %v3222_v59  ;;  %v9673_v62 = vcombine.high %v10709_v55, %v10709_v55  ;;  %v2666_v26 = vadd.f32 %v2596_v53, %v9350_v33  ;;  %v8427_v38 = vpop.eup %8426  ;;  %v1895_v59 = vrot.slane %v10710_v52, %v8968_v19  ;;  %v3234_v11 = vld [vmem:[#allocation7 + $0x6c8] sm:$0xff]  ;;  %8444 = vtanh.f32 %v2661_v45 }
 0x1ba   :  { %7863 = vmatprep.subr.mxu0 %v3237_v23  ;;  %2251 = vmatprep.mubr.f32.mxu1 %v8425_v9  ;;  %v2665_v61 = vadd.f32 %v2592_v0, %v9357_v22  ;;  %v1891_v23 = vrot.slane %v10710_v52, %v8962_v17  ;;  %v3217_v0 = vld [vmem:[#allocation7 + $0x640] sm:$0xff] }
 0x1bb   :  { %7864 = vmatpush3.msra.mxu0 %v3221_v2  ;;  %2252 = vmatmul.mubr.f32.gmra.mxu1 %v8427_v38  ;;  %v1959_v2 = vadd.f32 %v1895_v59, %v9549_v3  ;;  %8446 = vtanh.f32 %v2666_v26  ;;  %v2987_v45 = vrot.slane %v9673_v62, %v8959_v14  ;;  %v1491_v38 = vrot.slane %v9346_v5, %v8962_v17  ;;  %v3232_v26 = vld [vmem:[#allocation7 + $0x6b8] sm:$0xff]  ;;  %v10714_v5 = vld [vmem:[#allocation39_spill] sm:$0xff] }
 0x1bc   :  { %2841 = vmatmul.mubr.f32.gmra.mxu0 %v8421_v24  ;;  %7865 = vmatprep.subr.mxu0 %v3236_v25  ;;  %v8429_v25 = vpop.eup %8428  ;;  %v2991_v24 = vrot.slane %v9673_v62, %v8965_v18  ;;  %v1958_v53 = vadd.f32 %v1891_v23, %v9531_v47  ;;  %8448 = vtanh.f32 %v2665_v61  ;;  %v3231_v61 = vld [vmem:[#allocation7 + $0x6b0] sm:$0xff] }
 0x1bd   :  { %2845 = vmatprep.mubr.f32.mxu0 %v8423_v50  ;;  %7866 = vmatpush3.msra.mxu0 %v3220_v7  ;;  %v3233_v50 = vld [vmem:[#allocation7 + $0x6c0] sm:$0xff]  ;;  %v8431_v9 = vpop.eup %8430  ;;  %v10711_v7 = vld [vmem:[#allocation43_spill] sm:$0xff]  ;;  %v3144_v59 = vadd.f32 %v2987_v45, %v9124_v29  ;;  %8450 = vtanh.f32 %v1959_v2 }
 0x1be   :  { %7867 = vmatprep.subr.mxu0 %v3235_v40  ;;  %v1643_v55 = vadd.f32 %v1495_v46, %v10711_v7  ;;  %v3145_v40 = vadd.f32 %v2991_v24, %v9131_v36  ;;  %v3216_v46 = vld [vmem:[#allocation7 + $0x638] sm:$0xff]  ;;  %8452 = vtanh.f32 %v1958_v53  ;;  %v3215_v45 = vld [vmem:[#allocation7 + $0x630] sm:$0xff]  ;;  %v3230_v53 = vld [vmem:[#allocation7 + $0x6a8] sm:$0xff] }
 0x1bf   :  { %7868 = vmatpush3.msra.mxu0 %v3219_v8  ;;  %v10712_v8 = vld [vmem:[#allocation29_spill] sm:$0xff] }
 0x1c0   :  { %2846 = vmatmul.mubr.f32.gmra.mxu0 %v8429_v25  ;;  %7869 = vmatprep.subr.mxu0 %v3234_v11  ;;  %v1511_v23 = vrot.slane %v10712_v8, %v8968_v19  ;;  %v8433_v25 = vpop.eup %8432  ;;  %v10713_v11 = vld [vmem:[#allocation44_spill] sm:$0xff]  ;;  %8454 = vtanh.f32 %v1643_v55  ;;  %v1507_v2 = vrot.slane %v10712_v8, %v8962_v17  ;;  %v3229_v8 = vld [vmem:[#allocation7 + $0x6a0] sm:$0xff] }
 0x1c1   :  { %2850 = vmatprep.mubr.f32.mxu0 %v8431_v9  ;;  %7870 = vmatpush3.msra.mxu0 %v3218_v54  ;;  %v1642_v20 = vadd.f32 %v1491_v38, %v10713_v11  ;;  %v8435_v24 = vpop.eup %8434  ;;  %v3007_v9 = vrot.slane %v10714_v5, %v8965_v18  ;;  %v10715_v54 = vld [vmem:[#allocation33_spill] sm:$0xff]  ;;  %8456 = vtanh.f32 %v3145_v40  ;;  %v10716_v38 = vld [vmem:[#allocation40_spill] sm:$0xff] }
 0x1c2   :  { %7871 = vmatprep.subr.mxu0 %v3233_v50  ;;  %v1647_v36 = vadd.f32 %v1511_v23, %v10715_v54  ;;  %v8437_v29 = vpop.eup %8436  ;;  %8458 = vtanh.f32 %v3144_v59  ;;  %v1527_v55 = vrot.slane %v10716_v38, %v8968_v19  ;;  %v3214_v23 = vld [vmem:[#allocation7 + $0x628] sm:$0xff]  ;;  %v3213_v59 = vld [vmem:[#allocation7 + $0x620] sm:$0xff] }
 0x1c3   :  { %7872 = vmatpush3.msra.mxu0 %v3217_v0  ;;  %v8439_v50 = vpop.eup %8438  ;;  %v3149_v0 = vadd.f32 %v3007_v9, %v9155_v34  ;;  %2256 = vmatprep.mubr.f32.mxu1 %v8437_v29  ;;  %8460 = vtanh.f32 %v1642_v20  ;;  %v1523_v9 = vrot.slane %v10716_v38, %v8962_v17  ;;  %v3228_v29 = vld [vmem:[#allocation7 + $0x698] sm:$0xff]  ;;  %v10718_v20 = vld [vmem:[#allocation45_spill] sm:$0xff] }
 0x1c4   :  { %2851 = vmatmul.mubr.f32.gmra.mxu0 %v8433_v25  ;;  %7873 = vmatprep.subr.mxu0 %v3232_v26  ;;  %v8441_v26 = vpop.eup %8440  ;;  %v10717_v25 = vld [vmem:[#allocation32_spill] sm:$0xff]  ;;  %8462 = vtanh.f32 %v1647_v36 }
 0x1c5   :  { %2855 = vmatprep.mubr.f32.mxu0 %v8435_v24  ;;  %7874 = vmatpush3.msra.mxu0 %v3216_v46  ;;  %v1646_v40 = vadd.f32 %v1507_v2, %v10717_v25  ;;  %v8443_v24 = vpop.eup %8442  ;;  %v1651_v46 = vadd.f32 %v1527_v55, %v9501_v60  ;;  %8464 = vtanh.f32 %v3149_v0  ;;  %v1650_v36 = vadd.f32 %v1523_v9, %v9510_v30  ;;  %v3211_v0 = vld [vmem:[#allocation7 + $0x610] sm:$0xff] }
 0x1c6   :  { %7875 = vmatprep.subr.mxu0 %v3231_v61  ;;  %2257 = vmatmul.mubr.f32.gmra.mxu1 %v8439_v50  ;;  %v1543_v61 = vrot.slane %v10718_v20, %v8968_v19  ;;  %v8445_v2 = vpop.eup %8444  ;;  %v3227_v50 = vld [vmem:[#allocation7 + $0x690] sm:$0xff]  ;;  %v3003_v55 = vrot.slane %v10714_v5, %v8959_v14 }
 0x1c7   :  { %7876 = vmatpush3.msra.mxu0 %v3215_v45  ;;  %v3212_v45 = vld [vmem:[#allocation7 + $0x618] sm:$0xff]  ;;  %8466 = vtanh.f32 %v1646_v40 }
 0x1c8   :  { %2856 = vmatmul.mubr.f32.gmra.mxu0 %v8441_v26  ;;  %7877 = vmatprep.subr.mxu0 %v3230_v53  ;;  %v8447_v53 = vpop.eup %8446  ;;  %8468 = vtanh.f32 %v1651_v46  ;;  %v1655_v38 = vadd.f32 %v1543_v61, %v9543_v56  ;;  %v3148_v40 = vadd.f32 %v3003_v55, %v10700_v37  ;;  %v1575_v37 = vrot.slane %v9431_v12, %v8968_v19 }
 0x1c9   :  { %2860 = vmatprep.mubr.f32.mxu0 %v8443_v24  ;;  %7878 = vmatpush3.msra.mxu0 %v3214_v23  ;;  %v1539_v23 = vrot.slane %v10718_v20, %v8962_v17  ;;  %v8449_v26 = vpop.eup %8448  ;;  %8470 = vtanh.f32 %v1650_v36  ;;  %v3209_v36 = vld [vmem:[#allocation7 + $0x600] sm:$0xff] }
 0x1ca   :  { %7879 = vmatprep.subr.mxu0 %v3229_v8  ;;  %v10719_v8 = vld [vmem:[#allocation42_spill] sm:$0xff]  ;;  %v8451_v9 = vpop.eup %8450  ;;  %8472 = vtanh.f32 %v1655_v38 }
 0x1cb   :  { %7880 = vmatpush3.msra.mxu0 %v3213_v59  ;;  %v1559_v24 = vrot.slane %v10719_v8, %v8968_v19  ;;  %v3226_v59 = vld [vmem:[#allocation7 + $0x688] sm:$0xff]  ;;  %v1654_v46 = vadd.f32 %v1539_v23, %v9555_v49  ;;  %v8453_v61 = vpop.eup %8452  ;;  %2261 = vmatprep.mubr.f32.mxu1 %v8451_v9  ;;  %8474 = vtanh.f32 %v3148_v40  ;;  %v2764_v9 = vld [vmem:[#allocation7 + $0x5f0] sm:$0xff]  ;;  %v3747_v40 = vld [vmem:[#allocation7 + $0x8f8] sm:$0xff] }
 0x1cc   :  { %2861 = vmatmul.mubr.f32.gmra.mxu0 %v8445_v2  ;;  %7881 = vmatprep.subr.mxu0 %v3228_v29  ;;  %v3210_v29 = vld [vmem:[#allocation7 + $0x608] sm:$0xff]  ;;  %v10720_v2 = vld [vmem:[#allocation41_spill] sm:$0xff] }
 0x1cd   :  { %2865 = vmatprep.mubr.f32.mxu0 %v8447_v53  ;;  %7882 = vmatpush3.msra.mxu0 %v3212_v45  ;;  %v3023_v20 = vrot.slane %v10720_v2, %v8965_v18  ;;  %v1659_v45 = vadd.f32 %v1559_v24, %v9441_v15  ;;  %v3225_v53 = vld [vmem:[#allocation7 + $0x680] sm:$0xff]  ;;  %v8455_v55 = vpop.eup %8454  ;;  %8476 = vtanh.f32 %v1654_v46  ;;  %v2749_v24 = vld [vmem:[#allocation7 + $0x578] sm:$0xff] }
 0x1ce   :  { %7883 = vmatprep.subr.mxu0 %v3227_v50  ;;  %v1555_v50 = vrot.slane %v10719_v8, %v8962_v17  ;;  %2262 = vmatmul.mubr.f32.gmra.mxu1 %v8453_v61  ;;  %v8457_v23 = vpop.eup %8456  ;;  %v10721_v46 = vld [vmem:[#allocation52_spill] sm:$0xff] }
 0x1cf   :  { %7884 = vmatpush3.msra.mxu0 %v3211_v0  ;;  %v3153_v0 = vadd.f32 %v3023_v20, %v9178_v31  ;;  %2436 = vmatprep.mubr.f32.mxu1 %v8455_v55  ;;  %v8459_v38 = vpop.eup %8458  ;;  %8478 = vtanh.f32 %v1659_v45  ;;  %v1571_v20 = vrot.slane %v9431_v12, %v8962_v17  ;;  %v1591_v55 = vrot.slane %v10721_v46, %v8968_v19 }
 0x1d0   :  { %2866 = vmatmul.mubr.f32.gmra.mxu0 %v8449_v26  ;;  %7885 = vmatprep.subr.mxu0 %v3226_v59  ;;  %v1658_v26 = vadd.f32 %v1555_v50, %v9425_v35  ;;  %v8461_v8 = vpop.eup %8460  ;;  %v1663_v59 = vadd.f32 %v1575_v37, %v9478_v13  ;;  %v2747_v50 = vld [vmem:[#allocation7 + $0x568] sm:$0xff]  ;;  %v9740_v12 = vcombine.high %v9200_v44, %v9200_v44 }
 0x1d1   :  { %7886 = vmatpush3.msra.mxu0 %v3210_v29  ;;  %3337 = vmatprep.mubr.f32.mxu0 %v8457_v23  ;;  %v8463_v61 = vpop.eup %8462  ;;  %v2748_v29 = vld [vmem:[#allocation7 + $0x570] sm:$0xff]  ;;  %8480 = vtanh.f32 %v3153_v0  ;;  %v1662_v37 = vadd.f32 %v1571_v20, %v9459_v6  ;;  %v3019_v23 = vrot.slane %v10720_v2, %v8959_v14  ;;  %v1667_v0 = vadd.f32 %v1591_v55, %v9632_v39  ;;  %v2745_v20 = vld [vmem:[#allocation7 + $0x558] sm:$0xff] }
 0x1d2   :  { %7887 = vmatprep.subr.mxu0 %v3225_v53  ;;  %2437 = vmatmul.mubr.f32.vlgmr.msra.gmra.mxu1 %v8461_v8  ;;  %v2763_v53 = vld [vmem:[#allocation7 + $0x5e8] sm:$0xff]  ;;  %v8465_v45 = vpop.eup %8464  ;;  %8482 = vtanh.f32 %v1658_v26  ;;  %v3731_v26 = vld [vmem:[#allocation7 + $0x878] sm:$0xff]  ;;  %v1587_v8 = vrot.slane %v10721_v46, %v8962_v17  ;;  %v3039_v55 = vrot.slane %v9740_v12, %v8965_v18  ;;  %v2760_v46 = vld [vmem:[#allocation7 + $0x5d0] sm:$0xff] }
 0x1d3   :  { %7888 = vmatpush3.msra.mxu0 %v3209_v36  ;;  %2441 = vmatprep.mubr.f32.mxu1 %v8463_v61  ;;  %8484 = vtanh.f32 %v1663_v59  ;;  %v3152_v44 = vadd.f32 %v3019_v23, %v9181_v42  ;;  %v2761_v61 = vld [vmem:[#allocation7 + $0x5d8] sm:$0xff]  ;;  %v2759_v23 = vld [vmem:[#allocation7 + $0x5c8] sm:$0xff] }
 0x1d4   :  { %3338 = vmatmul.mubr.f32.vlgmr.msra.gmra.mxu0 %v8459_v38  ;;  %7802 = vmatpush3.msra.mxu1 %v2749_v24  ;;  %v8467_v36 = vpop.eup %8466  ;;  %v2762_v38 = vld [vmem:[#allocation7 + $0x5e0] sm:$0xff]  ;;  %8486 = vtanh.f32 %v1662_v37  ;;  %v1666_v59 = vadd.f32 %v1587_v8, %v9644_v58  ;;  %v3157_v37 = vadd.f32 %v3039_v55, %v9209_v16  ;;  %v10722_v8 = vld [vmem:[#allocation55_spill] sm:$0xff] }
 0x1d5   :  { %7803 = vmatprep.subr.mxu1 %v2764_v9  ;;  %7969 = vmatprep.subr.mxu0 %v3747_v40  ;;  %v8469_v24 = vpop.eup %8468  ;;  %v2746_v9 = vld [vmem:[#allocation7 + $0x560] sm:$0xff]  ;;  %v3746_v40 = vld [vmem:[#allocation7 + $0x8f0] sm:$0xff]  ;;  %8488 = vtanh.f32 %v1667_v0  ;;  %v2743_v0 = vld [vmem:[#allocation7 + $0x548] sm:$0xff] }
 0x1d6   :  { %7804 = vmatpush3.msra.mxu1 %v2748_v29  ;;  %3342 = vmatprep.mubr.f32.mxu0 %v8465_v45  ;;  %v8471_v29 = vpop.eup %8470  ;;  %8490 = vtanh.f32 %v3152_v44 }
 0x1d7   :  { %2442 = vmatmul.mubr.f32.gmra.mxu1 %v8467_v36  ;;  %7805 = vmatprep.subr.mxu1 %v2763_v53  ;;  %v3730_v53 = vld [vmem:[#allocation7 + $0x870] sm:$0xff]  ;;  %v8473_v45 = vpop.eup %8472  ;;  %v2492_v36 = vrot.slane %v9571_v1, %v8968_v19  ;;  %8492 = vtanh.f32 %v1666_v59  ;;  %v2757_v59 = vld [vmem:[#allocation7 + $0x5b8] sm:$0xff] }
 0x1d8   :  { %2446 = vmatprep.mubr.f32.mxu1 %v8469_v24  ;;  %7806 = vmatpush3.msra.mxu1 %v2747_v50  ;;  %v2744_v50 = vld [vmem:[#allocation7 + $0x550] sm:$0xff]  ;;  %8494 = vtanh.f32 %v10722_v8  ;;  %v2524_v8 = vrot.slane %v9591_v4, %v8968_v19 }
 0x1d9   :  { %7807 = vmatprep.subr.mxu1 %v2762_v38  ;;  %7970 = vmatpush3.msra.mxu0 %v3731_v26  ;;  %v8475_v38 = vpop.eup %8474  ;;  %v2640_v24 = vadd.f32 %v2492_v36, %v10711_v7  ;;  %8496 = vtanh.f32 %v3157_v37  ;;  %v2756_v37 = vld [vmem:[#allocation7 + $0x5b0] sm:$0xff]  ;;  %v3729_v36 = vld [vmem:[#allocation7 + $0x868] sm:$0xff] }
 0x1da   :  { %7808 = vmatpush3.msra.mxu1 %v2746_v9  ;;  %7971 = vmatprep.subr.mxu0 %v3746_v40  ;;  %v8477_v26 = vpop.eup %8476  ;;  %v2758_v9 = vld [vmem:[#allocation7 + $0x5c0] sm:$0xff]  ;;  %v3745_v40 = vld [vmem:[#allocation7 + $0x8e8] sm:$0xff] }
 0x1db   :  { %2447 = vmatmul.mubr.f32.gmra.mxu1 %v8471_v29  ;;  %7809 = vmatprep.subr.mxu1 %v2761_v61  ;;  %v2488_v61 = vrot.slane %v9571_v1, %v8962_v17  ;;  %v3035_v1 = vrot.slane %v9740_v12, %v8959_v14 }
 0x1dc   :  { %2451 = vmatprep.mubr.f32.mxu1 %v8473_v45  ;;  %7810 = vmatpush3.msra.mxu1 %v2745_v20  ;;  %v8479_v44 = vpop.eup %8478  ;;  %v2742_v20 = vld [vmem:[#allocation7 + $0x540] sm:$0xff] }
 0x1dd   :  { %7811 = vmatprep.subr.mxu1 %v2760_v46  ;;  %7972 = vmatpush3.msra.mxu0 %v3730_v53  ;;  %v2639_v55 = vadd.f32 %v2488_v61, %v10713_v11  ;;  %v10723_v46 = vld [vmem:[#allocation54_spill] sm:$0xff]  ;;  %v2741_v53 = vld [vmem:[#allocation7 + $0x538] sm:$0xff]  ;;  %v2648_v61 = vadd.f32 %v2524_v8, %v9501_v60  ;;  %v2752_v8 = vld [vmem:[#allocation7 + $0x590] sm:$0xff] }
 0x1de   :  { %7812 = vmatpush3.msra.mxu1 %v2744_v50  ;;  %3343 = vmatmul.mubr.f32.gmra.mxu0 %v8475_v38  ;;  %v8481_v29 = vpop.eup %8480  ;;  %8498 = vtanh.f32 %v10723_v46  ;;  %v9762_v50 = vcombine.high %v9227_v21, %v9227_v21  ;;  %v2740_v38 = vld [vmem:[#allocation7 + $0x530] sm:$0xff]  ;;  %v2755_v21 = vld [vmem:[#allocation7 + $0x5a8] sm:$0xff]  ;;  %v2520_v46 = vrot.slane %v9591_v4, %v8962_v17 }
 0x1df   :  { %2452 = vmatmul.mubr.f32.gmra.mxu1 %v8477_v26  ;;  %7813 = vmatprep.subr.mxu1 %v2759_v23  ;;  %v8483_v45 = vpop.eup %8482  ;;  %8500 = vtanh.f32 %v2640_v24  ;;  %v3156_v26 = vadd.f32 %v3035_v1, %v9212_v43  ;;  %v2739_v24 = vld [vmem:[#allocation7 + $0x528] sm:$0xff]  ;;  %v2753_v1 = vld [vmem:[#allocation7 + $0x598] sm:$0xff] }
 0x1e0   :  { %2456 = vmatprep.mubr.f32.mxu1 %v8479_v44  ;;  %7814 = vmatpush3.msra.mxu1 %v2743_v0  ;;  %v8485_v23 = vpop.eup %8484  ;;  %v3744_v0 = vld [vmem:[#allocation7 + $0x8e0] sm:$0xff]  ;;  %8502 = vtanh.f32 %v2639_v55 }
 0x1e1   :  { %7815 = vmatprep.subr.mxu1 %v2758_v9  ;;  %7973 = vmatprep.subr.mxu0 %v3745_v40  ;;  %v8487_v9 = vpop.eup %8486  ;;  %v3055_v40 = vrot.slane %v9762_v50, %v8965_v18  ;;  %v10724_v44 = vld [vmem:[#allocation37_spill] sm:$0xff] }
 0x1e2   :  { %7816 = vmatpush3.msra.mxu1 %v2742_v20  ;;  %3347 = vmatprep.mubr.f32.mxu0 %v8481_v29  ;;  %8504 = vtanh.f32 %v10724_v44  ;;  %v2754_v20 = vld [vmem:[#allocation7 + $0x5a0] sm:$0xff]  ;;  %v8489_v29 = vpop.eup %8488  ;;  %v2751_v44 = vld [vmem:[#allocation7 + $0x588] sm:$0xff] }
 0x1e3   :  { %2457 = vmatmul.mubr.f32.gmra.mxu1 %v8483_v45  ;;  %7817 = vmatprep.subr.mxu1 %v2757_v59  ;;  %v3728_v59 = vld [vmem:[#allocation7 + $0x860] sm:$0xff]  ;;  %8506 = vtanh.f32 %v3156_v26  ;;  %v2540_v45 = vrot.slane %v9602_v57, %v8968_v19 }
 0x1e4   :  { %2461 = vmatprep.mubr.f32.mxu1 %v8485_v23  ;;  %7818 = vmatpush3.msra.mxu1 %v2741_v53  ;;  %v2738_v55 = vld [vmem:[#allocation7 + $0x520] sm:$0xff]  ;;  %v3161_v53 = vadd.f32 %v3055_v40, %v9233_v41  ;;  %v2647_v23 = vadd.f32 %v2520_v46, %v9510_v30  ;;  %v2736_v40 = vld [vmem:[#allocation7 + $0x510] sm:$0xff]  ;;  %v3051_v46 = vrot.slane %v9762_v50, %v8959_v14 }
 0x1e5   :  { %7819 = vmatprep.subr.mxu1 %v2756_v37  ;;  %7974 = vmatpush3.msra.mxu0 %v3729_v36  ;;  %v8491_v37 = vpop.eup %8490  ;;  %v10725_v36 = vld [vmem:[#allocation34_spill] sm:$0xff]  ;;  %v2652_v26 = vadd.f32 %v2540_v45, %v9543_v56  ;;  %v3727_v45 = vld [vmem:[#allocation7 + $0x858] sm:$0xff] }
 0x1e6   :  { %7820 = vmatpush3.msra.mxu1 %v2740_v38  ;;  %7975 = vmatprep.subr.mxu0 %v3744_v0  ;;  %8508 = vtanh.f32 %v10725_v36  ;;  %v2737_v38 = vld [vmem:[#allocation7 + $0x518] sm:$0xff]  ;;  %v8493_v0 = vpop.eup %8492  ;;  %v3160_v36 = vadd.f32 %v3051_v46, %v10703_v32  ;;  %v10728_v46 = vld [vmem:[#allocation46_spill] sm:$0xff] }
 0x1e7   :  { %2462 = vmatmul.mubr.f32.gmra.mxu1 %v8487_v9  ;;  %7821 = vmatprep.subr.mxu1 %v2755_v21  ;;  %8510 = vtanh.f32 %v2648_v61  ;;  %v3743_v21 = vld [vmem:[#allocation7 + $0x8d8] sm:$0xff]  ;;  %v8495_v9 = vpop.eup %8494 }
 0x1e8   :  { %2466 = vmatprep.mubr.f32.mxu1 %v8489_v29  ;;  %7822 = vmatpush3.msra.mxu1 %v2739_v24  ;;  %v2536_v24 = vrot.slane %v9602_v57, %v8962_v17  ;;  %8512 = vtanh.f32 %v3161_v53 }
 0x1e9   :  { %7823 = vmatprep.subr.mxu1 %v2754_v20  ;;  %7976 = vmatpush3.msra.mxu0 %v3728_v59  ;;  %v8497_v20 = vpop.eup %8496  ;;  %8514 = vtanh.f32 %v2647_v23  ;;  %v2735_v59 = vld [vmem:[#allocation7 + $0x508] sm:$0xff]  ;;  %v3272_v23 = vld [vmem:[#allocation7 + $0x7f8] sm:$0xff] }
 0x1ea   :  { %7824 = vmatpush3.msra.mxu1 %v2738_v55  ;;  %3348 = vmatmul.mubr.f32.gmra.mxu0 %v8491_v37  ;;  %v2651_v61 = vadd.f32 %v2536_v24, %v9555_v49  ;;  %8516 = vtanh.f32 %v2652_v26  ;;  %v2750_v55 = vld [vmem:[#allocation7 + $0x580] sm:$0xff]  ;;  %v3742_v37 = vld [vmem:[#allocation7 + $0x8d0] sm:$0xff]  ;;  %v3256_v26 = vld [vmem:[#allocation7 + $0x778] sm:$0xff] }
 0x1eb   :  { %2467 = vmatmul.mubr.f32.gmra.mxu1 %v8493_v0  ;;  %7825 = vmatprep.subr.mxu1 %v2753_v1  ;;  %v8499_v29 = vpop.eup %8498  ;;  %v2734_v1 = vld [vmem:[#allocation7 + $0x500] sm:$0xff]  ;;  %v3726_v24 = vld [vmem:[#allocation7 + $0x850] sm:$0xff] }
 0x1ec   :  { %2471 = vmatprep.mubr.f32.mxu1 %v8495_v9  ;;  %7826 = vmatpush3.msra.mxu1 %v2737_v38  ;;  %v8501_v53 = vpop.eup %8500  ;;  %v10726_v38 = vld [vmem:[#allocation49_spill] sm:$0xff]  ;;  %8518 = vtanh.f32 %v2651_v61  ;;  %v3271_v9 = vld [vmem:[#allocation7 + $0x7f0] sm:$0xff]  ;;  %v3270_v61 = vld [vmem:[#allocation7 + $0x7e8] sm:$0xff] }
 0x1ed   :  { %7827 = vmatprep.subr.mxu1 %v2752_v8  ;;  %7977 = vmatprep.subr.mxu0 %v3743_v21  ;;  %v3071_v0 = vrot.slane %v10726_v38, %v8965_v18  ;;  %v8503_v8 = vpop.eup %8502  ;;  %v10727_v21 = vld [vmem:[#allocation47_spill] sm:$0xff] }
 0x1ee   :  { %7828 = vmatpush3.msra.mxu1 %v2736_v40  ;;  %3352 = vmatprep.mubr.f32.mxu0 %v8497_v20  ;;  %8520 = vtanh.f32 %v10727_v21  ;;  %v3255_v20 = vld [vmem:[#allocation7 + $0x770] sm:$0xff]  ;;  %v3253_v21 = vld [vmem:[#allocation7 + $0x760] sm:$0xff] }
 0x1ef   :  { %2472 = vmatmul.mubr.f32.gmra.mxu1 %v8499_v29  ;;  %7829 = vmatprep.subr.mxu1 %v2751_v44  ;;  %v8505_v40 = vpop.eup %8504  ;;  %v3165_v44 = vadd.f32 %v3071_v0, %v10705_v28  ;;  %8522 = vtanh.f32 %v3160_v36  ;;  %v3067_v29 = vrot.slane %v10726_v38, %v8959_v14  ;;  %v3741_v36 = vld [vmem:[#allocation7 + $0x8c8] sm:$0xff] }
 0x1f0   :  { %7830 = vmatpush3.msra.mxu1 %v2735_v59  ;;  %2935 = vmatprep.mubr.f32.mxu1 %v8501_v53  ;;  %v8507_v59 = vpop.eup %8506  ;;  %8524 = vtanh.f32 %v10728_v46  ;;  %v10729_v53 = vld [vmem:[#allocation51_spill] sm:$0xff] }
 0x1f1   :  { %7831 = vmatprep.subr.mxu1 %v2750_v55  ;;  %7978 = vmatpush3.msra.mxu0 %v3727_v45  ;;  %v3254_v55 = vld [vmem:[#allocation7 + $0x768] sm:$0xff]  ;;  %8526 = vtanh.f32 %v10729_v53  ;;  %v3164_v0 = vadd.f32 %v3067_v29, %v9265_v10 }
 0x1f2   :  { %7832 = vmatpush3.msra.mxu1 %v2734_v1  ;;  %7979 = vmatprep.subr.mxu0 %v3742_v37  ;;  %v2588_v1 = vrot.slane %v9638_v63, %v8968_v19  ;;  %v3269_v37 = vld [vmem:[#allocation7 + $0x7e0] sm:$0xff]  ;;  %8528 = vtanh.f32 %v3165_v44  ;;  %v3252_v44 = vld [vmem:[#allocation7 + $0x758] sm:$0xff]  ;;  %v3725_v53 = vld [vmem:[#allocation7 + $0x848] sm:$0xff] }
 0x1f3   :  { %2936 = vmatmul.mubr.f32.vlgmr.msra.gmra.mxu1 %v8503_v8  ;;  %7913 = vmatprep.subr.mxu1 %v3272_v23  ;;  %v8509_v45 = vpop.eup %8508 }
 0x1f4   :  { %2940 = vmatprep.mubr.f32.mxu1 %v8505_v40  ;;  %7914 = vmatpush3.msra.mxu1 %v3256_v26  ;;  %v8511_v23 = vpop.eup %8510  ;;  %v10730_v26 = vld [vmem:[#allocation50_spill] sm:$0xff] }
 0x1f5   :  { %7915 = vmatprep.subr.mxu1 %v3271_v9  ;;  %7980 = vmatpush3.msra.mxu0 %v3726_v24  ;;  %v3087_v8 = vrot.slane %v10730_v26, %v8965_v18  ;;  %v2664_v9 = vadd.f32 %v2588_v1, %v9632_v39  ;;  %v3268_v24 = vld [vmem:[#allocation7 + $0x7d8] sm:$0xff]  ;;  %v8513_v40 = vpop.eup %8512 }
 0x1f6   :  { %7916 = vmatpush3.msra.mxu1 %v3255_v20  ;;  %3353 = vmatmul.mubr.f32.gmra.mxu0 %v8507_v59  ;;  %v9803_v20 = vcombine.high %v10710_v52, %v10710_v52  ;;  %v8515_v46 = vpop.eup %8514  ;;  %v3083_v52 = vrot.slane %v10730_v26, %v8959_v14 }
 0x1f7   :  { %2941 = vmatmul.mubr.f32.gmra.mxu1 %v8509_v45  ;;  %7917 = vmatprep.subr.mxu1 %v3270_v61  ;;  %v3169_v59 = vadd.f32 %v3087_v8, %v9293_v51  ;;  %v10731_v45 = vld [vmem:[#allocation48_spill] sm:$0xff]  ;;  %v2584_v61 = vrot.slane %v9638_v63, %v8962_v17  ;;  %v8517_v1 = vpop.eup %8516 }
 0x1f8   :  { %2945 = vmatprep.mubr.f32.mxu1 %v8511_v23  ;;  %7918 = vmatpush3.msra.mxu1 %v3254_v55  ;;  %8530 = vtanh.f32 %v10731_v45  ;;  %v3267_v55 = vld [vmem:[#allocation7 + $0x7d0] sm:$0xff]  ;;  %v2604_v45 = vrot.slane %v9659_v27, %v8968_v19 }
 0x1f9   :  { %7919 = vmatprep.subr.mxu1 %v3269_v37  ;;  %7981 = vmatprep.subr.mxu0 %v3741_v36  ;;  %8532 = vtanh.f32 %v3164_v0  ;;  %v3251_v37 = vld [vmem:[#allocation7 + $0x750] sm:$0xff]  ;;  %v3740_v36 = vld [vmem:[#allocation7 + $0x8c0] sm:$0xff]  ;;  %v2663_v8 = vadd.f32 %v2584_v61, %v9644_v58  ;;  %v3168_v0 = vadd.f32 %v3083_v52, %v9301_v48  ;;  %v8519_v51 = vpop.eup %8518 }
 0x1fa   :  { %7920 = vmatpush3.msra.mxu1 %v3253_v21  ;;  %3357 = vmatprep.mubr.f32.mxu0 %v8513_v40  ;;  %8534 = vtanh.f32 %v2664_v9  ;;  %v3266_v21 = vld [vmem:[#allocation7 + $0x7c8] sm:$0xff]  ;;  %v2668_v9 = vadd.f32 %v2604_v45, %v9549_v3  ;;  %v3265_v61 = vld [vmem:[#allocation7 + $0x7c0] sm:$0xff] }
 0x1fb   :  { %2946 = vmatmul.mubr.f32.gmra.mxu1 %v8515_v46  ;;  %7921 = vmatprep.subr.mxu1 %v3268_v24  ;;  %8536 = vtanh.f32 %v3169_v59  ;;  %v3103_v24 = vrot.slane %v9803_v20, %v8965_v18  ;;  %v3250_v46 = vld [vmem:[#allocation7 + $0x748] sm:$0xff]  ;;  %v3249_v52 = vld [vmem:[#allocation7 + $0x740] sm:$0xff]  ;;  %v2600_v59 = vrot.slane %v9659_v27, %v8962_v17 }
 0x1fc   :  { %2950 = vmatprep.mubr.f32.mxu1 %v8517_v1  ;;  %7922 = vmatpush3.msra.mxu1 %v3252_v44  ;;  %v3724_v1 = vld [vmem:[#allocation7 + $0x840] sm:$0xff]  ;;  %v8521_v44 = vpop.eup %8520  ;;  %8538 = vtanh.f32 %v2663_v8  ;;  %v3248_v8 = vld [vmem:[#allocation7 + $0x738] sm:$0xff] }
 0x1fd   :  { %7923 = vmatprep.subr.mxu1 %v3267_v55  ;;  %7982 = vmatpush3.msra.mxu0 %v3725_v53  ;;  %v3264_v55 = vld [vmem:[#allocation7 + $0x7b8] sm:$0xff]  ;;  %v8523_v53 = vpop.eup %8522  ;;  %8540 = vtanh.f32 %v3168_v0  ;;  %v2999_v0 = vrot.slane %v9673_v62, %v8968_v19 }
 0x1fe   :  { %7924 = vmatpush3.msra.mxu1 %v3251_v37  ;;  %7983 = vmatprep.subr.mxu0 %v3740_v36  ;;  %v3099_v37 = vrot.slane %v9803_v20, %v8959_v14  ;;  %v3739_v36 = vld [vmem:[#allocation7 + $0x8b8] sm:$0xff]  ;;  %8542 = vtanh.f32 %v2668_v9  ;;  %v3738_v9 = vld [vmem:[#allocation7 + $0x8b0] sm:$0xff] }
 0x1ff   :  { %2951 = vmatmul.mubr.f32.gmra.mxu1 %v8519_v51  ;;  %7925 = vmatprep.subr.mxu1 %v3266_v21  ;;  %v2667_v51 = vadd.f32 %v2600_v59, %v9531_v47 }
 0x200   :  { %2955 = vmatprep.mubr.f32.mxu1 %v8521_v44  ;;  %7926 = vmatpush3.msra.mxu1 %v3250_v46  ;;  %v3172_v21 = vadd.f32 %v3099_v37, %v9357_v22  ;;  %v3263_v46 = vld [vmem:[#allocation7 + $0x7b0] sm:$0xff]  ;;  %v10733_v44 = vld [vmem:[#allocation21_spill] sm:$0xff]  ;;  %v2995_v22 = vrot.slane %v9673_v62, %v8962_v17  ;;  %v3015_v62 = vrot.slane %v10714_v5, %v8968_v19 }
 0x201   :  { %7927 = vmatprep.subr.mxu1 %v3265_v61  ;;  %7984 = vmatpush3.msra.mxu0 %v3724_v1  ;;  %v3498_v59 = vrot.slane %v10733_v44, %v8965_v18  ;;  %v3722_v37 = vld [vmem:[#allocation7 + $0x830] sm:$0xff] }
 0x202   :  { %7928 = vmatpush3.msra.mxu1 %v3249_v52  ;;  %3358 = vmatmul.mubr.f32.gmra.mxu0 %v8523_v53  ;;  %v3247_v52 = vld [vmem:[#allocation7 + $0x730] sm:$0xff]  ;;  %v3494_v53 = vrot.slane %v10733_v44, %v8959_v14 }
 0x203   :  { %7929 = vmatprep.subr.mxu1 %v3264_v55  ;;  %7985 = vmatprep.subr.mxu0 %v3739_v36  ;;  %v3262_v36 = vld [vmem:[#allocation7 + $0x7a8] sm:$0xff] }
 0x204   :  { %7930 = vmatpush3.msra.mxu1 %v3248_v8  ;;  %v3737_v8 = vld [vmem:[#allocation7 + $0x8a8] sm:$0xff] }
 0x205   :  { %7931 = vmatprep.subr.mxu1 %v3263_v46 }
 0x206   :  { %7932 = vmatpush3.msra.mxu1 %v3247_v52  ;;  %v3736_v52 = vld [vmem:[#allocation7 + $0x8a0] sm:$0xff] }
 0x207   :  { %7933 = vmatprep.subr.mxu1 %v3262_v36 }
 0x208   :  { %v7553_v29 = vpop.f32.mrf.mxu0 }
 0x20a   :  { %v7554_v23 = vpop.f32.mrf.mxu0 }
 0x20b   :  { %v9814_v40 = vadd.f32 %v7554_v23, %v7553_v29  ;;  %v3173_v29 = vadd.f32 %v3103_v24, %v9350_v33  ;;  %v8525_v23 = vpop.eup %8524  ;;  %v3723_v24 = vld [vmem:[#allocation7 + $0x838] sm:$0xff]  ;;  %v10735_v33 = vld [vmem:[#allocation19_spill] sm:$0xff] }
 0x20c   :  { %v8527_v45 = vpop.eup %8526  ;;  %2956 = vmatmul.mubr.f32.gmra.mxu1 %v8525_v23  ;;  %v10734_v23 = vld [vmem:[#allocation20_spill] sm:$0xff]  ;;  %7986 = vmatpush3.msra.mxu0 %v3723_v24  ;;  %v3651_v44 = vadd.f32 %v3494_v53, %v10735_v33  ;;  %v9847_v33 = vcombine.high %v9591_v4, %v9591_v4  ;;  %v3245_v53 = vld [vmem:[#allocation7 + $0x720] sm:$0xff] }
 0x20d   :  { %10732 = vst [vmem:[#allocation15_spill] sm:$0xff] %v9814_v40  ;;  %8544 = vtanh.f32 %v3173_v29  ;;  %v8529_v1 = vpop.eup %8528  ;;  %2960 = vmatprep.mubr.f32.mxu1 %v8527_v45  ;;  %v3147_v29 = vadd.f32 %v2999_v0, %v10711_v7  ;;  %v3652_v40 = vadd.f32 %v3498_v59, %v10734_v23  ;;  %v10736_v0 = vld [vmem:[#allocation23_spill] sm:$0xff]  ;;  %7987 = vmatprep.subr.mxu0 %v3738_v9  ;;  %v3720_v4 = vld [vmem:[#allocation7 + $0x820] sm:$0xff] }
 0x20e   :  { %v7556_v61 = vpop.f32.mrf.mxu0  ;;  %3362 = vmatprep.mubr.f32.mxu0 %v8529_v1  ;;  %8546 = vtanh.f32 %v2667_v51  ;;  %v8531_v47 = vpop.eup %8530  ;;  %v3514_v1 = vrot.slane %v10736_v0, %v8965_v18  ;;  %v3146_v23 = vadd.f32 %v2995_v22, %v10713_v11  ;;  %7988 = vmatpush3.msra.mxu0 %v3722_v37  ;;  %v3246_v51 = vld [vmem:[#allocation7 + $0x728] sm:$0xff]  ;;  %v3011_v22 = vrot.slane %v10714_v5, %v8962_v17  ;;  %v3260_v5 = vld [vmem:[#allocation7 + $0x798] sm:$0xff] }
 0x20f   :  { %8548 = vtanh.f32 %v3172_v21  ;;  %v8533_v59 = vpop.eup %8532  ;;  %v3721_v21 = vld [vmem:[#allocation7 + $0x828] sm:$0xff]  ;;  %7989 = vmatprep.subr.mxu0 %v3737_v8  ;;  %7934 = vmatpush3.msra.mxu1 %v3246_v51  ;;  %v3735_v8 = vld [vmem:[#allocation7 + $0x898] sm:$0xff] }
 0x210   :  { %v7557_v55 = vpop.f32.mrf.mxu0  ;;  %2961 = vmatmul.mubr.f32.gmra.mxu1 %v8531_v47  ;;  %v8535_v24 = vpop.eup %8534  ;;  %v3656_v46 = vadd.f32 %v3514_v1, %v9155_v34  ;;  %8550 = vtanh.f32 %v3147_v29  ;;  %3363 = vmatmul.mubr.f32.gmra.mxu0 %v8533_v59  ;;  %v3151_v47 = vadd.f32 %v3015_v62, %v10715_v54  ;;  %v3510_v34 = vrot.slane %v10736_v0, %v8959_v14 }
 0x211   :  { %v9837_v45 = vadd.f32 %v7557_v55, %v7556_v61  ;;  %v3261_v61 = vld [vmem:[#allocation7 + $0x7a0] sm:$0xff]  ;;  %v8537_v9 = vpop.eup %8536  ;;  %8552 = vtanh.f32 %v3652_v40  ;;  %2965 = vmatprep.mubr.f32.mxu1 %v8535_v24  ;;  %v3150_v29 = vadd.f32 %v3011_v22, %v10717_v25  ;;  %v3031_v40 = vrot.slane %v10720_v2, %v8968_v19  ;;  %7990 = vmatpush3.msra.mxu0 %v3721_v21 }
 0x212   :  { %8554 = vtanh.f32 %v3651_v44  ;;  %3367 = vmatprep.mubr.f32.mxu0 %v8537_v9  ;;  %7935 = vmatprep.subr.mxu1 %v3261_v61  ;;  %v8539_v37 = vpop.eup %8538  ;;  %v9860_v55 = vcombine.high %v9602_v57, %v9602_v57  ;;  %v10737_v44 = vld [vmem:[#allocation22_spill] sm:$0xff]  ;;  %v3530_v1 = vrot.slane %v9847_v33, %v8965_v18  ;;  %v3027_v62 = vrot.slane %v10720_v2, %v8962_v17  ;;  %v3244_v57 = vld [vmem:[#allocation7 + $0x718] sm:$0xff]  ;;  %v3259_v9 = vld [vmem:[#allocation7 + $0x790] sm:$0xff] }
 0x213   :  { %8556 = vtanh.f32 %v3146_v23  ;;  %v3655_v36 = vadd.f32 %v3510_v34, %v10737_v44  ;;  %7991 = vmatprep.subr.mxu0 %v3736_v52  ;;  %7936 = vmatpush3.msra.mxu1 %v3245_v53  ;;  %v8541_v23 = vpop.eup %8540  ;;  %v3155_v51 = vadd.f32 %v3031_v40, %v9501_v60  ;;  %v3719_v61 = vld [vmem:[#allocation7 + $0x818] sm:$0xff]  ;;  %v3047_v52 = vrot.slane %v9740_v12, %v8968_v19  ;;  %v3734_v53 = vld [vmem:[#allocation7 + $0x890] sm:$0xff]  ;;  %v3258_v44 = vld [vmem:[#allocation7 + $0x788] sm:$0xff] }
 0x214   :  { %8558 = vtanh.f32 %v3656_v46  ;;  %7992 = vmatpush3.msra.mxu0 %v3720_v4  ;;  %2966 = vmatmul.mubr.f32.gmra.mxu1 %v8539_v37  ;;  %v8543_v24 = vpop.eup %8542  ;;  %v3526_v46 = vrot.slane %v9847_v33, %v8959_v14  ;;  %v3660_v21 = vadd.f32 %v3530_v1, %v9178_v31  ;;  %v3154_v2 = vadd.f32 %v3027_v62, %v9510_v30  ;;  %v3243_v34 = vld [vmem:[#allocation7 + $0x710] sm:$0xff] }
 0x215   :  { %8560 = vtanh.f32 %v3151_v47  ;;  %3368 = vmatmul.mubr.f32.gmra.mxu0 %v8541_v23  ;;  %7937 = vmatprep.subr.mxu1 %v3260_v5  ;;  %v3546_v40 = vrot.slane %v9860_v55, %v8965_v18  ;;  %v3043_v5 = vrot.slane %v9740_v12, %v8962_v17  ;;  %v3159_v37 = vadd.f32 %v3047_v52, %v9543_v56 }
 0x216   :  { %8562 = vtanh.f32 %v3150_v29  ;;  %7993 = vmatprep.subr.mxu0 %v3735_v8  ;;  %2970 = vmatprep.mubr.f32.mxu1 %v8543_v24  ;;  %v3659_v31 = vadd.f32 %v3526_v46, %v9181_v42  ;;  %v3718_v29 = vld [vmem:[#allocation7 + $0x810] sm:$0xff]  ;;  %v3542_v42 = vrot.slane %v9860_v55, %v8959_v14  ;;  %v3733_v8 = vld [vmem:[#allocation7 + $0x888] sm:$0xff]  ;;  %v3063_v62 = vrot.slane %v9762_v50, %v8968_v19  ;;  %v10738_v24 = vld [vmem:[#allocation25_spill] sm:$0xff] }
 0x217   :  { %8564 = vtanh.f32 %v3655_v36  ;;  %7938 = vmatpush3.msra.mxu1 %v3244_v57  ;;  %7994 = vmatpush3.msra.mxu0 %v3719_v61  ;;  %v3664_v36 = vadd.f32 %v3546_v40, %v9209_v16  ;;  %v3158_v12 = vadd.f32 %v3043_v5, %v9555_v49  ;;  %v3562_v16 = vrot.slane %v10738_v24, %v8965_v18  ;;  %v3257_v46 = vld [vmem:[#allocation7 + $0x780] sm:$0xff] }
 0x218   :  { %v7559_v59 = vpop.f32.mrf.mxu0  ;;  %8566 = vtanh.f32 %v3155_v51  ;;  %7939 = vmatprep.subr.mxu1 %v3259_v9  ;;  %7995 = vmatprep.subr.mxu0 %v3734_v53  ;;  %v3717_v51 = vld [vmem:[#allocation7 + $0x808] sm:$0xff]  ;;  %v3663_v57 = vadd.f32 %v3542_v42, %v9212_v43  ;;  %v3059_v61 = vrot.slane %v9762_v50, %v8962_v17  ;;  %v3163_v9 = vadd.f32 %v3063_v62, %v9441_v15  ;;  %v3716_v53 = vld [vmem:[#allocation7 + $0x800] sm:$0xff] }
 0x219   :  { %8568 = vtanh.f32 %v3660_v21  ;;  %7940 = vmatpush3.msra.mxu1 %v3243_v34  ;;  %7996 = vmatpush3.msra.mxu0 %v3718_v29  ;;  %v3558_v43 = vrot.slane %v10738_v24, %v8959_v14  ;;  %v3668_v52 = vadd.f32 %v3562_v16, %v9233_v41  ;;  %v3079_v40 = vrot.slane %v10726_v38, %v8968_v19  ;;  %v3779_v29 = vld [vmem:[#allocation7 + $0x9f8] sm:$0xff]  ;;  %v3762_v16 = vld [vmem:[#allocation7 + $0x970] sm:$0xff] }
 0x21a   :  { %v7560_v22 = vpop.f32.mrf.mxu0  ;;  %v8545_v47 = vpop.eup %8544  ;;  %8570 = vtanh.f32 %v3154_v2  ;;  %7941 = vmatprep.subr.mxu1 %v3258_v44  ;;  %7997 = vmatprep.subr.mxu0 %v3733_v8  ;;  %v3162_v50 = vadd.f32 %v3059_v61, %v9425_v35  ;;  %v10739_v44 = vld [vmem:[#allocation28_spill] sm:$0xff]  ;;  %v3075_v8 = vrot.slane %v10726_v38, %v8962_v17 }
 0x21b   :  { %v9874_v4 = vadd.f32 %v7560_v22, %v7559_v59  ;;  %3372 = vmatprep.mubr.f32.mxu0 %v8545_v47  ;;  %v8547_v1 = vpop.eup %8546  ;;  %v3242_v59 = vld [vmem:[#allocation7 + $0x708] sm:$0xff]  ;;  %8572 = vtanh.f32 %v3659_v31  ;;  %v3732_v22 = vld [vmem:[#allocation7 + $0x880] sm:$0xff]  ;;  %7998 = vmatpush3.msra.mxu0 %v3717_v51  ;;  %v3667_v41 = vadd.f32 %v3558_v43, %v10703_v32  ;;  %v3574_v32 = vrot.slane %v10739_v44, %v8959_v14  ;;  %v3778_v51 = vld [vmem:[#allocation7 + $0x9f0] sm:$0xff] }
 0x21c   :  { %v8549_v23 = vpop.eup %8548  ;;  %2971 = vmatmul.mubr.f32.gmra.mxu1 %v8547_v1  ;;  %8574 = vtanh.f32 %v3159_v37  ;;  %v3241_v47 = vld [vmem:[#allocation7 + $0x700] sm:$0xff]  ;;  %v9902_v37 = vcombine.high %v9638_v63, %v9638_v63  ;;  %v3578_v1 = vrot.slane %v10739_v44, %v8965_v18  ;;  %7999 = vmatprep.subr.mxu0 %v3732_v22  ;;  %v3763_v63 = vld [vmem:[#allocation7 + $0x978] sm:$0xff]  ;;  %v3166_v38 = vadd.f32 %v3075_v8, %v9459_v6  ;;  %v3761_v43 = vld [vmem:[#allocation7 + $0x968] sm:$0xff] }
 0x21d   :  { %3373 = vmatmul.mubr.f32.gmra.mxu0 %v8549_v23  ;;  %v8551_v21 = vpop.eup %8550  ;;  %7942 = vmatpush3.msra.mxu1 %v3242_v59  ;;  %8576 = vtanh.f32 %v3664_v36  ;;  %v3167_v59 = vadd.f32 %v3079_v40, %v9478_v13  ;;  %v3760_v40 = vld [vmem:[#allocation7 + $0x960] sm:$0xff]  ;;  %v3107_v8 = vrot.slane %v9803_v20, %v8962_v17 }
 0x21e   :  { %v8553_v2 = vpop.eup %8552  ;;  %3442 = vmatprep.mubr.f32.mxu1 %v8551_v21  ;;  %8578 = vtanh.f32 %v3158_v12  ;;  %7943 = vmatprep.subr.mxu1 %v3257_v46  ;;  %v3672_v62 = vadd.f32 %v3578_v1, %v10705_v28  ;;  %v9920_v21 = vcombine.high %v9659_v27, %v9659_v27  ;;  %v3671_v28 = vadd.f32 %v3574_v32, %v9265_v10  ;;  %v3775_v1 = vld [vmem:[#allocation7 + $0x9d8] sm:$0xff] }
 0x21f   :  { %v8555_v31 = vpop.eup %8554  ;;  %3844 = vmatprep.mubr.f32.mxu0 %v8553_v2  ;;  %8580 = vtanh.f32 %v3663_v57  ;;  %7944 = vmatpush3.msra.mxu1 %v3241_v47  ;;  %v3095_v57 = vrot.slane %v10730_v26, %v8968_v19  ;;  %v3594_v61 = vrot.slane %v9902_v37, %v8965_v18  ;;  %v3091_v47 = vrot.slane %v10730_v26, %v8962_v17 }
 0x220   :  { %v8557_v5 = vpop.eup %8556  ;;  %8582 = vtanh.f32 %v3163_v9  ;;  %8000 = vmatpush3.msra.mxu0 %v3716_v53  ;;  %8025 = vmatprep.subr.mxu1 %v3779_v29  ;;  %v3777_v9 = vld [vmem:[#allocation7 + $0x9e8] sm:$0xff]  ;;  %v3590_v10 = vrot.slane %v9902_v37, %v8959_v14  ;;  %v3111_v26 = vrot.slane %v9803_v20, %v8968_v19 }
 0x221   :  { %v8559_v36 = vpop.eup %8558  ;;  %3443 = vmatmul.mubr.f32.vlgmr.msra.gmra.mxu1 %v8557_v5  ;;  %8584 = vtanh.f32 %v3668_v52  ;;  %3845 = vmatmul.mubr.f32.vlgmr.msra.gmra.mxu0 %v8555_v31  ;;  %v3171_v2 = vadd.f32 %v3095_v57, %v9632_v39  ;;  %v10740_v52 = vld [vmem:[#allocation31_spill] sm:$0xff]  ;;  %v10742_v57 = vld [vmem:[#allocation21_spill] sm:$0xff] }
 0x222   :  { %v7562_v34 = vpop.f32.mrf.mxu0  ;;  %v8561_v12 = vpop.eup %8560  ;;  %8586 = vtanh.f32 %v3162_v50  ;;  %3849 = vmatprep.mubr.f32.mxu0 %v8559_v36  ;;  %8026 = vmatpush3.msra.mxu1 %v3763_v63  ;;  %v3676_v53 = vadd.f32 %v3594_v61, %v10740_v52  ;;  %v3170_v50 = vadd.f32 %v3091_v47, %v9644_v58  ;;  %v3675_v5 = vadd.f32 %v3590_v10, %v9301_v48  ;;  %v3759_v63 = vld [vmem:[#allocation7 + $0x958] sm:$0xff]  ;;  %v3773_v47 = vld [vmem:[#allocation7 + $0x9c8] sm:$0xff]  ;;  %v3772_v52 = vld [vmem:[#allocation7 + $0x9c0] sm:$0xff] }
 0x223   :  { %3447 = vmatprep.mubr.f32.mxu1 %v8561_v12  ;;  %v8563_v46 = vpop.eup %8562  ;;  %8588 = vtanh.f32 %v3667_v41  ;;  %8027 = vmatprep.subr.mxu1 %v3778_v51  ;;  %v3610_v41 = vrot.slane %v9920_v21, %v8965_v18  ;;  %v3606_v48 = vrot.slane %v9920_v21, %v8959_v14  ;;  %v10741_v18 = vld [vmem:[#allocation36_spill] sm:$0xff]  ;;  %v3506_v20 = vrot.slane %v10742_v57, %v8968_v19  ;;  %v10744_v14 = vld [vmem:[#allocation38_spill] sm:$0xff] }
 0x224   :  { %v7563_v42 = vpop.f32.mrf.mxu0  ;;  %v8565_v22 = vpop.eup %8564  ;;  %8590 = vtanh.f32 %v3167_v59  ;;  %8028 = vmatpush3.msra.mxu1 %v3762_v16  ;;  %v3175_v59 = vadd.f32 %v3111_v26, %v9549_v3  ;;  %v10743_v16 = vld [vmem:[#allocation53_spill] sm:$0xff]  ;;  %v3771_v26 = vld [vmem:[#allocation7 + $0x9b8] sm:$0xff] }
 0x225   :  { %v9910_v23 = vadd.f32 %v7563_v42, %v7562_v34  ;;  %3448 = vmatmul.mubr.f32.gmra.mxu1 %v8563_v46  ;;  %v8567_v27 = vpop.eup %8566  ;;  %8592 = vtanh.f32 %v3672_v62  ;;  %3850 = vmatmul.mubr.f32.gmra.mxu0 %v8565_v22  ;;  %v3776_v34 = vld [vmem:[#allocation7 + $0x9e0] sm:$0xff]  ;;  %v3680_v32 = vadd.f32 %v3610_v41, %v10741_v18  ;;  %v3774_v62 = vld [vmem:[#allocation7 + $0x9d0] sm:$0xff]  ;;  %v3174_v46 = vadd.f32 %v3107_v8, %v10743_v16 }
 0x226   :  { %v8569_v31 = vpop.eup %8568  ;;  %8594 = vtanh.f32 %v3166_v38  ;;  %8029 = vmatprep.subr.mxu1 %v3777_v9  ;;  %3452 = vmatprep.mubr.f32.mxu1 %v8567_v27  ;;  %v3679_v22 = vadd.f32 %v3606_v48, %v10744_v14  ;;  %v3757_v27 = vld [vmem:[#allocation7 + $0x948] sm:$0xff]  ;;  %v3767_v14 = vld [vmem:[#allocation7 + $0x998] sm:$0xff] }
 0x227   :  { %v8571_v29 = vpop.eup %8570  ;;  %8596 = vtanh.f32 %v3671_v28  ;;  %3854 = vmatprep.mubr.f32.mxu0 %v8569_v31  ;;  %8030 = vmatpush3.msra.mxu1 %v3761_v43  ;;  %v3758_v28 = vld [vmem:[#allocation7 + $0x950] sm:$0xff]  ;;  %v3654_v43 = vadd.f32 %v3506_v20, %v10711_v7  ;;  %v3756_v31 = vld [vmem:[#allocation7 + $0x940] sm:$0xff]  ;;  %v3522_v7 = vrot.slane %v10736_v0, %v8968_v19  ;;  %v3769_v48 = vld [vmem:[#allocation7 + $0x9a8] sm:$0xff] }
 0x228   :  { %v8573_v36 = vpop.eup %8572  ;;  %8598 = vtanh.f32 %v3171_v2  ;;  %8031 = vmatprep.subr.mxu1 %v3776_v34  ;;  %v3502_v34 = vrot.slane %v10742_v57, %v8962_v17  ;;  %v3768_v57 = vld [vmem:[#allocation7 + $0x9a0] sm:$0xff] }
 0x229   :  { %3453 = vmatmul.mubr.f32.gmra.mxu1 %v8571_v29  ;;  %v8575_v12 = vpop.eup %8574  ;;  %8600 = vtanh.f32 %v3676_v53  ;;  %3855 = vmatmul.mubr.f32.gmra.mxu0 %v8573_v36 }
 0x22a   :  { %8032 = vmatpush3.msra.mxu1 %v3760_v40  ;;  %v8577_v38 = vpop.eup %8576  ;;  %8602 = vtanh.f32 %v3170_v50  ;;  %3457 = vmatprep.mubr.f32.mxu1 %v8575_v12  ;;  %v3653_v29 = vadd.f32 %v3502_v34, %v10713_v11  ;;  %v3538_v11 = vrot.slane %v9847_v33, %v8968_v19  ;;  %v3765_v34 = vld [vmem:[#allocation7 + $0x988] sm:$0xff] }
 0x22b   :  { %v7565_v42 = vpop.f32.mrf.mxu0  ;;  %8033 = vmatprep.subr.mxu1 %v3775_v1  ;;  %v8579_v9 = vpop.eup %8578  ;;  %8604 = vtanh.f32 %v3675_v5  ;;  %3859 = vmatprep.mubr.f32.mxu0 %v8577_v38  ;;  %v3755_v5 = vld [vmem:[#allocation7 + $0x938] sm:$0xff]  ;;  %v3658_v1 = vadd.f32 %v3522_v7, %v10715_v54  ;;  %v3749_v7 = vld [vmem:[#allocation7 + $0x908] sm:$0xff] }
 0x22c   :  { %8034 = vmatpush3.msra.mxu1 %v3759_v63  ;;  %v8581_v2 = vpop.eup %8580  ;;  %8606 = vtanh.f32 %v3175_v59  ;;  %v3518_v59 = vrot.slane %v10736_v0, %v8962_v17  ;;  %v3754_v63 = vld [vmem:[#allocation7 + $0x930] sm:$0xff]  ;;  %v3662_v38 = vadd.f32 %v3538_v11, %v9501_v60 }
 0x22d   :  { %v7566_v51 = vpop.f32.mrf.mxu0  ;;  %8035 = vmatprep.subr.mxu1 %v3774_v62  ;;  %3458 = vmatmul.mubr.f32.gmra.mxu1 %v8579_v9  ;;  %v8583_v10 = vpop.eup %8582  ;;  %8608 = vtanh.f32 %v3680_v32  ;;  %v3753_v62 = vld [vmem:[#allocation7 + $0x928] sm:$0xff]  ;;  %v3554_v9 = vrot.slane %v9860_v55, %v8968_v19 }
 0x22e   :  { %v9946_v61 = vadd.f32 %v7566_v51, %v7565_v42  ;;  %8036 = vmatpush3.msra.mxu1 %v3758_v28  ;;  %3860 = vmatmul.mubr.f32.gmra.mxu0 %v8581_v2  ;;  %v8585_v53 = vpop.eup %8584  ;;  %8610 = vtanh.f32 %v3174_v46  ;;  %v3770_v42 = vld [vmem:[#allocation7 + $0x9b0] sm:$0xff]  ;;  %v3657_v32 = vadd.f32 %v3518_v59, %v10717_v25  ;;  %v3534_v46 = vrot.slane %v9847_v33, %v8962_v17  ;;  %v3752_v28 = vld [vmem:[#allocation7 + $0x920] sm:$0xff] }
 0x22f   :  { %8037 = vmatprep.subr.mxu1 %v3773_v47  ;;  %3462 = vmatprep.mubr.f32.mxu1 %v8583_v10  ;;  %v8587_v50 = vpop.eup %8586  ;;  %8612 = vtanh.f32 %v3679_v22  ;;  %v3751_v47 = vld [vmem:[#allocation7 + $0x918] sm:$0xff]  ;;  %v3666_v33 = vadd.f32 %v3554_v9, %v9543_v56  ;;  %v3550_v10 = vrot.slane %v9860_v55, %v8962_v17  ;;  %v3602_v59 = vrot.slane %v9902_v37, %v8968_v19 }
 0x230   :  { %3864 = vmatprep.mubr.f32.mxu0 %v8585_v53  ;;  %8038 = vmatpush3.msra.mxu1 %v3757_v27  ;;  %v8589_v40 = vpop.eup %8588  ;;  %8614 = vtanh.f32 %v3654_v43  ;;  %v3661_v60 = vadd.f32 %v3534_v46, %v9510_v30  ;;  %v3766_v43 = vld [vmem:[#allocation7 + $0x990] sm:$0xff]  ;;  %v3570_v30 = vrot.slane %v10738_v24, %v8968_v19 }
 0x231   :  { %8039 = vmatprep.subr.mxu1 %v3772_v52  ;;  %3463 = vmatmul.mubr.f32.gmra.mxu1 %v8587_v50  ;;  %v8591_v41 = vpop.eup %8590  ;;  %8616 = vtanh.f32 %v3653_v29  ;;  %v3750_v52 = vld [vmem:[#allocation7 + $0x910] sm:$0xff]  ;;  %v3665_v56 = vadd.f32 %v3550_v10, %v9555_v49  ;;  %v3586_v49 = vrot.slane %v10739_v44, %v8968_v19 }
 0x232   :  { %8040 = vmatpush3.msra.mxu1 %v3756_v31  ;;  %3865 = vmatmul.mubr.f32.gmra.mxu0 %v8589_v40  ;;  %v8593_v8 = vpop.eup %8592  ;;  %8618 = vtanh.f32 %v3658_v1  ;;  %v3670_v55 = vadd.f32 %v3570_v30, %v9441_v15  ;;  %v3764_v40 = vld [vmem:[#allocation7 + $0x980] sm:$0xff] }
 0x233   :  { %8041 = vmatprep.subr.mxu1 %v3771_v26  ;;  %3467 = vmatprep.mubr.f32.mxu1 %v8591_v41  ;;  %v8595_v12 = vpop.eup %8594  ;;  %8620 = vtanh.f32 %v3657_v32  ;;  %v3748_v41 = vld [vmem:[#allocation7 + $0x900] sm:$0xff] }
 0x234   :  { %3869 = vmatprep.mubr.f32.mxu0 %v8593_v8  ;;  %8042 = vmatpush3.msra.mxu1 %v3755_v5  ;;  %v8597_v54 = vpop.eup %8596  ;;  %8622 = vtanh.f32 %v3662_v38  ;;  %v3566_v5 = vrot.slane %v10738_v24, %v8962_v17  ;;  %v3582_v24 = vrot.slane %v10739_v44, %v8962_v17  ;;  %v3618_v44 = vrot.slane %v9920_v21, %v8968_v19 }
 0x235   :  { %v7568_v36 = vpop.f32.mrf.mxu0  ;;  %8043 = vmatprep.subr.mxu1 %v3770_v42  ;;  %3468 = vmatmul.mubr.f32.gmra.mxu1 %v8595_v12  ;;  %v8599_v0 = vpop.eup %8598  ;;  %8624 = vtanh.f32 %v3661_v60  ;;  %v10745_v60 = vld [vmem:[#allocation15_spill] sm:$0xff] }
 0x236   :  { %8044 = vmatpush3.msra.mxu1 %v3754_v63  ;;  %3870 = vmatmul.mubr.f32.gmra.mxu0 %v8597_v54  ;;  %v8601_v20 = vpop.eup %8600  ;;  %8626 = vtanh.f32 %v3666_v33  ;;  %v3669_v42 = vadd.f32 %v3566_v5, %v9425_v35  ;;  %v3673_v63 = vadd.f32 %v3582_v24, %v9459_v6  ;;  %v3678_v35 = vadd.f32 %v3602_v59, %v9632_v39 }
 0x237   :  { %v7569_v18 = vpop.f32.mrf.mxu0  ;;  %8045 = vmatprep.subr.mxu1 %v3769_v48  ;;  %3472 = vmatprep.mubr.f32.mxu1 %v8599_v0  ;;  %v8603_v25 = vpop.eup %8602  ;;  %8628 = vtanh.f32 %v3665_v56  ;;  %v3682_v39 = vadd.f32 %v3618_v44, %v9549_v3 }
 0x238   :  { %v9961_v51 = vadd.f32 %v7569_v18, %v7568_v36  ;;  %3874 = vmatprep.mubr.f32.mxu0 %v8601_v20  ;;  %8046 = vmatpush3.msra.mxu1 %v3753_v62  ;;  %v8605_v22 = vpop.eup %8604  ;;  %8630 = vtanh.f32 %v3670_v55  ;;  %v3674_v36 = vadd.f32 %v3586_v49, %v9478_v13  ;;  %v3598_v13 = vrot.slane %v9902_v37, %v8962_v17 }
 0x239   :  { %8047 = vmatprep.subr.mxu1 %v3768_v57  ;;  %3473 = vmatmul.mubr.f32.gmra.mxu1 %v8603_v25  ;;  %v8607_v2 = vpop.eup %8606  ;;  %8632 = vtanh.f32 %v3669_v42  ;;  %v3614_v37 = vrot.slane %v9920_v21, %v8962_v17 }
 0x23a   :  { %8048 = vmatpush3.msra.mxu1 %v3752_v28  ;;  %3875 = vmatmul.mubr.f32.gmra.mxu0 %v8605_v22  ;;  %v8609_v27 = vpop.eup %8608  ;;  %8634 = vtanh.f32 %v3674_v36  ;;  %v3677_v54 = vadd.f32 %v3598_v13, %v9644_v58 }
 0x23b   :  { %8049 = vmatprep.subr.mxu1 %v3767_v14  ;;  %3477 = vmatprep.mubr.f32.mxu1 %v8607_v2  ;;  %v8611_v53 = vpop.eup %8610  ;;  %v7571_v31 = vpop.f32.mrf.mxu0  ;;  %8636 = vtanh.f32 %v3673_v63  ;;  %v3681_v19 = vadd.f32 %v3614_v37, %v10743_v16 }
 0x23c   :  { %3879 = vmatprep.mubr.f32.mxu0 %v8609_v27  ;;  %8050 = vmatpush3.msra.mxu1 %v3751_v47  ;;  %v8613_v50 = vpop.eup %8612  ;;  %8638 = vtanh.f32 %v3678_v35 }
 0x23d   :  { %8051 = vmatprep.subr.mxu1 %v3766_v43  ;;  %3478 = vmatmul.mubr.f32.gmra.mxu1 %v8611_v53  ;;  %v8615_v26 = vpop.eup %8614  ;;  %v7572_v29 = vpop.f32.mrf.mxu0  ;;  %8640 = vtanh.f32 %v3677_v54 }
 0x23e   :  { %8052 = vmatpush3.msra.mxu1 %v3750_v52  ;;  %3880 = vmatmul.mubr.f32.gmra.mxu0 %v8613_v50  ;;  %v9978_v1 = vadd.f32 %v7572_v29, %v7571_v31  ;;  %v8617_v15 = vpop.eup %8616  ;;  %8642 = vtanh.f32 %v3682_v39 }
 0x23f   :  { %8053 = vmatprep.subr.mxu1 %v3765_v34  ;;  %3949 = vmatprep.mubr.f32.mxu1 %v8615_v26  ;;  %v8619_v8 = vpop.eup %8618  ;;  %8644 = vtanh.f32 %v3681_v19 }
 0x240   :  { %8054 = vmatpush3.msra.mxu1 %v3749_v7  ;;  %v8621_v12 = vpop.eup %8620 }
 0x241   :  { %8055 = vmatprep.subr.mxu1 %v3764_v40  ;;  %v8623_v48 = vpop.eup %8622 }
 0x242   :  { %8056 = vmatpush3.msra.mxu1 %v3748_v41  ;;  %v7574_v11 = vpop.f32.mrf.mxu0  ;;  %v8625_v6 = vpop.eup %8624 }
 0x243   :  { %3950 = vmatmul.mubr.f32.vlgmr.msra.gmra.mxu1 %v8617_v15  ;;  %v8627_v0 = vpop.eup %8626 }
 0x244   :  { %3954 = vmatprep.mubr.f32.mxu1 %v8619_v8  ;;  %v7575_v18 = vpop.f32.mrf.mxu0  ;;  %v8629_v20 = vpop.eup %8628 }
 0x245   :  { %v9995_v32 = vadd.f32 %v7575_v18, %v7574_v11  ;;  %v8631_v46 = vpop.eup %8630 }
 0x246   :  { %v7665_v62 = vpop.f32.mrf.mxu0  ;;  %v8633_v9 = vpop.eup %8632 }
 0x247   :  { %3955 = vmatmul.mubr.f32.gmra.mxu1 %v8621_v12  ;;  %v8635_v17 = vpop.eup %8634 }
 0x248   :  { %3959 = vmatprep.mubr.f32.mxu1 %v8623_v48  ;;  %v7666_v38 = vpop.f32.mrf.mxu0  ;;  %v8637_v2 = vpop.eup %8636 }
 0x249   :  { %v7667_v57 = vadd.f32 %v7666_v38, %v7665_v62  ;;  %v8639_v43 = vpop.eup %8638 }
 0x24a   :  { %v7668_v58 = vpop.f32.mrf.mxu0  ;;  %v8641_v10 = vpop.eup %8640 }
 0x24b   :  { %3960 = vmatmul.mubr.f32.gmra.mxu1 %v8625_v6  ;;  %v8643_v53 = vpop.eup %8642 }
 0x24c   :  { %3964 = vmatprep.mubr.f32.mxu1 %v8627_v0  ;;  %v7609_v28 = vpop.f32.mrf.mxu1  ;;  %v7669_v3 = vpop.f32.mrf.mxu0 }
 0x24d   :  { %v7670_v25 = vadd.f32 %v7669_v3, %v7668_v58  ;;  %v8645_v56 = vpop.eup %8644 }
 0x24e   :  { %v7610_v14 = vpop.f32.mrf.mxu1 }
 0x24f   :  { %3965 = vmatmul.mubr.f32.gmra.mxu1 %v8629_v20  ;;  %v7611_v21 = vadd.f32 %v7610_v14, %v7609_v28  ;;  %v7671_v22 = vpop.f32.mrf.mxu0 }
 0x250   :  { %3969 = vmatprep.mubr.f32.mxu1 %v8631_v46 }
 0x251   :  { %v2229_v16 = vadd.f32 %v7611_v21, %v10745_v60  ;;  %v7672_v47 = vpop.f32.mrf.mxu0 }
 0x252   :  { %v7673_v33 = vadd.f32 %v7672_v47, %v7671_v22 }
 0x253   :  { %3970 = vmatmul.mubr.f32.gmra.mxu1 %v8633_v9  ;;  %v10002_v27 = vadd.f32 %v7667_v57, %v2229_v16 }
 0x254   :  { %3974 = vmatprep.mubr.f32.mxu1 %v8635_v17 }
 0x256   :  { %v7612_v52 = vpop.f32.mrf.mxu1 }
 0x257   :  { %3975 = vmatmul.mubr.f32.gmra.mxu1 %v8637_v2  ;;  %v7674_v30 = vpop.f32.mrf.mxu0 }
 0x258   :  { %3979 = vmatprep.mubr.f32.mxu1 %v8639_v43  ;;  %v7613_v34 = vpop.f32.mrf.mxu1 }
 0x259   :  { %v7614_v31 = vadd.f32 %v7613_v34, %v7612_v52  ;;  %v7675_v50 = vpop.f32.mrf.mxu0 }
 0x25a   :  { %v7676_v7 = vadd.f32 %v7675_v50, %v7674_v30 }
 0x25b   :  { %3980 = vmatmul.mubr.f32.gmra.mxu1 %v8641_v10  ;;  %v2234_v26 = vadd.f32 %v7614_v31, %v9837_v45 }
 0x25c   :  { %3984 = vmatprep.mubr.f32.mxu1 %v8643_v53 }
 0x25d   :  { %v10005_v55 = vadd.f32 %v7670_v25, %v2234_v26  ;;  %v7677_v40 = vpop.f32.mrf.mxu0 }
 0x25f   :  { %3985 = vmatmul.mubr.f32.gmra.mxu1 %v8645_v56  ;;  %v7678_v29 = vpop.f32.mrf.mxu0 }
 0x260   :  { %v7615_v5 = vpop.f32.mrf.mxu1  ;;  %v7679_v41 = vadd.f32 %v7678_v29, %v7677_v40 }
 0x262   :  { %v7616_v49 = vpop.f32.mrf.mxu1 }
 0x263   :  { %v7617_v42 = vadd.f32 %v7616_v49, %v7615_v5  ;;  %v7680_v15 = vpop.f32.mrf.mxu0 }
 0x265   :  { %v2239_v36 = vadd.f32 %v7617_v42, %v9874_v4  ;;  %v7681_v8 = vpop.f32.mrf.mxu0 }
 0x266   :  { %v7682_v24 = vadd.f32 %v7681_v8, %v7680_v15 }
 0x267   :  { %v10008_v59 = vadd.f32 %v7673_v33, %v2239_v36 }
 0x268   :  { %v7683_v63 = vpop.f32.mrf.mxu0 }
 0x26a   :  { %v7618_v12 = vpop.f32.mrf.mxu1  ;;  %v7684_v35 = vpop.f32.mrf.mxu0 }
 0x26b   :  { %v7685_v11 = vadd.f32 %v7684_v35, %v7683_v63 }
 0x26c   :  { %v7619_v45 = vpop.f32.mrf.mxu1 }
 0x26d   :  { %v7620_v48 = vadd.f32 %v7619_v45, %v7618_v12  ;;  %v7686_v13 = vpop.f32.mrf.mxu0  ;;  %v10045_v12 = vld [vmem:[%s10568_s2 + $0x8] sm:$0xff]  }
 0x26e   :  { %v10644_v35 = vunpack.c.l.bf16 %v10045_v12 }
 0x26f   :  { %v2244_v44 = vadd.f32 %v7620_v48, %v9910_v23  ;;  %v7687_v18 = vpop.f32.mrf.mxu0 }
 0x270   :  { %v7688_v54 = vadd.f32 %v7687_v18, %v7686_v13 }
 0x271   :  { %v10011_v6 = vadd.f32 %v7676_v7, %v2244_v44  ;;  %v10060_v44 = vld [vmem:[%s10568_s2 + $0x10] sm:$0xff]  }
 0x272   :  { %v10643_v18 = vunpack.c.l.bf16 %v10060_v44 }
 0x273   :  { %v10013_v39 = vpop.f32.mrf.mxu0 }
 0x274   :  { %v7621_v4 = vpop.f32.mrf.mxu1 }
 0x275   :  { %v10015_v62 = vpop.f32.mrf.mxu0 }
 0x276   :  { %v7622_v0 = vpop.f32.mrf.mxu1 }
 0x277   :  { %v7623_v37 = vadd.f32 %v7622_v0, %v7621_v4 }
 0x278   :  { %v10017_v38 = vpop.f32.mrf.mxu0 }
 0x279   :  { %v2249_v19 = vadd.f32 %v7623_v37, %v9946_v61 }
 0x27a   :  { %v10020_v57 = vpop.f32.mrf.mxu0 }
 0x27b   :  { %v10022_v20 = vadd.f32 %v7679_v41, %v2249_v19  ;;  %v7624_v58 = vpop.f32.mrf.mxu1 }
 0x27c   :  { %v7783_v23 = vpop.f32.mrf.mxu0 }
 0x27d   :  { %v7625_v3 = vpop.f32.mrf.mxu1 }
 0x27e   :  { %v7784_v46 = vpop.f32.mrf.mxu0  ;;  %v7626_v25 = vadd.f32 %v7625_v3, %v7624_v58 }
 0x27f   :  { %v10024_v28 = vadd.f32 %v7784_v46, %v7783_v23 }
 0x280   :  { %v7786_v9 = vpop.f32.mrf.mxu0  ;;  %v2254_v14 = vadd.f32 %v7626_v25, %v9961_v51 }
 0x282   :  { %v7787_v17 = vpop.f32.mrf.mxu0  ;;  %v2359_v22 = vadd.f32 %v7682_v24, %v2254_v14 }
 0x283   :  { %v10027_v21 = vadd.f32 %v7787_v17, %v7786_v9 }
 0x284   :  { %v7789_v60 = vpop.f32.mrf.mxu0 }
 0x286   :  { %v7790_v61 = vpop.f32.mrf.mxu0  ;;  %v7627_v16 = vpop.f32.mrf.mxu1 }
 0x287   :  { %v10029_v47 = vadd.f32 %v7790_v61, %v7789_v60 }
 0x288   :  { %v7792_v2 = vpop.f32.mrf.mxu0  ;;  %v7628_v33 = vpop.f32.mrf.mxu1 }
 0x289   :  { %v7629_v43 = vadd.f32 %v7628_v33, %v7627_v16 }
 0x28a   :  { %v7793_v10 = vpop.f32.mrf.mxu0 }
 0x28b   :  { %v10031_v52 = vadd.f32 %v7793_v10, %v7792_v2  ;;  %v2259_v53 = vadd.f32 %v7629_v43, %v9978_v1 }
 0x28c   :  { %v7795_v30 = vpop.f32.mrf.mxu0 }
 0x28d   :  { %v2364_v34 = vadd.f32 %v7685_v11, %v2259_v53  ;;  %v10645_v11 = vunpack.c.h.bf16 %v10045_v12 }
 0x28e   :  { %v7796_v51 = vpop.f32.mrf.mxu0  ;;  %v7630_v56 = vpop.f32.mrf.mxu1 }
 0x28f   :  { %v10034_v31 = vadd.f32 %v7796_v51, %v7795_v30  ;;  %v10083_v30 = vld [vmem:[%s10568_s2] sm:$0xff]  }
 0x290   :  { %v7798_v50 = vpop.f32.mrf.mxu0  ;;  %v7631_v26 = vpop.f32.mrf.mxu1  ;;  %v4135_v51 = vunpack.c.h.bf16 %v10083_v30 }
 0x291   :  { %v7632_v29 = vadd.f32 %v7631_v26, %v7630_v56 }
 0x292   :  { %v7799_v7 = vpop.f32.mrf.mxu0  ;;  %v7721_v5 = vpop.f32.mrf.mxu1 }
 0x293   :  { %v10036_v40 = vadd.f32 %v7799_v7, %v7798_v50  ;;  %v2264_v41 = vadd.f32 %v7632_v29, %v9995_v32 }
 0x294   :  { %v7722_v49 = vpop.f32.mrf.mxu1  ;;  %v10069_v19 = vpop.f32.mrf.mxu0 }
 0x295   :  { %v2369_v42 = vadd.f32 %v7688_v54, %v2264_v41  ;;  %v7723_v15 = vadd.f32 %v7722_v49, %v7721_v5 }
 0x296   :  { %v10073_v25 = vpop.f32.mrf.mxu0 }
 0x297   :  { %v7724_v36 = vpop.f32.mrf.mxu1  ;;  %v10040_v1 = vadd.f32 %v7723_v15, %v10002_v27  ;;  %v8213_v27 = vpack.i.bf16 %v10645_v11, %v10644_v35 }
 0x299   :  { %v7725_v8 = vpop.f32.mrf.mxu1  ;;  %8214 = vrot.lane.b32.xlu1 %v8213_v27, %s8786_s14 }
 0x29a   :  { %v7726_v24 = vadd.f32 %v7725_v8, %v7724_v36 }
 0x29b   :  { %v7727_v63 = vpop.f32.mrf.mxu1 }
 0x29c   :  { %v10050_v32 = vadd.f32 %v7726_v24, %v10005_v55  ;;  %v10642_v55 = vunpack.c.h.bf16 %v10060_v44 }
 0x29d   :  { %v7728_v45 = vpop.f32.mrf.mxu1 }
 0x29e   :  { %v7729_v48 = vadd.f32 %v7728_v45, %v7727_v63  ;;  %v8218_v0 = vpack.i.bf16 %v10643_v18, %v10642_v55  ;;  %v10076_v60 = vpop.f32.mrf.mxu0  ;;  %v7779_v55 = vadd.f32 %v10015_v62, %v10013_v39 }
 0x29f   :  { %v7730_v13 = vpop.f32.mrf.mxu1 }
 0x2a0   :  { %v2449_v54 = vadd.f32 %v7729_v48, %v10008_v59  ;;  %8219 = vrot.lane.b32.xlu1 %v8218_v0, %s8786_s14  ;;  %v10078_v43 = vpop.f32.mrf.mxu0 }
 0x2a1   :  { %v7731_v4 = vpop.f32.mrf.mxu1 }
 0x2a2   :  { %v7732_v37 = vadd.f32 %v7731_v4, %v7730_v13 }
 0x2a3   :  { %v7733_v23 = vpop.f32.mrf.mxu1 }
 0x2a4   :  { %v2454_v58 = vadd.f32 %v7732_v37, %v10011_v6 }
 0x2a5   :  { %v7734_v46 = vpop.f32.mrf.mxu1 }
 0x2a6   :  { %v7735_v3 = vadd.f32 %v7734_v46, %v7733_v23 }
 0x2a7   :  { %v7736_v9 = vpop.f32.mrf.mxu1 }
 0x2a8   :  { %v2459_v59 = vadd.f32 %v7735_v3, %v10022_v20  ;;  %v4134_v20 = vunpack.c.l.bf16 %v10083_v30  ;;  %v10746_v30 = vunpack.c.h.bf16 %v10045_v12 }
 0x2a9   :  { %v7737_v14 = vpop.f32.mrf.mxu1 }
 0x2aa   :  { %v7738_v17 = vadd.f32 %v7737_v14, %v7736_v9  ;;  %v10087_v56 = vpop.f32.mrf.mxu0 }
 0x2ab   :  { %v7739_v61 = vpop.f32.mrf.mxu1 }
 0x2ac   :  { %v2464_v16 = vadd.f32 %v7738_v17, %v2359_v22  ;;  %v10098_v29 = vpop.f32.mrf.mxu0 }
 0x2ad   :  { %v7740_v2 = vpop.f32.mrf.mxu1 }
 0x2ae   :  { %v7741_v33 = vadd.f32 %v7740_v2, %v7739_v61 }
 0x2af   :  { %v7742_v10 = vpop.f32.mrf.mxu1 }
 0x2b0   :  { %v2469_v53 = vadd.f32 %v7741_v33, %v2364_v34  ;;  %v8208_v34 = vpack.i.bf16 %v4135_v51, %v4134_v20 }
 0x2b1   :  { %v7743_v6 = vpop.f32.mrf.mxu1 }
 0x2b2   :  { %v7744_v50 = vadd.f32 %v7743_v6, %v7742_v10  ;;  %8209 = vrot.lane.b32.xlu0 %v8208_v34, %s8786_s14 }
 0x2b3   :  { %v10089_v22 = vpop.f32.mrf.mxu1 }
 0x2b4   :  { %v2474_v7 = vadd.f32 %v7744_v50, %v2369_v42 }
 0x2b5   :  { %v10095_v26 = vpop.f32.mrf.mxu1 }
 0x2b6   :  { %v10104_v49 = vpop.f32.mrf.mxu0 }
 0x2b7   :  { %v10100_v5 = vpop.f32.mrf.mxu1 }
 0x2b8   :  { %v10106_v24 = vpop.f32.mrf.mxu0 }
 0x2b9   :  { %v10102_v41 = vpop.f32.mrf.mxu1 }
 0x2bb   :  { %v7839_v15 = vpop.f32.mrf.mxu1 }
 0x2bd   :  { %v7840_v36 = vpop.f32.mrf.mxu1 }
 0x2be   :  { %v7841_v8 = vadd.f32 %v7840_v36, %v7839_v15 }
 0x2bf   :  { %v7842_v63 = vpop.f32.mrf.mxu1 }
 0x2c0   :  { %v2948_v42 = vadd.f32 %v7841_v8, %v10024_v28 }
 0x2c1   :  { %v7843_v45 = vpop.f32.mrf.mxu1 }
 0x2c2   :  { %v10109_v27 = vadd.f32 %v2948_v42, %v2449_v54  ;;  %v7844_v48 = vadd.f32 %v7843_v45, %v7842_v63  ;;  %v10111_v13 = vpop.f32.mrf.mxu0 }
 0x2c4   :  { %v2953_v0 = vadd.f32 %v7844_v48, %v10027_v21  ;;  %v10114_v23 = vpop.f32.mrf.mxu0 }
 0x2c6   :  { %v10116_v46 = vadd.f32 %v2953_v0, %v2454_v58 }
 0x2cc   :  { %v7845_v4 = vpop.f32.mrf.mxu1 }
 0x2ce   :  { %v7846_v37 = vpop.f32.mrf.mxu1 }
 0x2cf   :  { %v7847_v3 = vadd.f32 %v7846_v37, %v7845_v4 }
 0x2d0   :  { %v7848_v14 = vpop.f32.mrf.mxu1  ;;  %v7904_v17 = vpop.f32.mrf.mxu0 }
 0x2d1   :  { %v2958_v9 = vadd.f32 %v7847_v3, %v10029_v47 }
 0x2d2   :  { %v7849_v54 = vpop.f32.mrf.mxu1  ;;  %v7905_v2 = vpop.f32.mrf.mxu0 }
 0x2d3   :  { %v10119_v28 = vadd.f32 %v2958_v9, %v2459_v59  ;;  %v7850_v61 = vadd.f32 %v7849_v54, %v7848_v14  ;;  %v7906_v33 = vadd.f32 %v7905_v2, %v7904_v17 }
 0x2d4   :  { %v7851_v6 = vpop.f32.mrf.mxu1 }
 0x2d5   :  { %v2963_v10 = vadd.f32 %v7850_v61, %v10031_v52  ;;  %v7907_v50 = vpop.f32.mrf.mxu0 }
 0x2d6   :  { %v7852_v34 = vpop.f32.mrf.mxu1 }
 0x2d7   :  { %v2981_v21 = vadd.f32 %v2963_v10, %v2464_v16  ;;  %v7853_v15 = vadd.f32 %v7852_v34, %v7851_v6  ;;  %v7908_v58 = vpop.f32.mrf.mxu0 }
 0x2d8   :  { %v7909_v36 = vadd.f32 %v7908_v58, %v7907_v50 }
 0x2d9   :  { %v2968_v8 = vadd.f32 %v7853_v15, %v10034_v31 }
 0x2db   :  { %v2982_v63 = vadd.f32 %v2968_v8, %v2469_v53 }
 0x2dc   :  { %v7854_v47 = vpop.f32.mrf.mxu1 }
 0x2dd   :  { %v7910_v42 = vpop.f32.mrf.mxu0 }
 0x2de   :  { %v7855_v59 = vpop.f32.mrf.mxu1 }
 0x2df   :  { %v7856_v45 = vadd.f32 %v7855_v59, %v7854_v47  ;;  %v7911_v48 = vpop.f32.mrf.mxu0 }
 0x2e0   :  { %v7912_v4 = vadd.f32 %v7911_v48, %v7910_v42 }
 0x2e1   :  { %v2973_v0 = vadd.f32 %v7856_v45, %v10036_v40  ;;  %v7945_v37 = vpop.f32.mrf.mxu1  ;;  %v8001_v2 = vpop.f32.mrf.mxu0  ;;  %v7835_v45 = vadd.f32 %v10095_v26, %v10089_v22  ;;  %v7782_v22 = vadd.f32 %v10020_v57, %v10017_v38  ;;  %v7897_v57 = vadd.f32 %v10098_v29, %v10087_v56 }
 0x2e3   :  { %v2983_v52 = vadd.f32 %v2973_v0, %v2474_v7  ;;  %v7946_v3 = vpop.f32.mrf.mxu1  ;;  %v8002_v10 = vpop.f32.mrf.mxu0 }
 0x2e4   :  { %v7947_v18 = vadd.f32 %v7946_v3, %v7945_v37 }
 0x2e5   :  { %v7948_v16 = vpop.f32.mrf.mxu1  ;;  %v8004_v34 = vpop.f32.mrf.mxu0 }
 0x2e7   :  { %v7949_v9 = vpop.f32.mrf.mxu1  ;;  %v8005_v8 = vpop.f32.mrf.mxu0 }
 0x2e9   :  { %v7951_v14 = vpop.f32.mrf.mxu1  ;;  %v8007_v35 = vpop.f32.mrf.mxu0 }
 0x2eb   :  { %v7952_v17 = vpop.f32.mrf.mxu1  ;;  %v8008_v39 = vpop.f32.mrf.mxu0 }
 0x2ed   :  { %v7954_v54 = vpop.f32.mrf.mxu1 }
 0x2ef   :  { %v7955_v61 = vpop.f32.mrf.mxu1 }
 0x2f1   :  { %v10124_v31 = vpop.f32.mrf.mxu1 }
 0x2f3   :  { %v10126_v53 = vpop.f32.mrf.mxu1 }
 0x2f5   :  { %v7960_v6 = vpop.f32.mrf.mxu1 }
 0x2f7   :  { %v7961_v50 = vpop.f32.mrf.mxu1 }
 0x2f8   :  { %v7962_v15 = vadd.f32 %v7961_v50, %v7960_v6  ;;  %v7838_v50 = vadd.f32 %v10102_v41, %v10100_v5 }
 0x2f9   :  { %v7963_v40 = vpop.f32.mrf.mxu1 }
 0x2fa   :  { %v3470_v58 = vadd.f32 %v7962_v15, %v7906_v33  ;;  %v2938_v33 = vadd.f32 %v7835_v45, %v7779_v55 }
 0x2fb   :  { %v7964_v7 = vpop.f32.mrf.mxu1 }
 0x2fc   :  { %v10128_v47 = vadd.f32 %v3470_v58, %v2981_v21  ;;  %v7965_v42 = vadd.f32 %v7964_v7, %v7963_v40  ;;  %v7891_v21 = vadd.f32 %v10073_v25, %v10069_v19  ;;  %v2976_v37 = vadd.f32 %v2938_v33, %v10040_v1  ;;  %v8010_v7 = vpop.f32.mrf.mxu0 }
 0x2fd   :  { %v7966_v59 = vpop.f32.mrf.mxu1  ;;  %v2943_v19 = vadd.f32 %v7838_v50, %v7782_v22  ;;  %v8003_v25 = vadd.f32 %v8002_v10, %v8001_v2  ;;  %v7953_v58 = vadd.f32 %v7952_v17, %v7951_v14  ;;  %v7900_v14 = vadd.f32 %v10106_v24, %v10104_v49 }
 0x2fe   :  { %v3475_v48 = vadd.f32 %v7965_v42, %v7909_v36  ;;  %v3445_v26 = vadd.f32 %v7947_v18, %v7891_v21  ;;  %v7950_v36 = vadd.f32 %v7949_v9, %v7948_v16  ;;  %v8006_v16 = vadd.f32 %v8005_v8, %v8004_v34  ;;  %v8011_v10 = vpop.f32.mrf.mxu0 }
 0x2ff   :  { %v7967_v0 = vpop.f32.mrf.mxu1  ;;  %v7956_v9 = vadd.f32 %v7955_v61, %v7954_v54  ;;  %v3455_v2 = vadd.f32 %v7953_v58, %v7897_v57  ;;  %v8012_v21 = vadd.f32 %v8011_v10, %v8010_v7  ;;  %v7959_v50 = vadd.f32 %v10126_v53, %v10124_v31 }
 0x300   :  { %v10134_v11 = vadd.f32 %v3475_v48, %v2982_v63  ;;  %v7968_v6 = vadd.f32 %v7967_v0, %v7966_v59  ;;  %v7894_v63 = vadd.f32 %v10078_v43, %v10076_v60  ;;  %v3483_v41 = vadd.f32 %v3445_v26, %v2976_v37  ;;  %v8013_v8 = vpop.f32.mrf.mxu0 }
 0x301   :  { %v8009_v48 = vadd.f32 %v8008_v39, %v8007_v35  ;;  %v3485_v34 = vadd.f32 %v3455_v2, %v10109_v27  ;;  %v7903_v22 = vadd.f32 %v10114_v23, %v10111_v13 }
 0x302   :  { %v3480_v15 = vadd.f32 %v7968_v6, %v7912_v4  ;;  %v3450_v4 = vadd.f32 %v7950_v36, %v7894_v63  ;;  %v3460_v6 = vadd.f32 %v7956_v9, %v7900_v14  ;;  %v8014_v27 = vpop.f32.mrf.mxu0 }
 0x303   :  { %v8057_v40 = vpop.f32.mrf.mxu1 }
 0x304   :  { %v10142_v62 = vadd.f32 %v3480_v15, %v2983_v52  ;;  %v2977_v52 = vadd.f32 %v2943_v19, %v10050_v32  ;;  %v3486_v26 = vadd.f32 %v3460_v6, %v10116_v46  ;;  %v3465_v19 = vadd.f32 %v7959_v50, %v7903_v22  ;;  %v8016_v50 = vpop.f32.mrf.mxu0 }
 0x305   :  { %v8058_v55 = vpop.f32.mrf.mxu1 }
 0x306   :  { %v8059_v3 = vadd.f32 %v8058_v55, %v8057_v40  ;;  %v3484_v42 = vadd.f32 %v3450_v4, %v2977_v52  ;;  %v3487_v23 = vadd.f32 %v3465_v19, %v10119_v28 }
 0x307   :  { %v8060_v5 = vpop.f32.mrf.mxu1 }
 0x308   :  { %v3952_v38 = vadd.f32 %v8059_v3, %v8003_v25 }
 0x309   :  { %v8061_v18 = vpop.f32.mrf.mxu1 }
 0x30a   :  { %v3990_v60 = vadd.f32 %v3952_v38, %v3483_v41  ;;  %v8062_v43 = vadd.f32 %v8061_v18, %v8060_v5  ;;  %v8015_v41 = vadd.f32 %v8014_v27, %v8013_v8 }
 0x30b   :  { %v8063_v1 = vpop.f32.mrf.mxu1 }
 0x30c   :  { %v3998_v59 = vrot.slane %v3990_v60, 4  ;;  %v3957_v45 = vadd.f32 %v8062_v43, %v8006_v16 }
 0x30d   :  { %v8064_v17 = vpop.f32.mrf.mxu1 }
 0x30e   :  { %v3999_v0 = vmax.f32 %v3990_v60, %v3998_v59  ;;  %v3991_v56 = vadd.f32 %v3957_v45, %v3484_v42  ;;  %v8065_v29 = vadd.f32 %v8064_v17, %v8063_v1 }
 0x30f   :  { %v8066_v32 = vpop.f32.mrf.mxu1 }
 0x310   :  { %v4000_v54 = vrot.slane %v3999_v0, 2  ;;  %v4004_v61 = vrot.slane %v3991_v56, 4  ;;  %v3962_v33 = vadd.f32 %v8065_v29, %v8009_v48 }
 0x311   :  { %v8067_v15 = vpop.f32.mrf.mxu1 }
 0x312   :  { %v4001_v40 = vmax.f32 %v3999_v0, %v4000_v54  ;;  %v4005_v49 = vmax.f32 %v3991_v56, %v4004_v61  ;;  %v3992_v24 = vadd.f32 %v3962_v33, %v3485_v34  ;;  %v8068_v35 = vadd.f32 %v8067_v15, %v8066_v32 }
 0x313   :  { %v8069_v36 = vpop.f32.mrf.mxu1 }
 0x314   :  { %v4002_v39 = vrot.slane %v4001_v40, 1  ;;  %v4006_v63 = vrot.slane %v4005_v49, 2  ;;  %v4010_v55 = vrot.slane %v3992_v24, 4  ;;  %v3967_v37 = vadd.f32 %v8068_v35, %v8012_v21 }
 0x315   :  { %v8070_v25 = vpop.f32.mrf.mxu1 }
 0x316   :  { %v4003_v3 = vmax.f32 %v4001_v40, %v4002_v39  ;;  %v4007_v31 = vmax.f32 %v4005_v49, %v4006_v63  ;;  %v4011_v53 = vmax.f32 %v3992_v24, %v4010_v55  ;;  %v3993_v5 = vadd.f32 %v3967_v37, %v3486_v26 }
 0x317   :  { %v8071_v4 = vadd.f32 %v8070_v25, %v8069_v36 }
 0x318   :  { %v4046_v58 = vsub.f32 %v3990_v60, %v4003_v3  ;;  %v4008_v7 = vrot.slane %v4007_v31, 1  ;;  %v4012_v38 = vrot.slane %v4011_v53, 2  ;;  %v4016_v13 = vrot.slane %v3993_v5, 4 }
 0x319   :  { %v3972_v46 = vadd.f32 %v8071_v4, %v8015_v41 }
 0x31a   :  { %v4054_v57 = vmul.f32 1.442695, %v4046_v58  ;;  %v4009_v18 = vmax.f32 %v4007_v31, %v4008_v7  ;;  %v4013_v52 = vmax.f32 %v4011_v53, %v4012_v38  ;;  %v4017_v16 = vmax.f32 %v3993_v5, %v4016_v13 }
 0x31b   :  { %v3994_v43 = vadd.f32 %v3972_v46, %v3487_v23 }
 0x31c   :  { %8646 = vpow2.f32 %v4054_v57  ;;  %v4047_v9 = vsub.f32 %v3991_v56, %v4009_v18  ;;  %v4018_v1 = vrot.slane %v4017_v16, 2  ;;  %v4014_v10 = vrot.slane %v4013_v52, 1  ;;  %v8072_v56 = vpop.f32.mrf.mxu1 }
 0x31d   :  { %v4022_v42 = vrot.slane %v3994_v43, 4 }
 0x31e   :  { %v4056_v2 = vmul.f32 1.442695, %v4047_v9  ;;  %v4019_v59 = vmax.f32 %v4017_v16, %v4018_v1  ;;  %v4015_v14 = vmax.f32 %v4013_v52, %v4014_v10  ;;  %v8073_v35 = vpop.f32.mrf.mxu1 }
 0x31f   :  { %v4023_v45 = vmax.f32 %v3994_v43, %v4022_v42  ;;  %v8074_v3 = vadd.f32 %v8073_v35, %v8072_v56 }
 0x320   :  { %8648 = vpow2.f32 %v4056_v2  ;;  %v4020_v17 = vrot.slane %v4019_v59, 1  ;;  %v4048_v0 = vsub.f32 %v3992_v24, %v4015_v14  ;;  %v8017_v24 = vpop.f32.mrf.mxu0  ;;  %v8075_v63 = vpop.f32.mrf.mxu1 }
 0x321   :  { %v4024_v60 = vrot.slane %v4023_v45, 2 }
 0x322   :  { %v4021_v29 = vmax.f32 %v4019_v59, %v4020_v17  ;;  %v4058_v34 = vmul.f32 1.442695, %v4048_v0  ;;  %v8019_v19 = vpop.f32.mrf.mxu0  ;;  %v8076_v31 = vpop.f32.mrf.mxu1 }
 0x323   :  { %v4025_v48 = vmax.f32 %v4023_v45, %v4024_v60  ;;  %v8077_v7 = vadd.f32 %v8076_v31, %v8075_v63 }
 0x324   :  { %v4049_v8 = vsub.f32 %v3993_v5, %v4021_v29  ;;  %8650 = vpow2.f32 %v4058_v34  ;;  %v8018_v5 = vadd.f32 %v8017_v24, %v8016_v50  ;;  %v8020_v41 = vpop.f32.mrf.mxu0 }
 0x325   :  { %v4026_v28 = vrot.slane %v4025_v48, 1  ;;  %v8021_v38 = vadd.f32 %v8020_v41, %v8019_v19 }
 0x326   :  { %v4060_v15 = vmul.f32 1.442695, %v4049_v8  ;;  %v3977_v58 = vadd.f32 %v8074_v3, %v8018_v5 }
 0x327   :  { %v4027_v32 = vmax.f32 %v4025_v48, %v4026_v28  ;;  %v3982_v57 = vadd.f32 %v8077_v7, %v8021_v38 }
 0x328   :  { %8652 = vpow2.f32 %v4060_v15  ;;  %v3995_v46 = vadd.f32 %v3977_v58, %v10128_v47  ;;  %v8022_v15 = vpop.f32.mrf.mxu0 }
 0x329   :  { %v8647_v6 = vpop.eup %8646  ;;  %v4050_v21 = vsub.f32 %v3994_v43, %v4027_v32  ;;  %v3996_v1 = vadd.f32 %v3982_v57, %v10134_v11 }
 0x32a   :  { %v4070_v54 = vrot.slane %v8647_v6, 4  ;;  %v4028_v9 = vrot.slane %v3995_v46, 4 }
 0x32b   :  { %v4062_v36 = vmul.f32 1.442695, %v4050_v21  ;;  %v4034_v60 = vrot.slane %v3996_v1, 4 }
 0x32c   :  { %v4071_v61 = vadd.f32 %v8647_v6, %v4070_v54  ;;  %v4029_v45 = vmax.f32 %v3995_v46, %v4028_v9  ;;  %v8078_v54 = vpop.f32.mrf.mxu1 }
 0x32d   :  { %v8649_v33 = vpop.eup %8648  ;;  %8654 = vpow2.f32 %v4062_v36  ;;  %v4035_v0 = vmax.f32 %v3996_v1, %v4034_v60  ;;  %v8023_v36 = vpop.f32.mrf.mxu0 }
 0x32e   :  { %v4072_v40 = vrot.slane %v4071_v61, 2  ;;  %v4076_v49 = vrot.slane %v8649_v33, 4  ;;  %v4030_v28 = vrot.slane %v4029_v45, 2 }
 0x32f   :  { %v4036_v8 = vrot.slane %v4035_v0, 2 }
 0x330   :  { %v4073_v22 = vadd.f32 %v4072_v40, %v4071_v61  ;;  %v4077_v26 = vadd.f32 %v8649_v33, %v4076_v49  ;;  %v4031_v34 = vmax.f32 %v4029_v45, %v4030_v28  ;;  %v8079_v40 = vpop.f32.mrf.mxu1 }
 0x331   :  { %v10159_v4 = vpop.eup %8650  ;;  %v8080_v24 = vadd.f32 %v8079_v40, %v8078_v54 }
 0x332   :  { %v4074_v27 = vrot.slane %v4073_v22, 1  ;;  %v4078_v39 = vrot.slane %v4077_v26, 2  ;;  %v4082_v13 = vrot.slane %v10159_v4, 4  ;;  %v4032_v50 = vrot.slane %v4031_v34, 1 }
 0x334   :  { %v4075_v55 = vadd.f32 %v4074_v27, %v4073_v22  ;;  %v4079_v37 = vadd.f32 %v4078_v39, %v4077_v26  ;;  %v4083_v52 = vadd.f32 %v10159_v4, %v4082_v13  ;;  %v4033_v22 = vmax.f32 %v4031_v34, %v4032_v50 }
 0x335   :  { %v10162_v23 = vpop.eup %8652  ;;  %v8024_v39 = vadd.f32 %v8023_v36, %v8022_v15 }
 0x336   :  { %8656 = vrcp.f32 %v4075_v55  ;;  %v4080_v25 = vrot.slane %v4079_v37, 1  ;;  %v4088_v16 = vrot.slane %v10162_v23, 4  ;;  %v4084_v2 = vrot.slane %v4083_v52, 2 }
 0x337   :  { %v4051_v63 = vsub.f32 %v3995_v46, %v4033_v22  ;;  %v10747_v22 = vunpack.c.l.bf16 %v10045_v12  ;;  %v8691_v12 = vld [vmem:[%s10568_s2 + $0x18] sm:$0xff]  }
 0x338   :  { %v4081_v53 = vadd.f32 %v4080_v25, %v4079_v37  ;;  %v4089_v10 = vadd.f32 %v10162_v23, %v4088_v16  ;;  %v4085_v17 = vadd.f32 %v4084_v2, %v4083_v52  ;;  %v3987_v37 = vadd.f32 %v8080_v24, %v8024_v39 }
 0x339   :  { %v4064_v19 = vmul.f32 1.442695, %v4051_v63  ;;  %v4141_v39 = vunpack.c.h.bf16 %v8691_v12 }
 0x33a   :  { %8658 = vrcp.f32 %v4081_v53  ;;  %v10165_v18 = vpop.eup %8654  ;;  %v4090_v48 = vrot.slane %v4089_v10, 2  ;;  %v4086_v29 = vrot.slane %v4085_v17, 1  ;;  %v3997_v3 = vadd.f32 %v3987_v37, %v10142_v62 }
 0x33b   :  { %v4094_v47 = vrot.slane %v10165_v18, 4 }
 0x33c   :  { %v4087_v56 = vadd.f32 %v4086_v29, %v4085_v17  ;;  %v4040_v5 = vrot.slane %v3997_v3, 4 }
 0x33d   :  { %v4095_v11 = vadd.f32 %v10165_v18, %v4094_v47 }
 0x33e   :  { %8660 = vrcp.f32 %v4087_v56  ;;  %v4041_v7 = vmax.f32 %v3997_v3, %v4040_v5  ;;  %v8791_v56 = vmov 0.0  }
 0x33f   :  { %v4096_v32 = vrot.slane %v4095_v11, 2  ;;  %8113 = vmatprep.subr.mxu0 %v8791_v56  ;;  %8115 = vmatprep.mubr.msk.f32.mxu0 %vm8792_vm1, %v8791_v56 }
 0x340   :  { %v4042_v62 = vrot.slane %v4041_v7, 2  ;;  %8114 = vmatpush3.msra.mxu0 %v4134_v20  ;;  %8118 = vmatprep.subr.mxu1 %v8791_v56 }
 0x341   :  { %v4097_v21 = vadd.f32 %v4096_v32, %v4095_v11  ;;  %8123 = vmatprep.subr.mxu0 %v8791_v56  ;;  %8119 = vmatpush3.msra.mxu1 %v4135_v51  ;;  %v10213_v51 = vpop.permute.xlu0 %8209 }
 0x342   :  { %v4043_v52 = vmax.f32 %v4041_v7, %v4042_v62  ;;  %8120 = vmatprep.mubr.msk.f32.mxu1 %vm8792_vm1, %v8791_v56  ;;  %8128 = vmatprep.subr.mxu1 %v8791_v56 }
 0x343   :  { %v8657_v43 = vpop.eup %8656  ;;  %v4098_v35 = vrot.slane %v4097_v21, 1 }
 0x344   :  { %v4126_v42 = vmul.f32 %v8657_v43, %v8647_v6  ;;  %v4091_v6 = vadd.f32 %v4090_v48, %v4089_v10  ;;  %v4044_v43 = vrot.slane %v4043_v52, 1 }
 0x345   :  { %v4099_v27 = vadd.f32 %v4098_v35, %v4097_v21 }
 0x346   :  { %4406 = vrot.lane.b32.xlu0 %v4126_v42, %s8790_s23  ;;  %v4092_v61 = vrot.slane %v4091_v6, 1 }
 0x347   :  { %v8659_v59 = vpop.eup %8658 }
 0x348   :  { %v10173_v14 = vmul.f32 %v8659_v59, %v8649_v33  ;;  %v4037_v33 = vmax.f32 %v4035_v0, %v4036_v8  ;;  %v4093_v49 = vadd.f32 %v4092_v61, %v4091_v6 }
 0x34a   :  { %4174 = vxpose.xlu1.b32.start.end [1/1] (short) (narrow) %v10173_v14, 8  ;;  %v4038_v26 = vrot.slane %v4037_v33, 1  ;;  %8662 = vrcp.f32 %v4093_v49 }
 0x34b   :  { %8664 = vrcp.f32 %v4099_v27  ;;  %v8661_v31 = vpop.eup %8660  ;;  %v4140_v27 = vunpack.c.l.bf16 %v8691_v12 }
 0x34c   :  { %v4039_v55 = vmax.f32 %v4037_v33, %v4038_v26  ;;  %8666 = vpow2.f32 %v4064_v19  ;;  %v4128_v41 = vmul.f32 %v8661_v31, %v10159_v4  ;;  %v10201_v33 = vpop.permute.xlu1 %8214  ;;  %v8211_v31 = vunpack.i.l.bf16 %v10213_v51 }
 0x34d   :  { %v8223_v63 = vpack.i.bf16 %v4141_v39, %v4140_v27 }
 0x34e   :  { %v4052_v25 = vsub.f32 %v3996_v1, %v4039_v55 }
 0x350   :  { %v4066_v53 = vmul.f32 1.442695, %v4052_v25  ;;  %v10204_v15 = vpop.permute.xlu1 %8219 }
 0x352   :  { %8668 = vpow2.f32 %v4066_v53 }
 0x357   :  { %v8663_v58 = vpop.eup %8662 }
 0x358   :  { %v10181_v38 = vmul.f32 %v8663_v58, %v10162_v23  ;;  %v8665_v13 = vpop.eup %8664 }
 0x359   :  { %v4130_v46 = vmul.f32 %v8665_v13, %v10165_v18  ;;  %v8667_v57 = vpop.eup %8666  ;;  %v8216_v13 = vunpack.i.l.bf16 %v10201_v33 }
 0x35a   :  { %v4100_v4 = vrot.slane %v8667_v57, 4 }
 0x35c   :  { %v4101_v9 = vadd.f32 %v8667_v57, %v4100_v4  ;;  %v8217_v4 = vunpack.i.h.bf16 %v10201_v33 }
 0x35e   :  { %v4102_v2 = vrot.slane %v4101_v9, 2 }
 0x35f   :  { %v8669_v16 = vpop.eup %8668 }
 0x360   :  { %v4106_v1 = vrot.slane %v8669_v16, 4  ;;  %v4103_v47 = vadd.f32 %v4102_v2, %v4101_v9  ;;  %v8221_v9 = vunpack.i.l.bf16 %v10204_v15 }
 0x362   :  { %v4107_v23 = vadd.f32 %v8669_v16, %v4106_v1  ;;  %v4104_v60 = vrot.slane %v4103_v47, 1 }
 0x364   :  { %4142 = vxpose.xlu0.b32.start.end [1/1] (short) (narrow) %v4126_v42, 8  ;;  %v4045_v42 = vmax.f32 %v4043_v52, %v4044_v43  ;;  %v4108_v59 = vrot.slane %v4107_v23, 2  ;;  %v4105_v18 = vadd.f32 %v4104_v60, %v4103_v47  ;;  %v8212_v52 = vunpack.i.h.bf16 %v10213_v51  ;;  %v8315_v51 = vld [vmem:[#allocation8 + $0x10] sm:$0xff]  }
 0x366   :  { %v4053_v10 = vsub.f32 %v3997_v3, %v4045_v42  ;;  %v4109_v17 = vadd.f32 %v4108_v59, %v4107_v23  ;;  %v10748_v3 = vunpack.c.l.bf16 %v10060_v44 }
 0x368   :  { %4410 = vrot.lane.b32.xlu1 %v4128_v41, %s8790_s23  ;;  %v4068_v45 = vmul.f32 1.442695, %v4053_v10  ;;  %v4110_v48 = vrot.slane %v4109_v17, 1 }
 0x36a   :  { %8670 = vpow2.f32 %v4068_v45  ;;  %v4111_v11 = vadd.f32 %v4110_v48, %v4109_v17 }
 0x36b   :  { %8672 = vrcp.f32 %v4105_v18 }
 0x36c   :  { %4412 = vrot.lane.b32.xlu1 %v10181_v38, %s8790_s23  ;;  %8674 = vrcp.f32 %v4111_v11 }
 0x370   :  { %4414 = vrot.lane.b32.xlu1 %v4130_v46, %s8790_s23 }
 0x377   :  { %v8671_v28 = vpop.eup %8670 }
 0x378   :  { %v4112_v0 = vrot.slane %v8671_v28, 4  ;;  %v8673_v29 = vpop.eup %8672 }
 0x379   :  { %v4131_v32 = vmul.f32 %v8673_v29, %v8667_v57  ;;  %v8675_v34 = vpop.eup %8674  ;;  %v10750_v57 = vunpack.c.h.bf16 %v10060_v44 }
 0x37a   :  { %v4113_v6 = vadd.f32 %v8671_v28, %v4112_v0  ;;  %v4132_v54 = vmul.f32 %v8675_v34, %v8669_v16  ;;  %v8222_v16 = vunpack.i.h.bf16 %v10204_v15  ;;  %v8310_v34 = vld [vmem:[#allocation8 + $0x38] sm:$0xff]  }
 0x37c   :  { %v4114_v8 = vrot.slane %v4113_v6, 2 }
 0x38d   :  { %4408 = vrot.lane.b32.xlu0 %v10173_v14, %s8790_s23  ;;  %v4115_v14 = vadd.f32 %v4114_v8, %v4113_v6  ;;  %v8311_v8 = vld [vmem:[#allocation8 + $0x30] sm:$0xff]  }
 0x38f   :  { %v4116_v61 = vrot.slane %v4115_v14, 1 }
 0x391   :  { %v4117_v21 = vadd.f32 %v4116_v61, %v4115_v14  ;;  %v8314_v14 = vld [vmem:[#allocation8 + $0x18] sm:$0xff]  }
 0x393   :  { %8676 = vrcp.f32 %v4117_v21 }
 0x399   :  { %4270 = vxpose.xlu1.b32.start.end [1/1] (short) (narrow) %v4130_v46, 8 }
 0x39d   :  { %4302 = vxpose.xlu1.b32.start.end [1/1] (short) (narrow) %v4131_v32, 8 }
 0x3a0   :  { %v8677_v50 = vpop.eup %8676 }
 0x3a1   :  { %4334 = vxpose.xlu1.b32.start.end [1/1] (short) (narrow) %v4132_v54, 8  ;;  %v4133_v20 = vmul.f32 %v8677_v50, %v8671_v28 }
 0x3ab   :  { %4206 = vxpose.xlu0.b32.start.end [1/1] (short) (narrow) %v4128_v41, 8 }
 0x3b8   :  { %v4407_v49 = vpop.permute.xlu0 %4406 }
 0x3bf   :  { %4420 = vrot.lane.b32.xlu1 %v4133_v20, %s8790_s23 }
 0x3c6   :  { %v4190_v40 = vpop.trf.xlu1 }
 0x3c7   :  { %8121 = vmatmul.mubr.msk.f32.vlgmr.msra.gmra.mxu1 %vm4686_vm2, %v4190_v40 }
 0x3c8   :  { %8129 = vmatpush3.msra.mxu1 %v10746_v30  ;;  %8130 = vmatprep.mubr.msk.f32.mxu1 %vm8792_vm1, %v8791_v56 }
 0x3c9   :  { %8138 = vmatprep.subr.mxu1 %v8791_v56 }
 0x3d4   :  { %4416 = vrot.lane.b32.xlu0 %v4131_v32, %s8790_s23 }
 0x3d8   :  { %4418 = vrot.lane.b32.xlu0 %v4132_v54, %s8790_s23  ;;  %v8312_v54 = vld [vmem:[#allocation8 + $0x28] sm:$0xff]  }
 0x3da   :  { %v4411_v36 = vpop.permute.xlu1 %4410 }
 0x3de   :  { %v4413_v24 = vpop.permute.xlu1 %4412 }
 0x3e0   :  { %v4158_v35 = vpop.trf.xlu0 }
 0x3e1   :  { %8116 = vmatmul.mubr.msk.f32.vlgmr.msra.gmra.mxu0 %vm4686_vm2, %v4158_v35 }
 0x3e2   :  { %8124 = vmatpush3.msra.mxu0 %v10747_v22  ;;  %8125 = vmatprep.mubr.msk.f32.mxu0 %vm8792_vm1, %v8791_v56  ;;  %v4415_v55 = vpop.permute.xlu1 %4414 }
 0x3e3   :  { %8133 = vmatprep.subr.mxu0 %v8791_v56 }
 0x3e8   :  { %4366 = vxpose.xlu1.b32.start.end [1/1] (short) (narrow) %v4133_v20, 8 }
 0x3ec   :  { %4430 = vxpose.xlu1.b32.start.end [1/1] (short) (narrow) %v4407_v49, 8 }
 0x3f6   :  { %4238 = vxpose.xlu0.b32.start.end [1/1] (short) (narrow) %v10181_v38, 8  ;;  %v10749_v38 = vmov 0  }
 0x3ff   :  { %v4409_v26 = vpop.permute.xlu0 %4408 }
 0x400   :  { %4462 = vxpose.xlu1.b32.start.end [1/1] (short) (narrow) %v4409_v26, 8 }
 0x404   :  { %4494 = vxpose.xlu1.b32.start.end [1/1] (short) (narrow) %v4411_v36, 8  ;;  %v8316_v36 = vld [vmem:[#allocation8 + $0x8] sm:$0xff]  }
 0x408   :  { %4526 = vxpose.xlu1.b32.start.end [1/1] (short) (narrow) %v4413_v24, 8 }
 0x415   :  { %v4286_v37 = vpop.trf.xlu1 }
 0x419   :  { %v4318_v25 = vpop.trf.xlu1 }
 0x41d   :  { %v4350_v53 = vpop.trf.xlu1 }
 0x41f   :  { %8224 = vrot.lane.b32.xlu0 %v8223_v63, %s8786_s14  ;;  %v8318_v63 = vld [vmem:[#allocation8 + $0x58] sm:$0xff]  }
 0x427   :  { %v4222_v19 = vpop.trf.xlu0 }
 0x428   :  { %8126 = vmatmul.mubr.msk.f32.vlgmr.msra.gmra.mxu0 %vm4686_vm2, %v4222_v19  ;;  %v8321_v19 = vld [vmem:[#allocation8 + $0x40] sm:$0xff]  }
 0x429   :  { %8134 = vmatpush3.msra.mxu0 %v10748_v3  ;;  %8135 = vmatprep.mubr.msk.f32.mxu0 %vm8792_vm1, %v8791_v56 }
 0x42a   :  { %8143 = vmatprep.subr.mxu0 %v8791_v56 }
 0x42c   :  { %8136 = vmatmul.mubr.msk.f32.vlgmr.msra.gmra.mxu0 %vm4686_vm2, %v4286_v37  ;;  %v8320_v37 = vld [vmem:[#allocation8 + $0x48] sm:$0xff]  }
 0x42d   :  { %8144 = vmatpush3.msra.mxu0 %v4140_v27  ;;  %8145 = vmatprep.mubr.msk.f32.mxu0 %vm8792_vm1, %v8791_v56  ;;  %v8317_v27 = vld [vmem:[#allocation8] sm:$0xff]  }
 0x42e   :  { %8153 = vmatprep.subr.mxu0 %v8791_v56 }
 0x430   :  { %8146 = vmatmul.mubr.msk.f32.vlgmr.msra.gmra.mxu0 %vm4686_vm2, %v4350_v53 }
 0x431   :  { %8154 = vmatpush3.msra.mxu0 %v8211_v31  ;;  %8155 = vmatprep.mubr.msk.f32.mxu0 %vm8792_vm1, %v8791_v56  ;;  %v4421_v58 = vpop.permute.xlu1 %4420 }
 0x432   :  { %8163 = vmatprep.subr.mxu0 %v8791_v56 }
 0x43d   :  { %4558 = vxpose.xlu0.b32.start.end [1/1] (short) (narrow) %v4415_v55, 8  ;;  %v8319_v55 = vld [vmem:[#allocation8 + $0x50] sm:$0xff]  }
 0x446   :  { %v4417_v5 = vpop.permute.xlu0 %4416 }
 0x447   :  { %4590 = vxpose.xlu1.b32.start.end [1/1] (short) (narrow) %v4417_v5, 8 }
 0x44a   :  { %v4419_v41 = vpop.permute.xlu0 %4418 }
 0x44b   :  { %4622 = vxpose.xlu1.b32.start.end [1/1] (short) (narrow) %v4419_v41, 8 }
 0x44f   :  { %4654 = vxpose.xlu1.b32.start.end [1/1] (short) (narrow) %v4421_v58, 8 }
 0x464   :  { %v4382_v7 = vpop.trf.xlu1 }
 0x466   :  { %8233 = vset.pattern.permute.xlu0 %v10749_v38 }
 0x468   :  { %v4446_v62 = vpop.trf.xlu1 }
 0x469   :  { %8156 = vmatmul.mubr.msk.f32.vlgmr.msra.gmra.mxu0 %vm4686_vm2, %v4446_v62 }
 0x46a   :  { %8164 = vmatpush3.msra.mxu0 %v8216_v13  ;;  %8165 = vmatprep.mubr.msk.f32.mxu0 %vm8792_vm1, %v8791_v56 }
 0x46b   :  { %8173 = vmatprep.subr.mxu0 %v8791_v56 }
 0x472   :  { %v4254_v46 = vpop.trf.xlu0 }
 0x473   :  { %8131 = vmatmul.mubr.msk.f32.vlgmr.msra.gmra.mxu1 %vm4686_vm2, %v4254_v46 }
 0x474   :  { %8139 = vmatpush3.msra.mxu1 %v10750_v57  ;;  %8140 = vmatprep.mubr.msk.f32.mxu1 %vm8792_vm1, %v8791_v56  ;;  %v5937_v57 = vld [vmem:[%s10567_s1 + $0x8] sm:$0x7] }
 0x475   :  { %8148 = vmatprep.subr.mxu1 %v8791_v56 }
 0x477   :  { %8141 = vmatmul.mubr.msk.f32.vlgmr.msra.gmra.mxu1 %vm4686_vm2, %v4318_v25 }
 0x478   :  { %8149 = vmatpush3.msra.mxu1 %v4141_v39  ;;  %8150 = vmatprep.mubr.msk.f32.mxu1 %vm8792_vm1, %v8791_v56 }
 0x479   :  { %8158 = vmatprep.subr.mxu1 %v8791_v56 }
 0x47b   :  { %8151 = vmatmul.mubr.msk.f32.vlgmr.msra.gmra.mxu1 %vm4686_vm2, %v4382_v7 }
 0x47c   :  { %8159 = vmatpush3.msra.mxu1 %v8212_v52  ;;  %v4478_v44 = vpop.trf.xlu1  ;;  %8160 = vmatprep.mubr.msk.f32.mxu1 %vm8792_vm1, %v8791_v56 }
 0x47d   :  { %8168 = vmatprep.subr.mxu1 %v8791_v56 }
 0x47f   :  { %8161 = vmatmul.mubr.msk.f32.vlgmr.msra.gmra.mxu1 %vm4686_vm2, %v4478_v44 }
 0x480   :  { %8169 = vmatpush3.msra.mxu1 %v8217_v4  ;;  %v4510_v43 = vpop.trf.xlu1  ;;  %8170 = vmatprep.mubr.msk.f32.mxu1 %vm8792_vm1, %v8791_v56  ;;  %v5935_v4 = vld [vmem:[%s10567_s1] sm:$0x7] }
 0x481   :  { %8166 = vmatmul.mubr.msk.f32.vlgmr.msra.gmra.mxu0 %vm4686_vm2, %v4510_v43  ;;  %8178 = vmatprep.subr.mxu1 %v8791_v56 }
 0x482   :  { %8174 = vmatpush3.msra.mxu0 %v8222_v16  ;;  %8175 = vmatprep.mubr.msk.f32.mxu0 %vm8792_vm1, %v8791_v56  ;;  %v5936_v16 = vld [vmem:[%s10567_s1 + $0x4] sm:$0x7] }
 0x483   :  { %8183 = vmatprep.subr.mxu0 %v8791_v56 }
 0x484   :  { %v4542_v1 = vpop.trf.xlu1 }
 0x485   :  { %8171 = vmatmul.mubr.msk.f32.vlgmr.msra.gmra.mxu1 %vm4686_vm2, %v4542_v1 }
 0x486   :  { %8179 = vmatpush3.msra.mxu1 %v8221_v9  ;;  %8180 = vmatprep.mubr.msk.f32.mxu1 %vm8792_vm1, %v8791_v56 }
 0x487   :  { %8188 = vmatprep.subr.mxu1 %v8791_v56  ;;  %v10278_v42 = vpop.f32.mrf.mxu1 }
 0x489   :  { %v8122_v2 = vpop.f32.mrf.mxu1 }
 0x491   :  { %v8225_v47 = vpop.permute.xlu0 %8224 }
 0x492   :  { %v8226_v59 = vunpack.i.l.bf16 %v8225_v47  ;;  %v8227_v60 = vunpack.i.h.bf16 %v8225_v47 }
 0x4a1   :  { %v10280_v23 = vpop.f32.mrf.mxu0 }
 0x4a3   :  { %v8117_v10 = vpop.f32.mrf.mxu0 }
 0x4b9   :  { %v4574_v45 = vpop.trf.xlu0 }
 0x4ba   :  { %8176 = vmatmul.mubr.msk.f32.vlgmr.msra.gmra.mxu0 %vm4686_vm2, %v4574_v45 }
 0x4bb   :  { %8184 = vmatpush3.msra.mxu0 %v8226_v59  ;;  %8185 = vmatprep.mubr.msk.f32.mxu0 %vm8792_vm1, %v8791_v56 }
 0x4bc   :  { %6487 = vmatprep.subr.bf16.mxu0 %v10749_v38 }
 0x4c3   :  { %v4606_v17 = vpop.trf.xlu1 }
 0x4c4   :  { %8181 = vmatmul.mubr.msk.f32.vlgmr.msra.gmra.mxu1 %vm4686_vm2, %v4606_v17  ;;  %v10751_v17 = vld [vmem:[#allocation14_spill] sm:$0xff] }
 0x4c5   :  { %8189 = vmatpush3.msra.mxu1 %v8227_v60  ;;  %8190 = vmatprep.mubr.msk.f32.mxu1 %vm8792_vm1, %v8791_v56  ;;  %v8313_v56 = vld [vmem:[#allocation8 + $0x20] sm:$0xff]  }
 0x4c7   :  { %v4638_v18 = vpop.trf.xlu1 }
 0x4c8   :  { %8186 = vmatmul.mubr.msk.f32.vlgmr.msra.gmra.mxu0 %vm4686_vm2, %v4638_v18 }
 0x4c9   :  { %6488 = vmatpush1.bf16.msra.mxu0 %v8310_v34 }
 0x4ca   :  { %6489 = vmatprep.subr.bf16.mxu0 %v10749_v38 }
 0x4cb   :  { %v4670_v48 = vpop.trf.xlu1 }
 0x4cc   :  { %8191 = vmatmul.mubr.msk.f32.vlgmr.msra.gmra.mxu1 %vm4686_vm2, %v4670_v48  ;;  %v5938_v48 = vld [vmem:[%s10567_s1 + $0xc] sm:$0x7] }
 0x4cd   :  { %6490 = vmatpush1.bf16.msra.mxu0 %v8311_v8 }
 0x4ce   :  { %6491 = vmatprep.subr.bf16.mxu0 %v10749_v38 }
 0x4d1   :  { %6492 = vmatpush1.bf16.msra.mxu0 %v8312_v54 }
 0x4d2   :  { %6493 = vmatprep.subr.bf16.mxu0 %v10749_v38 }
 0x4d5   :  { %6494 = vmatpush1.bf16.msra.mxu0 %v8313_v56 }
 0x4d6   :  { %6495 = vmatprep.subr.bf16.mxu0 %v10749_v38 }
 0x4d9   :  { %6496 = vmatpush1.bf16.msra.mxu0 %v8314_v14 }
 0x4da   :  { %6497 = vmatprep.subr.bf16.mxu0 %v10749_v38 }
 0x4dd   :  { %6498 = vmatpush1.bf16.msra.mxu0 %v8315_v51 }
 0x4de   :  { %6499 = vmatprep.subr.bf16.mxu0 %v10749_v38 }
 0x4e1   :  { %6500 = vmatpush1.bf16.msra.mxu0 %v8316_v36 }
 0x4e2   :  { %6501 = vmatprep.subr.bf16.mxu0 %v10749_v38 }
 0x4e5   :  { %6502 = vmatpush1.bf16.msra.mxu0 %v8317_v27 }
 0x4e6   :  { %6511 = vmatprep.subr.bf16.mxu0 %v10749_v38 }
 0x4e8   :  { %v10291_v11 = vpop.f32.mrf.mxu0 }
 0x4e9   :  { %6512 = vmatpush2.bf16.msra.mxu0 %v8318_v63 }
 0x4ea   :  { %v8127_v28 = vpop.f32.mrf.mxu0  ;;  %6513 = vmatprep.subr.bf16.mxu0 %v10749_v38 }
 0x4ec   :  { %v10293_v0 = vpop.f32.mrf.mxu0 }
 0x4ed   :  { %6514 = vmatpush2.bf16.msra.mxu0 %v8319_v55 }
 0x4ee   :  { %v8137_v29 = vpop.f32.mrf.mxu0  ;;  %6515 = vmatprep.subr.bf16.mxu0 %v10749_v38 }
 0x4f0   :  { %v10295_v6 = vpop.f32.mrf.mxu0 }
 0x4f1   :  { %6516 = vmatpush2.bf16.msra.mxu0 %v8320_v37 }
 0x4f2   :  { %v8147_v32 = vpop.f32.mrf.mxu0  ;;  %6517 = vmatprep.subr.bf16.mxu0 %v10749_v38 }
 0x4f5   :  { %6518 = vmatpush2.bf16.msra.mxu0 %v8321_v19 }
 0x529   :  { %v5344_v61 = vpop.f32.mrf.mxu0 }
 0x52b   :  { %v8157_v21 = vpop.f32.mrf.mxu0 }
 0x533   :  { %v10302_v50 = vpop.f32.mrf.mxu1 }
 0x535   :  { %v8132_v33 = vpop.f32.mrf.mxu1 }
 0x537   :  { %v10304_v20 = vpop.f32.mrf.mxu1 }
 0x539   :  { %v8142_v15 = vpop.f32.mrf.mxu1 }
 0x53b   :  { %v10306_v40 = vpop.f32.mrf.mxu1 }
 0x53d   :  { %v8152_v30 = vpop.f32.mrf.mxu1 }
 0x53f   :  { %v5421_v49 = vpop.f32.mrf.mxu1 }
 0x540   :  { %v8228_v35 = vpack.i.bf16 %v5344_v61, %v5421_v49 }
 0x541   :  { %v5498_v22 = vpop.f32.mrf.mxu0  ;;  %v8162_v26 = vpop.f32.mrf.mxu1 }
 0x542   :  { %5899 = vrot.lane.b32.xlu0 %v5498_v22, %s8786_s14  ;;  %8229 = vrot.lane.b32.xlu1 %v8228_v35, %s8786_s14 }
 0x543   :  { %v8167_v24 = vpop.f32.mrf.mxu0 }
 0x545   :  { %v5575_v12 = vpop.f32.mrf.mxu1 }
 0x546   :  { %5901 = vrot.lane.b32.xlu1 %v5575_v12, %s8786_s14 }
 0x547   :  { %v8172_v39 = vpop.f32.mrf.mxu1 }
 0x57a   :  { %v5652_v25 = vpop.f32.mrf.mxu0 }
 0x57c   :  { %v8177_v3 = vpop.f32.mrf.mxu0 }
 0x584   :  { %v5729_v31 = vpop.f32.mrf.mxu1 }
 0x585   :  { %5905 = vrot.lane.b32.xlu1 %v5729_v31, %s8786_s14 }
 0x586   :  { %v8182_v53 = vpop.f32.mrf.mxu1 }
 0x588   :  { %v5806_v5 = vpop.f32.mrf.mxu0 }
 0x589   :  { %5903 = vrot.lane.b32.xlu1 %v5652_v25, %s8786_s14 }
 0x58a   :  { %v8187_v41 = vpop.f32.mrf.mxu0 }
 0x58c   :  { %v5883_v58 = vpop.f32.mrf.mxu1 }
 0x58d   :  { %5907 = vrot.lane.b32.xlu1 %v5806_v5, %s8786_s14 }
 0x58e   :  { %v8192_v7 = vpop.f32.mrf.mxu1 }
 0x591   :  { %5909 = vrot.lane.b32.xlu1 %v5883_v58, %s8786_s14 }
 0x5b4   :  { %v8230_v13 = vpop.permute.xlu1 %8229  ;;  %v5900_v62 = vpop.permute.xlu0 %5899 }
 0x5b5   :  { %v8232_v38 = vunpack.i.h.bf16 %v8230_v13  ;;  %v8231_v46 = vunpack.i.l.bf16 %v8230_v13  ;;  %v5921_v52 = vsel %vm597_vm0, %v10291_v11, %v5900_v62 }
 0x5b6   :  { %v5929_v44 = vpack.c.bf16 %v5921_v52, %v5921_v52 }
 0x5b7   :  { %v5919_v43 = vsel %vm597_vm0, %v10280_v23, %v8232_v38  ;;  %v5920_v9 = vsel %vm597_vm0, %v10278_v42, %v8231_v46 }
 0x5b8   :  { %v5927_v1 = vpack.c.bf16 %v5919_v43, %v5919_v43  ;;  %v5928_v2 = vpack.c.bf16 %v5920_v9, %v5920_v9  ;;  %v6007_v10 = vcombine.low %v5929_v44, %v5937_v57  ;;  %v5902_v47 = vpop.permute.xlu1 %5901 }
 0x5b9   :  { %v5922_v59 = vsel %vm597_vm0, %v10302_v50, %v5902_v47 }
 0x5ba   :  { %v5959_v45 = vcombine.low %v5927_v1, %v5935_v4  ;;  %v5983_v60 = vcombine.low %v5928_v2, %v5936_v16  ;;  %v6014_v18 = vrot.slane %v6007_v10, %v10751_v17  ;;  %v5930_v11 = vpack.c.bf16 %v5922_v59, %v5922_v59  ;;  %v5940_v2 = vld [vmem:[%s10567_s1 + $0x14] sm:$0x7] }
 0x5bc   :  { %v5966_v23 = vrot.slane %v5959_v45, %v10751_v17  ;;  %v5990_v42 = vrot.slane %v5983_v60, %v10751_v17  ;;  %v6022_v28 = vrot.slane %v6014_v18, %v10751_v17  ;;  %v6031_v29 = vcombine.low %v5930_v11, %v5938_v48  ;;  %v5939_v60 = vld [vmem:[%s10567_s1 + $0x10] sm:$0x7] }
 0x5bd   :  { %v6015_v56 = vcombine.high %v6014_v18, %v6014_v18 }
 0x5be   :  { %v5967_v32 = vcombine.high %v5966_v23, %v5966_v23  ;;  %v5974_v34 = vrot.slane %v5966_v23, %v10751_v17  ;;  %v5991_v8 = vcombine.high %v5990_v42, %v5990_v42  ;;  %v5998_v54 = vrot.slane %v5990_v42, %v10751_v17 }
 0x5bf   :  { %v6038_v14 = vrot.slane %v6031_v29, %v10751_v17  ;;  %v6030_v30 = vcombine.high %v6022_v28, %v6022_v28  ;;  %v6029_v24 = vrot.slane %v6015_v56, %v10751_v17 }
 0x5c0   :  { %v5981_v61 = vrot.slane %v5967_v32, %v10751_v17  ;;  %v5982_v21 = vcombine.high %v5974_v34, %v5974_v34  ;;  %v6005_v50 = vrot.slane %v5991_v8, %v10751_v17  ;;  %v6157_v33 = vunpack.i.h.s16 %v5998_v54  ;;  %v5941_v8 = vld [vmem:[%s10567_s1 + $0x18] sm:$0x7] }
 0x5c1   :  { %v6006_v15 = vcombine.high %v5998_v54, %v5998_v54  ;;  %v6039_v51 = vcombine.high %v6038_v14, %v6038_v14  ;;  %v6046_v49 = vrot.slane %v6038_v14, %v10751_v17 }
 0x5c2   :  { %v6239_v35 = vcombine.low %v5974_v34, %v5981_v61  ;;  %v7492_v22 = vpack.i.b16 %v5998_v54, %v5982_v21  ;;  %v7493_v26 = vpack.i.b16 %v6005_v50, %v6157_v33  ;;  %v6159_v36 = vunpack.i.h.s16 %v6005_v50 }
 0x5c3   :  { %v6053_v12 = vrot.slane %v6039_v51, %v10751_v17  ;;  %v6167_v27 = vunpack.i.h.s16 %v6046_v49  ;;  %v7495_v39 = vpack.i.b16 %v6046_v49, %v6030_v30  ;;  %v6054_v37 = vcombine.high %v6046_v49, %v6046_v49 }
 0x5c4   :  { %v7494_v63 = vpack.i.b16 %v6006_v15, %v6159_v36  ;;  %v6240_v55 = vcombine.low %v7492_v22, %v7493_v26  ;;  %v6249_v53 = vrot.slane %v6239_v35, %v10751_v17 }
 0x5c5   :  { %v6169_v19 = vunpack.i.h.s16 %v6053_v12  ;;  %v10353_v25 = vpack.i.b16 %v6053_v12, %v6167_v27  ;;  %v6242_v3 = vcombine.low %v6029_v24, %v7495_v39 }
 0x5c6   :  { %v6241_v31 = vcombine.low %v7494_v63, %v6022_v28  ;;  %v6256_v5 = vrot.slane %v6240_v55, %v10751_v17 }
 0x5c7   :  { %v7497_v41 = vpack.i.b16 %v6054_v37, %v6169_v19  ;;  %v6270_v7 = vrot.slane %v6242_v3, %v10751_v17 }
 0x5c8   :  { %v6263_v58 = vrot.slane %v6241_v31, %v10751_v17  ;;  %v6272_v13 = vcombine.high %v6249_v53, %v6256_v5  ;;  %v6271_v62 = vcombine.low %v6249_v53, %v6256_v5 }
 0x5c9   :  { %v6305_v38 = vcombine.low %v10353_v25, %v7497_v41 }
 0x5ca   :  { %v6274_v46 = vcombine.high %v6263_v58, %v6270_v7  ;;  %v6273_v57 = vcombine.low %v6263_v58, %v6270_v7  ;;  %v6288_v52 = vrot.slane %v6272_v13, %v10751_v17  ;;  %v6281_v4 = vrot.slane %v6271_v62, %v10751_v17 }
 0x5cb   :  { %v6315_v19 = vrot.slane %v6305_v38, %v10751_v17 }
 0x5cc   :  { %v6302_v44 = vrot.slane %v6274_v46, %v10751_v17  ;;  %v6295_v16 = vrot.slane %v6273_v57, %v10751_v17 }
 0x5ce   :  { %v6304_v43 = vcombine.low %v6288_v52, %v6302_v44  ;;  %v6303_v9 = vcombine.low %v6281_v4, %v6295_v16 }
 0x5d0   :  { %7516 = vmatprep.mubr.msk.bf16.mxu0 %vm597_vm0, %v6304_v43 }
 0x5d1   :  { %6520 = vmatmul.mubr.bf16.vlgmr.msra.gmra.mxu0 %v6303_v9 }
 0x5f7   :  { %v5906_v1 = vpop.permute.xlu1 %5905 }
 0x5f8   :  { %v5924_v10 = vsel %vm597_vm0, %v10304_v20, %v5906_v1 }
 0x5f9   :  { %v5932_v47 = vpack.c.bf16 %v5924_v10, %v5924_v10 }
 0x5fb   :  { %v6079_v59 = vcombine.low %v5932_v47, %v5940_v2  ;;  %v5904_v45 = vpop.permute.xlu1 %5903 }
 0x5fc   :  { %v5923_v18 = vsel %vm597_vm0, %v10293_v0, %v5904_v45 }
 0x5fd   :  { %v6086_v48 = vrot.slane %v6079_v59, %v10751_v17  ;;  %v5931_v11 = vpack.c.bf16 %v5923_v18, %v5923_v18 }
 0x5ff   :  { %v6087_v23 = vcombine.high %v6086_v48, %v6086_v48  ;;  %v6094_v42 = vrot.slane %v6086_v48, %v10751_v17  ;;  %v6055_v28 = vcombine.low %v5931_v11, %v5939_v60  ;;  %v5908_v29 = vpop.permute.xlu1 %5907 }
 0x600   :  { %v5925_v20 = vsel %vm597_vm0, %v10295_v6, %v5908_v29  ;;  %v5942_v6 = vld [vmem:[%s10567_s1 + $0x1c] sm:$0x7] }
 0x601   :  { %v6101_v32 = vrot.slane %v6087_v23, %v10751_v17  ;;  %v6062_v34 = vrot.slane %v6055_v28, %v10751_v17  ;;  %v5933_v0 = vpack.c.bf16 %v5925_v20, %v5925_v20  ;;  %v6177_v54 = vunpack.i.h.s16 %v6094_v42  ;;  %v10414_v28 = vld [vmem:[%s10574_s8] ss:$0 sm:$0xff] }
 0x602   :  { %v6102_v49 = vcombine.high %v6094_v42, %v6094_v42 }
 0x603   :  { %v6063_v56 = vcombine.high %v6062_v34, %v6062_v34  ;;  %v6070_v14 = vrot.slane %v6062_v34, %v10751_v17  ;;  %v5910_v61 = vpop.permute.xlu1 %5909  ;;  %v6179_v21 = vunpack.i.h.s16 %v6101_v32  ;;  %v6103_v50 = vcombine.low %v5933_v0, %v5941_v8  ;;  %v7519_v0 = vld [vmem:[%s10574_s8 + $0x1] ss:$0 sm:$0xff] }
 0x604   :  { %v5926_v33 = vsel %vm597_vm0, %v10306_v40, %v5910_v61  ;;  %v7499_v22 = vpack.i.b16 %v6101_v32, %v6177_v54 }
 0x605   :  { %v6077_v15 = vrot.slane %v6063_v56, %v10751_v17  ;;  %v6078_v30 = vcombine.high %v6070_v14, %v6070_v14  ;;  %v5934_v51 = vpack.c.bf16 %v5926_v33, %v5926_v33  ;;  %v6110_v35 = vrot.slane %v6103_v50, %v10751_v17 }
 0x606   :  { %v7500_v12 = vpack.i.b16 %v6102_v49, %v6179_v21  ;;  %v6850_v56 = vrot.slane %v7519_v0, %v10751_v17 }
 0x607   :  { %v7498_v26 = vpack.i.b16 %v6094_v42, %v6078_v30  ;;  %v6306_v36 = vcombine.low %v6070_v14, %v6077_v15  ;;  %v6127_v24 = vcombine.low %v5934_v51, %v5942_v6  ;;  %v6118_v27 = vrot.slane %v6110_v35, %v10751_v17 }
 0x608   :  { %v6111_v40 = vcombine.high %v6110_v35, %v6110_v35  ;;  %v6843_v14 = vcombine.high %v7519_v0, %v7519_v0  ;;  %v6858_v61 = vcombine.high %v6850_v56, %v6850_v56  ;;  %v10424_v50 = vrot.slane %v6850_v56, %v10751_v17 }
 0x609   :  { %v6307_v39 = vcombine.low %v7498_v26, %v7499_v22  ;;  %v6322_v63 = vrot.slane %v6306_v36, %v10751_v17  ;;  %v6134_v55 = vrot.slane %v6127_v24, %v10751_v17  ;;  %v6308_v37 = vcombine.low %v7500_v12, %v6118_v27 }
 0x60a   :  { %v6126_v25 = vcombine.high %v6118_v27, %v6118_v27  ;;  %v6125_v52 = vrot.slane %v6111_v40, %v10751_v17  ;;  %v6857_v21 = vrot.slane %v6843_v14, %v10751_v17  ;;  %v10427_v33 = vrot.slane %v6858_v61, %v10751_v17 }
 0x60b   :  { %v6135_v3 = vcombine.high %v6134_v55, %v6134_v55  ;;  %v6142_v31 = vrot.slane %v6134_v55, %v10751_v17  ;;  %v6329_v53 = vrot.slane %v6307_v39, %v10751_v17  ;;  %v6336_v5 = vrot.slane %v6308_v37, %v10751_v17 }
 0x60c   :  { %v6338_v41 = vcombine.high %v6315_v19, %v6322_v63  ;;  %v6337_v58 = vcombine.low %v6315_v19, %v6322_v63  ;;  %v10431_v51 = vrot.slane %v6857_v21, %v10751_v17  ;;  %v10437_v26 = vcombine.high %v10424_v50, %v10424_v50 }
 0x60d   :  { %v6149_v7 = vrot.slane %v6135_v3, %v10751_v17  ;;  %v6187_v13 = vunpack.i.h.s16 %v6142_v31  ;;  %v7501_v62 = vpack.i.b16 %v6142_v31, %v6126_v25  ;;  %v6340_v46 = vcombine.high %v6329_v53, %v6336_v5 }
 0x60e   :  { %v6339_v57 = vcombine.low %v6329_v53, %v6336_v5  ;;  %v6150_v44 = vcombine.high %v6142_v31, %v6142_v31  ;;  %v6354_v4 = vrot.slane %v6338_v41, %v10751_v17  ;;  %v6347_v43 = vrot.slane %v6337_v58, %v10751_v17 }
 0x60f   :  { %v6189_v38 = vunpack.i.h.s16 %v6149_v7  ;;  %v6368_v16 = vrot.slane %v6340_v46, %v10751_v17  ;;  %v7502_v1 = vpack.i.b16 %v6149_v7, %v6187_v13  ;;  %v6371_v10 = vcombine.low %v6125_v52, %v7501_v62 }
 0x610   :  { %v6361_v9 = vrot.slane %v6339_v57, %v10751_v17  ;;  %v10441_v24 = vcombine.high %v10427_v33, %v10427_v33 }
 0x611   :  { %v7503_v2 = vpack.i.b16 %v6150_v44, %v6189_v38  ;;  %v6370_v47 = vcombine.low %v6354_v4, %v6368_v16  ;;  %v6379_v60 = vrot.slane %v6371_v10, %v10751_v17 }
 0x612   :  { %v6369_v59 = vcombine.low %v6347_v43, %v6361_v9 }
 0x613   :  { %v6372_v45 = vcombine.low %v7502_v1, %v7503_v2  ;;  %7517 = vmatprep.mubr.msk.bf16.mxu0 %vm597_vm0, %v6370_v47 }
 0x614   :  { %6528 = vmatmul.mubr.bf16.gmra.mxu0 %v6369_v59 }
 0x615   :  { %v6386_v18 = vrot.slane %v6372_v45, %v10751_v17 }
 0x617   :  { %v6388_v48 = vcombine.high %v6379_v60, %v6386_v18  ;;  %v6387_v11 = vcombine.low %v6379_v60, %v6386_v18 }
 0x619   :  { %v6402_v23 = vrot.slane %v6388_v48, %v10751_v17  ;;  %v6395_v42 = vrot.slane %v6387_v11, %v10751_v17 }
 0x61b   :  { %7518 = vmatprep.mubr.msk.bf16.mxu0 %vm597_vm0, %v6402_v23 }
 0x61c   :  { %6536 = vmatmul.mubr.bf16.gmra.mxu0 %v6395_v42 }
 0x691   :  { %v6521_v29 = vpop.f32.mrf.mxu0 }
 0x692   :  { %v6522_v20 = vadd.f32 %v10414_v28, %v6521_v29 }
 0x693   :  { %v6523_v32 = vpop.f32.mrf.mxu0 }
 0x694   :  { %8678 = vtanh.f32 %v6522_v20 }
 0x695   :  { %v6524_v34 = vpop.f32.mrf.mxu0 }
 0x696   :  { %v6525_v8 = vadd.f32 %v10414_v28, %v6524_v34 }
 0x697   :  { %v6526_v54 = vpop.f32.mrf.mxu0 }
 0x698   :  { %8680 = vtanh.f32 %v6525_v8 }
 0x6a1   :  { %v8679_v6 = vpop.eup %8678 }
 0x6a2   :  { %v6560_v15 = vrot.slane %v8679_v6, %v10751_v17  ;;  %v6553_v30 = vcombine.high %v8679_v6, %v8679_v6 }
 0x6a4   :  { %v6567_v49 = vrot.slane %v6553_v30, %v10751_v17  ;;  %v6568_v35 = vcombine.high %v6560_v15, %v6560_v15  ;;  %v6576_v22 = vrot.slane %v6560_v15, %v10751_v17 }
 0x6a5   :  { %v8681_v36 = vpop.eup %8680 }
 0x6a6   :  { %v6602_v12 = vcombine.high %v8681_v36, %v8681_v36  ;;  %v6583_v27 = vrot.slane %v6567_v49, %v10751_v17  ;;  %v6590_v39 = vrot.slane %v6568_v35, %v10751_v17  ;;  %v6598_v63 = vcombine.high %v6576_v22, %v6576_v22 }
 0x6a7   :  { %v6887_v55 = vmul.f32 %v10424_v50, %v6576_v22  ;;  %v6569_v40 = vcombine.high %v6567_v49, %v6567_v49  ;;  %v6609_v37 = vrot.slane %v8681_v36, %v10751_v17 }
 0x6a8   :  { %v6600_v19 = vcombine.high %v6590_v39, %v6590_v39  ;;  %v6888_v25 = vmul.f32 %v10427_v33, %v6590_v39  ;;  %v6889_v3 = vmul.f32 %v10437_v26, %v6598_v63  ;;  %v6891_v31 = vmul.f32 %v10431_v51, %v6583_v27 }
 0x6a9   :  { %v6599_v53 = vcombine.high %v6583_v27, %v6583_v27  ;;  %v6597_v5 = vrot.slane %v6569_v40, %v10751_v17  ;;  %v6617_v41 = vcombine.high %v6609_v37, %v6609_v37  ;;  %v6625_v58 = vrot.slane %v6609_v37, %v10751_v17 }
 0x6aa   :  { %v6890_v7 = vmul.f32 %v10441_v24, %v6600_v19  ;;  %v6967_v13 = vcombine.low %v6887_v55, %v6888_v25  ;;  %v6989_v62 = vrot.slane %v6891_v31, %v10751_v17  ;;  %v6616_v46 = vrot.slane %v6602_v12, %v10751_v17 }
 0x6ab   :  { %v6601_v57 = vcombine.high %v6597_v5, %v6597_v5  ;;  %v6639_v52 = vrot.slane %v6617_v41, %v10751_v17  ;;  %v6892_v44 = vmul.f32 %v10424_v50, %v6597_v5  ;;  %v6893_v38 = vmul.f32 %v10427_v33, %v6599_v53 }
 0x6ac   :  { %v6968_v4 = vcombine.low %v6889_v3, %v6890_v7  ;;  %v6975_v16 = vrot.slane %v6967_v13, %v10751_v17  ;;  %v6895_v43 = vmul.f32 %v10441_v24, %v6625_v58  ;;  %v6618_v59 = vcombine.high %v6616_v46, %v6616_v46 }
 0x6ad   :  { %v6649_v9 = vcombine.high %v6639_v52, %v6639_v52  ;;  %v6894_v1 = vmul.f32 %v10437_v26, %v6601_v57  ;;  %v6896_v2 = vmul.f32 %v10431_v51, %v6639_v52  ;;  %v7006_v10 = vcombine.low %v6892_v44, %v6893_v38 }
 0x6ae   :  { %v6982_v47 = vrot.slane %v6968_v4, %v10751_v17  ;;  %v6632_v45 = vrot.slane %v6616_v46, %v10751_v17  ;;  %v6647_v60 = vcombine.high %v6625_v58, %v6625_v58  ;;  %v7004_v18 = vrot.slane %v6989_v62, %v10751_v17 }
 0x6af   :  { %v7007_v48 = vcombine.low %v6894_v1, %v6895_v43  ;;  %v6898_v11 = vmul.f32 %v10427_v33, %v6649_v9  ;;  %v6646_v42 = vrot.slane %v6618_v59, %v10751_v17  ;;  %v7014_v32 = vrot.slane %v7006_v10, %v10751_v17 }
 0x6b0   :  { %v6990_v23 = vcombine.low %v6975_v16, %v6982_v47  ;;  %v6648_v29 = vcombine.high %v6632_v45, %v6632_v45  ;;  %v6897_v20 = vmul.f32 %v10424_v50, %v6647_v60  ;;  %v7028_v8 = vrot.slane %v6896_v2, %v10751_v17 }
 0x6b1   :  { %v7021_v34 = vrot.slane %v7007_v48, %v10751_v17  ;;  %v6899_v0 = vmul.f32 %v10437_v26, %v6632_v45  ;;  %v6900_v56 = vmul.f32 %v10441_v24, %v6646_v42  ;;  %v6650_v38 = vcombine.high %v6646_v42, %v6646_v42 }
 0x6b2   :  { %v6997_v54 = vrot.slane %v6990_v23, %v10751_v17  ;;  %v6901_v14 = vmul.f32 %v10431_v51, %v6648_v29  ;;  %v7045_v61 = vcombine.low %v6897_v20, %v6898_v11  ;;  %v7043_v35 = vrot.slane %v7028_v8, %v10751_v17 }
 0x6b3   :  { %v7029_v21 = vcombine.low %v7014_v32, %v7021_v34  ;;  %v7046_v15 = vcombine.low %v6899_v0, %v6900_v56 }
 0x6b4   :  { %v7005_v6 = vcombine.low %v6997_v54, %v7004_v18  ;;  %v7053_v30 = vrot.slane %v7045_v61, %v10751_v17  ;;  %v7067_v12 = vrot.slane %v6901_v14, %v10751_v17 }
 0x6b5   :  { %v7036_v49 = vrot.slane %v7029_v21, %v10751_v17  ;;  %v7060_v36 = vrot.slane %v7046_v15, %v10751_v17 }
 0x6b6   :  { %v7288_v22 = vsel %vm7287_vm3, %v7005_v6, 0.0  ;;  %v7082_v40 = vrot.slane %v7067_v12, %v10751_v17 }
 0x6b7   :  { %7289 = vadd.xlane.f32.xlu1 %v7288_v22  ;;  %v7044_v27 = vcombine.low %v7036_v49, %v7043_v35  ;;  %v7068_v39 = vcombine.low %v7053_v30, %v7060_v36 }
 0x6b9   :  { %v7291_v63 = vsel %vm7287_vm3, %v7044_v27, 0.0  ;;  %v7075_v55 = vrot.slane %v7068_v39, %v10751_v17 }
 0x6ba   :  { %7292 = vadd.xlane.f32.xlu0 %v7291_v63 }
 0x6bb   :  { %v7083_v37 = vcombine.low %v7075_v55, %v7082_v40 }
 0x6bd   :  { %v7294_v19 = vsel %vm7287_vm3, %v7083_v37, 0.0 }
 0x6be   :  { %7295 = vadd.xlane.f32.xlu1 %v7294_v19 }
 0x6d4   :  { %v6529_v25 = vpop.f32.mrf.mxu0 }
 0x6d5   :  { %v6530_v3 = vadd.f32 %v10414_v28, %v6529_v25 }
 0x6d6   :  { %v6531_v31 = vpop.f32.mrf.mxu0 }
 0x6d7   :  { %8682 = vtanh.f32 %v6530_v3 }
 0x6d8   :  { %v6532_v53 = vpop.f32.mrf.mxu0 }
 0x6d9   :  { %v6533_v5 = vadd.f32 %v10414_v28, %v6532_v53 }
 0x6da   :  { %v6534_v41 = vpop.f32.mrf.mxu0 }
 0x6db   :  { %8684 = vtanh.f32 %v6533_v5 }
 0x6dc   :  { %v6537_v58 = vpop.f32.mrf.mxu0 }
 0x6dd   :  { %v6538_v7 = vadd.f32 %v10414_v28, %v6537_v58  ;;  %v6902_v28 = vmul.f32 %v10424_v50, %v6650_v38 }
 0x6de   :  { %v6539_v13 = vpop.f32.mrf.mxu0 }
 0x6df   :  { %8686 = vtanh.f32 %v6538_v7 }
 0x6e0   :  { %v6540_v62 = vpop.f32.mrf.mxu0 }
 0x6e2   :  { %v6541_v46 = vpop.f32.mrf.mxu0 }
 0x6e4   :  { %v8683_v57 = vpop.eup %8682 }
 0x6e5   :  { %v6651_v52 = vcombine.high %v8683_v57, %v8683_v57  ;;  %v6658_v44 = vrot.slane %v8683_v57, %v10751_v17 }
 0x6e7   :  { %v6666_v4 = vcombine.high %v6658_v44, %v6658_v44  ;;  %v6674_v16 = vrot.slane %v6658_v44, %v10751_v17  ;;  %v6665_v43 = vrot.slane %v6651_v52, %v10751_v17 }
 0x6e8   :  { %v8685_v9 = vpop.eup %8684 }
 0x6e9   :  { %v6688_v1 = vrot.slane %v6666_v4, %v10751_v17  ;;  %v6696_v2 = vcombine.high %v6674_v16, %v6674_v16  ;;  %v6903_v10 = vmul.f32 %v10427_v33, %v6674_v16  ;;  %v6700_v47 = vcombine.high %v8685_v9, %v8685_v9 }
 0x6ea   :  { %v6667_v59 = vcombine.high %v6665_v43, %v6665_v43  ;;  %v6681_v45 = vrot.slane %v6665_v43, %v10751_v17  ;;  %v6707_v60 = vrot.slane %v8685_v9, %v10751_v17 }
 0x6eb   :  { %v6698_v18 = vcombine.high %v6688_v1, %v6688_v1  ;;  %v6904_v48 = vmul.f32 %v10437_v26, %v6688_v1  ;;  %v6905_v11 = vmul.f32 %v10441_v24, %v6696_v2  ;;  %v7084_v23 = vcombine.low %v6902_v28, %v6903_v10 }
 0x6ec   :  { %v6695_v42 = vrot.slane %v6667_v59, %v10751_v17  ;;  %v6697_v29 = vcombine.high %v6681_v45, %v6681_v45  ;;  %v6715_v20 = vcombine.high %v6707_v60, %v6707_v60  ;;  %v6723_v32 = vrot.slane %v6707_v60, %v10751_v17  ;;  %v8687_v54 = vpop.eup %8686 }
 0x6ed   :  { %v6906_v34 = vmul.f32 %v10431_v51, %v6698_v18  ;;  %v7085_v8 = vcombine.low %v6904_v48, %v6905_v11  ;;  %v7092_v0 = vrot.slane %v7084_v23, %v10751_v17  ;;  %v6907_v61 = vmul.f32 %v10424_v50, %v6681_v45 }
 0x6ee   :  { %v6699_v56 = vcombine.high %v6695_v42, %v6695_v42  ;;  %v6745_v14 = vcombine.high %v6723_v32, %v6723_v32  ;;  %v6908_v21 = vmul.f32 %v10427_v33, %v6695_v42  ;;  %v6909_v30 = vmul.f32 %v10437_v26, %v6697_v29 }
 0x6ef   :  { %v7099_v6 = vrot.slane %v7085_v8, %v10751_v17  ;;  %v7106_v15 = vrot.slane %v6906_v34, %v10751_v17  ;;  %v6911_v49 = vmul.f32 %v10431_v51, %v6723_v32  ;;  %v6714_v36 = vrot.slane %v6700_v47, %v10751_v17 }
 0x6f0   :  { %v6910_v35 = vmul.f32 %v10441_v24, %v6699_v56  ;;  %v7123_v22 = vcombine.low %v6907_v61, %v6908_v21  ;;  %v6737_v12 = vrot.slane %v6715_v20, %v10751_v17  ;;  %v6749_v27 = vcombine.high %v8687_v54, %v8687_v54 }
 0x6f1   :  { %v7107_v39 = vcombine.low %v7092_v0, %v7099_v6  ;;  %v7121_v63 = vrot.slane %v7106_v15, %v10751_v17  ;;  %v6913_v55 = vmul.f32 %v10427_v33, %v6745_v14  ;;  %v7145_v37 = vrot.slane %v6911_v49, %v10751_v17 }
 0x6f2   :  { %v7124_v40 = vcombine.low %v6909_v30, %v6910_v35  ;;  %v6716_v19 = vcombine.high %v6714_v36, %v6714_v36  ;;  %v6730_v25 = vrot.slane %v6714_v36, %v10751_v17  ;;  %v7131_v31 = vrot.slane %v7123_v22, %v10751_v17 }
 0x6f3   :  { %v7114_v3 = vrot.slane %v7107_v39, %v10751_v17  ;;  %v6747_v53 = vcombine.high %v6737_v12, %v6737_v12  ;;  %v6912_v5 = vmul.f32 %v10424_v50, %v6737_v12  ;;  %v6756_v52 = vrot.slane %v8687_v54, %v10751_v17 }
 0x6f4   :  { %v7138_v41 = vrot.slane %v7124_v40, %v10751_v17  ;;  %v6744_v58 = vrot.slane %v6716_v19, %v10751_v17  ;;  %v6915_v7 = vmul.f32 %v10441_v24, %v6730_v25  ;;  %v6746_v13 = vcombine.high %v6730_v25, %v6730_v25 }
 0x6f5   :  { %v7122_v62 = vcombine.low %v7114_v3, %v7121_v63  ;;  %v6914_v46 = vmul.f32 %v10437_v26, %v6747_v53  ;;  %v7162_v57 = vcombine.low %v6912_v5, %v6913_v55  ;;  %v7160_v38 = vrot.slane %v7145_v37, %v10751_v17 }
 0x6f6   :  { %v7146_v44 = vcombine.low %v7131_v31, %v7138_v41  ;;  %v6748_v4 = vcombine.high %v6744_v58, %v6744_v58  ;;  %v6916_v16 = vmul.f32 %v10431_v51, %v6744_v58  ;;  %v6764_v1 = vcombine.high %v6756_v52, %v6756_v52 }
 0x6f7   :  { %v7297_v43 = vsel %vm7287_vm3, %v7122_v62, 0.0  ;;  %v7163_v9 = vcombine.low %v6914_v46, %v6915_v7  ;;  %v6917_v2 = vmul.f32 %v10424_v50, %v6746_v13  ;;  %v6772_v47 = vrot.slane %v6756_v52, %v10751_v17  ;;  %v7520_v13 = vld [vmem:[#allocation2] ss:$0 sm:$0xff] }
 0x6f8   :  { %7298 = vadd.xlane.f32.xlu1 %v7297_v43  ;;  %v7153_v28 = vrot.slane %v7146_v44, %v10751_v17  ;;  %v7184_v10 = vrot.slane %v6916_v16, %v10751_v17  ;;  %v6918_v59 = vmul.f32 %v10427_v33, %v6748_v4  ;;  %v7170_v45 = vrot.slane %v7162_v57, %v10751_v17 }
 0x6f9   :  { %v7177_v60 = vrot.slane %v7163_v9, %v10751_v17  ;;  %v6786_v18 = vrot.slane %v6764_v1, %v10751_v17  ;;  %v6763_v48 = vrot.slane %v6749_v27, %v10751_v17  ;;  %v6794_v42 = vcombine.high %v6772_v47, %v6772_v47  ;;  %v10753_v9 = vld [vmem:[#allocation13_spill] sm:$0xff] }
 0x6fa   :  { %v7161_v11 = vcombine.low %v7153_v28, %v7160_v38  ;;  %v7199_v23 = vrot.slane %v7184_v10, %v10751_v17  ;;  %v6919_v29 = vmul.f32 %v10437_v26, %v6772_v47  ;;  %v7201_v34 = vcombine.low %v6917_v2, %v6918_v59 }
 0x6fb   :  { %v7185_v20 = vcombine.low %v7170_v45, %v7177_v60  ;;  %v6920_v32 = vmul.f32 %v10441_v24, %v6786_v18  ;;  %v6765_v8 = vcombine.high %v6763_v48, %v6763_v48  ;;  %v6921_v54 = vmul.f32 %v10431_v51, %v6794_v42 }
 0x6fc   :  { %v7300_v0 = vsel %vm7287_vm3, %v7161_v11, 0.0  ;;  %v6779_v56 = vrot.slane %v6763_v48, %v10751_v17  ;;  %v6796_v14 = vcombine.high %v6786_v18, %v6786_v18  ;;  %v7209_v6 = vrot.slane %v7201_v34, %v10751_v17 }
 0x6fd   :  { %7301 = vadd.xlane.f32.xlu0 %v7300_v0  ;;  %v7192_v61 = vrot.slane %v7185_v20, %v10751_v17  ;;  %v7202_v21 = vcombine.low %v6919_v29, %v6920_v32  ;;  %v6793_v15 = vrot.slane %v6765_v8, %v10751_v17  ;;  %v7223_v30 = vrot.slane %v6921_v54, %v10751_v17 }
 0x6fe   :  { %v6795_v49 = vcombine.high %v6779_v56, %v6779_v56  ;;  %v6922_v35 = vmul.f32 %v10424_v50, %v6796_v14  ;;  %v6923_v22 = vmul.f32 %v10427_v33, %v6779_v56  ;;  %v10752_v38 = vlaneseq }
 0x6ff   :  { %v7200_v36 = vcombine.low %v7192_v61, %v7199_v23  ;;  %v7216_v12 = vrot.slane %v7202_v21, %v10751_v17  ;;  %v6797_v27 = vcombine.high %v6793_v15, %v6793_v15  ;;  %v6924_v39 = vmul.f32 %v10437_v26, %v6793_v15 }
 0x700   :  { %v6925_v63 = vmul.f32 %v10441_v24, %v6795_v49  ;;  %v7240_v55 = vcombine.low %v6922_v35, %v6923_v22  ;;  %v7238_v3 = vrot.slane %v7223_v30, %v10751_v17  ;;  %v7339_v4 = vand.u32 127, %v10752_v38 }
 0x701   :  { %v7303_v40 = vsel %vm7287_vm3, %v7200_v36, 0.0  ;;  %v7224_v37 = vcombine.low %v7209_v6, %v7216_v12  ;;  %v6926_v19 = vmul.f32 %v10431_v51, %v6797_v27 }
 0x702   :  { %7304 = vadd.xlane.f32.xlu1 %v7303_v40  ;;  %v7241_v25 = vcombine.low %v6924_v39, %v6925_v63  ;;  %v7248_v50 = vrot.slane %v7240_v55, %v10751_v17  ;;  %v7342_v1 = vsub.s32 %v7339_v4, %v10753_v9 }
 0x703   :  { %v7231_v33 = vrot.slane %v7224_v37, %v10751_v17  ;;  %v7262_v26 = vrot.slane %v6926_v19, %v10751_v17 }
 0x704   :  { %v7255_v31 = vrot.slane %v7241_v25, %v10751_v17 }
 0x705   :  { %v7239_v53 = vcombine.low %v7231_v33, %v7238_v3  ;;  %v7277_v51 = vrot.slane %v7262_v26, %v10751_v17 }
 0x706   :  { %v7263_v24 = vcombine.low %v7248_v50, %v7255_v31 }
 0x707   :  { %v7306_v5 = vsel %vm7287_vm3, %v7239_v53, 0.0 }
 0x708   :  { %7307 = vadd.xlane.f32.xlu0 %v7306_v5  ;;  %v7270_v41 = vrot.slane %v7263_v24, %v10751_v17 }
 0x70a   :  { %v7278_v58 = vcombine.low %v7270_v41, %v7277_v51 }
 0x70c   :  { %v7309_v7 = vsel %vm7287_vm3, %v7278_v58, 0.0 }
 0x70d   :  { %7310 = vadd.xlane.f32.xlu1 %v7309_v7 }
 0x71e   :  { %7319 = vperm.xlu0 %8233, %v7520_v13  }
 0x740   :  { %v7290_v62 = vpop.xlane.xlu1 %7289 }
 0x743   :  { %v7293_v46 = vpop.xlane.xlu0 %7292 }
 0x747   :  { %v7296_v57 = vpop.xlane.xlu1 %7295 }
 0x781   :  { %v7299_v44 = vpop.xlane.xlu1 %7298 }
 0x786   :  { %v7302_v52 = vpop.xlane.xlu0 %7301 }
 0x78b   :  { %v7305_v43 = vpop.xlane.xlu1 %7304 }
 0x791   :  { %v7308_v16 = vpop.xlane.xlu0 %7307 }
 0x796   :  { %v7311_v11 = vpop.xlane.xlu1 %7310 }
 0x799   :  { %v7320_v2 = vpop.permute.xlu0 %7319 }
 0x79a   :  { %v7322_v28 = vadd.f32 %v7320_v2, %v7290_v62  ;;  %v7323_v17 = vadd.f32 %v7320_v2, %v7293_v46  ;;  %v7324_v10 = vadd.f32 %v7320_v2, %v7296_v57  ;;  %v7325_v47 = vadd.f32 %v7320_v2, %v7299_v44 }
 0x79b   :  { %v7326_v59 = vadd.f32 %v7320_v2, %v7302_v52  ;;  %v7327_v45 = vadd.f32 %v7320_v2, %v7305_v43  ;;  %v7328_v23 = vadd.f32 %v7320_v2, %v7308_v16  ;;  %v7329_v42 = vadd.f32 %v7320_v2, %v7311_v11 }
 0x79c   :  { %v7343_v60 = vrot.slane %v7322_v28, %v7342_v1  ;;  %v7347_v18 = vrot.slane %v7323_v17, %v7342_v1  ;;  %v7351_v48 = vrot.slane %v7324_v10, %v7342_v1  ;;  %v7355_v29 = vrot.slane %v7325_v47, %v7342_v1 }
 0x79d   :  { %v7359_v32 = vrot.slane %v7326_v59, %v7342_v1  ;;  %v7363_v8 = vrot.slane %v7327_v45, %v7342_v1  ;;  %v7367_v54 = vrot.slane %v7328_v23, %v7342_v1  ;;  %v7371_v14 = vrot.slane %v7329_v42, %v7342_v1 }
 0x79e   :  { %v7373_v20 = vsel %vm7372_vm4, %v7347_v18, %v7343_v60 }
 0x79f   :  { %v7375_v34 = vsel %vm7374_vm5, %v7351_v48, %v7373_v20 }
 0x7a0   :  { %v7377_v0 = vsel %vm7376_vm6, %v7355_v29, %v7375_v34 }
 0x7a1   :  { %v7379_v56 = vsel %vm7378_vm7, %v7359_v32, %v7377_v0 }
 0x7a2   :  { %v7381_v61 = vsel %vm7380_vm8, %v7363_v8, %v7379_v56 }
 0x7a3   :  { %v7383_v21 = vsel %vm7382_vm9, %v7367_v54, %v7381_v61 }
 0x7a4   :  { %v7385_v6 = vsel %vm7384_vm10, %v7371_v14, %v7383_v21 }
 0x7a5   :  { %7388 = vst.msk [vmem:[%s10576_s10] sm:$0xff] %vm7387_vm11, %v7385_v6 }
 0x7a6   :  { %7393 = vsyncpa [#allocation4], 1 }
 0x7a7   :  { %7394 = vsyncpa [#allocation6], 1 }
 0x7a8   :  { %7395 = vsyncpa [#allocation9], 1 }

</bundles_post_ra>
